<compile_context>
chip_gen: v6e
topology: v6e:2x2x1
jax: 0.10.0
libtpu: 0.0.40
codegen_flags: <defaults>
</compile_context>

<pallas_src>
import math
import functools

import jax
import jax.numpy as jnp
from jax.experimental import pallas as pl
from jax.experimental.pallas import tpu as pltpu


# ------------------------------ fused kernel ------------------------------

def _transformer6_kernel(src_ids_ref, tgt_ids_ref, pe_ref, emb_ref, emb_t_ref,
                         out_b_ref, hsel_ref, hselt_ref,
                         wq_ref, bq_ref, wk_ref, bk_ref, wv_ref, bv_ref,
                         wo_ref, bo_ref, g1_ref, b1_ref,
                         w1_ref, fb1_ref, w2_ref, fb2_ref, g2_ref, b2_ref,
                         logits_ref, mem_ref, *, T, N, L, eps):
    """Whole Transformer6 forward (dropout == identity) in one kernel.

    Encoder activation x is (T*N, E) with time-major rows: row = t*N + n.
    """
    V, E = emb_ref.shape
    M = T * N
    Mt = tgt_ids_ref.shape[0]
    H = hsel_ref.shape[1]

    emb = emb_ref[...]                                            # (V, E) f32

    # --- src embedding as a one-hot matmul + positional encoding (in-kernel)
    lane_v = jax.lax.broadcasted_iota(jnp.int32, (M, V), 1)
    onehot_src = (lane_v == src_ids_ref[...]).astype(jnp.float32)     # (M, V)
    x = jnp.dot(onehot_src, emb, preferred_element_type=jnp.float32)  # (M, E)
    x = (x.reshape(T, N, E) + pe_ref[...].reshape(T, 1, E)).reshape(M, E)

    hsel = hsel_ref[...]                                          # (E, H)
    hselt = hselt_ref[...]                                        # (H, E)

    for l in range(L):   # L = 2, Python-unrolled; all weights resident in VMEM
        # ---- self-attention: only the seq-position-0 query row survives ----
        x0 = x[0:N, :]                                            # (N, E)
        q0 = jnp.dot(x0, wq_ref[l],
                     preferred_element_type=jnp.float32) + bq_ref[l]   # pre-scaled
        k = jnp.dot(x, wk_ref[l],
                    preferred_element_type=jnp.float32) + bk_ref[l]    # (M, E)
        v = jnp.dot(x, wv_ref[l],
                    preferred_element_type=jnp.float32) + bv_ref[l]    # (M, E)

        # Per-head scores for every (batch, head) at once:
        #   s[t*N+n, h] = sum_{e in head h} q0[n, e] * k[t*N+n, e]
        prod = (k.reshape(T, N, E) * q0).reshape(M, E)
        s = jnp.dot(prod, hsel, preferred_element_type=jnp.float32)    # (M, H)

        # Softmax over the T (sequence) axis per (batch, head).
        s3 = s.reshape(T, N, H)
        s3 = s3 - jnp.max(s3, axis=0, keepdims=True)
        p = jnp.exp(s3)
        p = p / jnp.sum(p, axis=0, keepdims=True)                      # exact

        # Weighted-V and out-projection, all heads at once.
        p_exp = jnp.dot(p.reshape(M, H), hselt,
                        preferred_element_type=jnp.float32)            # (M, E)
        attn = jnp.sum((p_exp * v).reshape(T, N, E), axis=0)           # (N, E)
        proj = jnp.dot(attn, wo_ref[l],
                       preferred_element_type=jnp.float32) + bo_ref[l]  # (N, E)

        # ---- residual (position-0 row broadcast over T) + LayerNorm1 ----
        y = (x.reshape(T, N, E) + proj).reshape(M, E)
        mu = jnp.mean(y, axis=-1, keepdims=True)
        var = jnp.mean(jnp.square(y - mu), axis=-1, keepdims=True)
        y = (y - mu) * jax.lax.rsqrt(var + eps) * g1_ref[l] + b1_ref[l]

        # ---- FFN: bf16 weights, f32 accumulation; hidden never leaves VMEM --
        h1 = jnp.dot(y.astype(jnp.bfloat16), w1_ref[l],
                     preferred_element_type=jnp.float32) + fb1_ref[l]
        h1 = jnp.maximum(h1, 0.0)
        f = jnp.dot(h1.astype(jnp.bfloat16), w2_ref[l],
                    preferred_element_type=jnp.float32) + fb2_ref[l]

        # ---- residual + LayerNorm2 ----
        z = y + f
        mu2 = jnp.mean(z, axis=-1, keepdims=True)
        var2 = jnp.mean(jnp.square(z - mu2), axis=-1, keepdims=True)
        x = (z - mu2) * jax.lax.rsqrt(var2 + eps) * g2_ref[l] + b2_ref[l]

    mem_ref[...] = x

    # --- decoder is identity -> logits = embedding(tgt) @ emb^T + output_bias
    lane_vt = jax.lax.broadcasted_iota(jnp.int32, (Mt, V), 1)
    onehot_tgt = (lane_vt == tgt_ids_ref[...]).astype(jnp.float32)     # (Mt, V)
    tgt_emb = jnp.dot(onehot_tgt, emb, preferred_element_type=jnp.float32)
    logits_ref[...] = (jnp.dot(tgt_emb, emb_t_ref[...],
                               preferred_element_type=jnp.float32) + out_b_ref[...])


def _full_block(shape):
    nd = len(shape)
    return pl.BlockSpec(shape, lambda i, _n=nd: (0,) * _n)


def transformer6_forward(params, src_ids, tgt_ids, nhead):
    del nhead  # head structure is baked into the static hsel matrices
    T, N = src_ids.shape
    Tt, Nt = tgt_ids.shape
    emb = params["embedding"]
    V, E = emb.shape
    L = params["wq"].shape[0]

    src_flat = src_ids.reshape(T * N, 1).astype(jnp.int32)       # time-major rows
    tgt_flat = tgt_ids.reshape(Tt * Nt, 1).astype(jnp.int32)
    pe = params["pos_enc"][:T]                                    # (T, E); ref needs T == max_len

    ins = (src_flat, tgt_flat, pe, emb, params["emb_t"], params["output_bias"],
           params["hsel"], params["hsel_t"],
           params["wq"], params["bq"], params["wk"], params["bk"],
           params["wv"], params["bv"], params["wo"], params["bo"],
           params["g1"], params["b1"], params["w1"], params["fb1"],
           params["w2"], params["fb2"], params["g2"], params["b2"])

    kern = functools.partial(_transformer6_kernel, T=T, N=N, L=L, eps=1e-5)
    logits2d, mem2d = pl.pallas_call(
        kern,
        grid=(1,),
        in_specs=[_full_block(a.shape) for a in ins],
        out_specs=(_full_block((Tt * Nt, V)), _full_block((T * N, E))),
        out_shape=(jax.ShapeDtypeStruct((Tt * Nt, V), jnp.float32),
                   jax.ShapeDtypeStruct((T * N, E), jnp.float32)),
        compiler_params=pltpu.CompilerParams(dimension_semantics=("arbitrary",)),
    )(*ins)

    logits = logits2d.reshape(Tt, Nt, V)
    # `memory` is computed (and discarded) by the reference module; returned
    # here so the encoder math stays observable.
    memory = mem2d.reshape(T, N, E)
    return logits, memory


# ------------------------------- params -----------------------------------

def make_positional_encoding(max_len, d_model):
    position = jnp.arange(max_len, dtype=jnp.float32)[:, None]
    div_term = jnp.exp(jnp.arange(0, d_model, 2, dtype=jnp.float32)
                       / d_model * math.log(1.0 / 10000.0))
    pe = jnp.zeros((max_len, d_model), jnp.float32)
    pe = pe.at[:, 0::2].set(jnp.sin(position * div_term))
    pe = pe.at[:, 1::2].set(jnp.cos(position * div_term))
    return pe - jnp.mean(pe)          # reference subtracts the global mean


def _xavier(key, shape):
    fan_out, fan_in = shape
    a = math.sqrt(6.0 / (fan_in + fan_out))
    return jax.random.uniform(key, shape, jnp.float32, -a, a)


def init_params(key, d_model, nhead, vocab_size, max_len, num_enc_layers,
                dim_ff=2048):
    hd = d_model // nhead
    scale = float(hd) ** -0.5
    k_emb, k_bias, k_layers = jax.random.split(key, 3)
    emb = 0.1 * jax.random.normal(k_emb, (vocab_size, d_model), jnp.float32)
    bound = 1.0 / math.sqrt(d_model)

    # Static head-selection matrix: hsel[e, h] = 1 iff lane e belongs to head h.
    e_idx = jnp.arange(d_model) // hd
    hsel = (e_idx[:, None] == jnp.arange(nhead)[None, :]).astype(jnp.float32)

    params = {
        "embedding": emb,                                   # (V, E) lookup table
        "emb_t": jnp.transpose(emb),                        # (E, V) pre-transposed once
        "output_bias": jax.random.uniform(k_bias, (1, vocab_size), jnp.float32,
                                          -bound, bound),
        "pos_enc": make_positional_encoding(max_len, d_model),   # (max_len, E)
        "hsel": hsel,                                       # (E, H)
        "hsel_t": jnp.transpose(hsel),                      # (H, E)
    }

    per_layer = []
    for lk in jax.random.split(k_layers, num_enc_layers):
        ks = jax.random.split(lk, 6)
        q_w = _xavier(ks[0], (d_model, d_model))
        k_w = _xavier(ks[1], (d_model, d_model))
        v_w = _xavier(ks[2], (d_model, d_model))
        out_w = _xavier(ks[3], (d_model, d_model))
        lin1_w = _xavier(ks[4], (dim_ff, d_model))
        lin2_w = _xavier(ks[5], (d_model, dim_ff))
        zrow = jnp.zeros((1, d_model), jnp.float32)
        per_layer.append(dict(
            # Pre-transposed (in, out) layouts; hd**-0.5 folded into Wq
            # (exact: the reference q_bias is initialised to zero).
            wq=q_w.T * scale, bq=zrow,
            wk=k_w.T, bk=zrow,
            wv=v_w.T, bv=zrow,
            wo=out_w.T, bo=zrow,
            g1=jnp.ones((1, d_model), jnp.float32), b1=zrow,
            w1=lin1_w.T.astype(jnp.bfloat16),               # (E, FF) bf16
            fb1=jnp.zeros((1, dim_ff), jnp.float32),
            w2=lin2_w.T.astype(jnp.bfloat16),               # (FF, E) bf16
            fb2=zrow,
            g2=jnp.ones((1, d_model), jnp.float32), b2=zrow,
        ))
    # Stack across layers -> (L, ...): one pallas_call holds all weights in VMEM.
    for name in per_layer[0]:
        params[name] = jnp.stack([lp[name] for lp in per_layer])
    return params


# ------------------------------- main --------------------------------------

if __name__ == "__main__":
    d_model, nhead = 32, 4
    vocab_size, max_len = 128, 8
    batch = 2
    tgt_len = 8
    num_encoder_layers = 2   # (constructor arg; decoder layers are dead code)

    key = jax.random.PRNGKey(0)
    k_params, k_src, k_tgt = jax.random.split(key, 3)
    params = init_params(k_params, d_model, nhead, vocab_size, max_len,
                         num_encoder_layers)

    src = jax.random.randint(k_src, (max_len, batch), 0, vocab_size, jnp.int32)
    tgt = jax.random.randint(k_tgt, (tgt_len, batch), 0, vocab_size, jnp.int32)

    fwd = jax.jit(lambda p, s, t: transformer6_forward(p, s, t, nhead))
    logits, memory = fwd(params, src, tgt)
    jax.block_until_ready((logits, memory))

    assert logits.shape == (tgt_len, batch, vocab_size)
    assert logits.dtype == jnp.float32
    assert memory.shape == (max_len, batch, d_model)
    assert bool(jnp.all(jnp.isfinite(logits)))
    assert bool(jnp.all(jnp.isfinite(memory)))
    print("KERNEL_OK")
</pallas_src>

<mosaic_0001>
module attributes {stable_mosaic.version = 11 : i64} {
  func.func @_transformer6_kernel(%arg0: i32, %arg1: memref<16x1xi32, #tpu.memory_space<vmem>>, %arg2: memref<16x1xi32, #tpu.memory_space<vmem>>, %arg3: memref<8x32xf32, #tpu.memory_space<vmem>>, %arg4: memref<128x32xf32, #tpu.memory_space<vmem>>, %arg5: memref<32x128xf32, #tpu.memory_space<vmem>>, %arg6: memref<1x128xf32, #tpu.memory_space<vmem>>, %arg7: memref<32x4xf32, #tpu.memory_space<vmem>>, %arg8: memref<4x32xf32, #tpu.memory_space<vmem>>, %arg9: memref<2x32x32xf32, #tpu.memory_space<vmem>>, %arg10: memref<2x1x32xf32, #tpu.memory_space<vmem>>, %arg11: memref<2x32x32xf32, #tpu.memory_space<vmem>>, %arg12: memref<2x1x32xf32, #tpu.memory_space<vmem>>, %arg13: memref<2x32x32xf32, #tpu.memory_space<vmem>>, %arg14: memref<2x1x32xf32, #tpu.memory_space<vmem>>, %arg15: memref<2x32x32xf32, #tpu.memory_space<vmem>>, %arg16: memref<2x1x32xf32, #tpu.memory_space<vmem>>, %arg17: memref<2x1x32xf32, #tpu.memory_space<vmem>>, %arg18: memref<2x1x32xf32, #tpu.memory_space<vmem>>, %arg19: memref<2x32x2048xbf16, #tpu.memory_space<vmem>>, %arg20: memref<2x1x2048xf32, #tpu.memory_space<vmem>>, %arg21: memref<2x2048x32xbf16, #tpu.memory_space<vmem>>, %arg22: memref<2x1x32xf32, #tpu.memory_space<vmem>>, %arg23: memref<2x1x32xf32, #tpu.memory_space<vmem>>, %arg24: memref<2x1x32xf32, #tpu.memory_space<vmem>>, %arg25: memref<16x128xf32, #tpu.memory_space<vmem>>, %arg26: memref<16x32xf32, #tpu.memory_space<vmem>>) attributes {dimension_semantics = [#tpu.dimension_semantics<arbitrary>], iteration_bounds = array<i64: 1>, scalar_prefetch = 0 : i64, scratch_operands = 0 : i64, tpu.core_type = #tpu.core_type<tc>, window_params = [{pipeline_mode = #tpu.pipeline_mode<synchronous>, transform_indices = @transform_0, window_bounds = array<i64: 16, 1>}, {pipeline_mode = #tpu.pipeline_mode<synchronous>, transform_indices = @transform_1, window_bounds = array<i64: 16, 1>}, {pipeline_mode = #tpu.pipeline_mode<synchronous>, transform_indices = @transform_2, window_bounds = array<i64: 8, 32>}, {pipeline_mode = #tpu.pipeline_mode<synchronous>, transform_indices = @transform_3, window_bounds = array<i64: 128, 32>}, {pipeline_mode = #tpu.pipeline_mode<synchronous>, transform_indices = @transform_4, window_bounds = array<i64: 32, 128>}, {pipeline_mode = #tpu.pipeline_mode<synchronous>, transform_indices = @transform_5, window_bounds = array<i64: 1, 128>}, {pipeline_mode = #tpu.pipeline_mode<synchronous>, transform_indices = @transform_6, window_bounds = array<i64: 32, 4>}, {pipeline_mode = #tpu.pipeline_mode<synchronous>, transform_indices = @transform_7, window_bounds = array<i64: 4, 32>}, {pipeline_mode = #tpu.pipeline_mode<synchronous>, transform_indices = @transform_8, window_bounds = array<i64: 2, 32, 32>}, {pipeline_mode = #tpu.pipeline_mode<synchronous>, transform_indices = @transform_9, window_bounds = array<i64: 2, 1, 32>}, {pipeline_mode = #tpu.pipeline_mode<synchronous>, transform_indices = @transform_10, window_bounds = array<i64: 2, 32, 32>}, {pipeline_mode = #tpu.pipeline_mode<synchronous>, transform_indices = @transform_11, window_bounds = array<i64: 2, 1, 32>}, {pipeline_mode = #tpu.pipeline_mode<synchronous>, transform_indices = @transform_12, window_bounds = array<i64: 2, 32, 32>}, {pipeline_mode = #tpu.pipeline_mode<synchronous>, transform_indices = @transform_13, window_bounds = array<i64: 2, 1, 32>}, {pipeline_mode = #tpu.pipeline_mode<synchronous>, transform_indices = @transform_14, window_bounds = array<i64: 2, 32, 32>}, {pipeline_mode = #tpu.pipeline_mode<synchronous>, transform_indices = @transform_15, window_bounds = array<i64: 2, 1, 32>}, {pipeline_mode = #tpu.pipeline_mode<synchronous>, transform_indices = @transform_16, window_bounds = array<i64: 2, 1, 32>}, {pipeline_mode = #tpu.pipeline_mode<synchronous>, transform_indices = @transform_17, window_bounds = array<i64: 2, 1, 32>}, {pipeline_mode = #tpu.pipeline_mode<synchronous>, transform_indices = @transform_18, window_bounds = array<i64: 2, 32, 2048>}, {pipeline_mode = #tpu.pipeline_mode<synchronous>, transform_indices = @transform_19, window_bounds = array<i64: 2, 1, 2048>}, {pipeline_mode = #tpu.pipeline_mode<synchronous>, transform_indices = @transform_20, window_bounds = array<i64: 2, 2048, 32>}, {pipeline_mode = #tpu.pipeline_mode<synchronous>, transform_indices = @transform_21, window_bounds = array<i64: 2, 1, 32>}, {pipeline_mode = #tpu.pipeline_mode<synchronous>, transform_indices = @transform_22, window_bounds = array<i64: 2, 1, 32>}, {pipeline_mode = #tpu.pipeline_mode<synchronous>, transform_indices = @transform_23, window_bounds = array<i64: 2, 1, 32>}, {pipeline_mode = #tpu.pipeline_mode<synchronous>, transform_indices = @transform_24, window_bounds = array<i64: 16, 128>}, {pipeline_mode = #tpu.pipeline_mode<synchronous>, transform_indices = @transform_25, window_bounds = array<i64: 16, 32>}]} {
    %c0 = arith.constant 0 : index
    %c0_0 = arith.constant 0 : index
    %0 = vector.load %arg4[%c0, %c0_0] : memref<128x32xf32, #tpu.memory_space<vmem>>, vector<128x32xf32>
    %1 = tpu.iota {dimensions = array<i32: 1>} : vector<16x128xi32>
    %c0_1 = arith.constant 0 : index
    %c0_2 = arith.constant 0 : index
    %2 = vector.load %arg1[%c0_1, %c0_2] : memref<16x1xi32, #tpu.memory_space<vmem>>, vector<16x1xi32>
    %3 = vector.broadcast %2 : vector<16x1xi32> to vector<16x128xi32>
    %4 = arith.cmpi eq, %1, %3 : vector<16x128xi32>
    %5 = arith.extui %4 : vector<16x128xi1> to vector<16x128xi32>
    %6 = arith.sitofp %5 : vector<16x128xi32> to vector<16x128xf32>
    %cst = arith.constant dense<0.000000e+00> : vector<16x32xf32>
    %7 = tpu.matmul %6, %0, %cst {dimension_numbers = #tpu.dot_dimension_numbers<[1], [0], [0], [1], [0, 0, 1, 1], [], []>} : vector<16x128xf32>, vector<128x32xf32>, vector<16x32xf32> -> vector<16x32xf32>
    %8 = vector.shape_cast %7 : vector<16x32xf32> to vector<8x2x32xf32>
    %c0_3 = arith.constant 0 : index
    %c0_4 = arith.constant 0 : index
    %9 = vector.load %arg3[%c0_3, %c0_4] : memref<8x32xf32, #tpu.memory_space<vmem>>, vector<8x32xf32>
    %10 = vector.shape_cast %9 : vector<8x32xf32> to vector<8x1x32xf32>
    %11 = vector.broadcast %10 : vector<8x1x32xf32> to vector<8x2x32xf32>
    %12 = arith.addf %8, %11 : vector<8x2x32xf32>
    %13 = vector.shape_cast %12 : vector<8x2x32xf32> to vector<16x32xf32>
    %c0_5 = arith.constant 0 : index
    %c0_6 = arith.constant 0 : index
    %14 = vector.load %arg7[%c0_5, %c0_6] : memref<32x4xf32, #tpu.memory_space<vmem>>, vector<32x4xf32>
    %c0_7 = arith.constant 0 : index
    %c0_8 = arith.constant 0 : index
    %15 = vector.load %arg8[%c0_7, %c0_8] : memref<4x32xf32, #tpu.memory_space<vmem>>, vector<4x32xf32>
    %16 = vector.extract_strided_slice %13 {offsets = [0, 0], sizes = [2, 32], strides = [1, 1]} : vector<16x32xf32> to vector<2x32xf32>
    %c0_9 = arith.constant 0 : index
    %c0_10 = arith.constant 0 : index
    %c0_11 = arith.constant 0 : index
    %17 = vector.load %arg9[%c0_9, %c0_10, %c0_11] : memref<2x32x32xf32, #tpu.memory_space<vmem>>, vector<1x32x32xf32>
    %18 = vector.shape_cast %17 : vector<1x32x32xf32> to vector<32x32xf32>
    %cst_12 = arith.constant dense<0.000000e+00> : vector<2x32xf32>
    %19 = tpu.matmul %16, %18, %cst_12 {dimension_numbers = #tpu.dot_dimension_numbers<[1], [0], [0], [1], [0, 0, 1, 1], [], []>} : vector<2x32xf32>, vector<32x32xf32>, vector<2x32xf32> -> vector<2x32xf32>
    %c0_13 = arith.constant 0 : index
    %c0_14 = arith.constant 0 : index
    %c0_15 = arith.constant 0 : index
    %20 = vector.load %arg10[%c0_13, %c0_14, %c0_15] : memref<2x1x32xf32, #tpu.memory_space<vmem>>, vector<1x1x32xf32>
    %21 = vector.shape_cast %20 : vector<1x1x32xf32> to vector<1x32xf32>
    %22 = vector.broadcast %21 : vector<1x32xf32> to vector<2x32xf32>
    %23 = arith.addf %19, %22 : vector<2x32xf32>
    %c0_16 = arith.constant 0 : index
    %c0_17 = arith.constant 0 : index
    %c0_18 = arith.constant 0 : index
    %24 = vector.load %arg11[%c0_16, %c0_17, %c0_18] : memref<2x32x32xf32, #tpu.memory_space<vmem>>, vector<1x32x32xf32>
    %25 = vector.shape_cast %24 : vector<1x32x32xf32> to vector<32x32xf32>
    %cst_19 = arith.constant dense<0.000000e+00> : vector<16x32xf32>
    %26 = tpu.matmul %13, %25, %cst_19 {dimension_numbers = #tpu.dot_dimension_numbers<[1], [0], [0], [1], [0, 0, 1, 1], [], []>} : vector<16x32xf32>, vector<32x32xf32>, vector<16x32xf32> -> vector<16x32xf32>
    %c0_20 = arith.constant 0 : index
    %c0_21 = arith.constant 0 : index
    %c0_22 = arith.constant 0 : index
    %27 = vector.load %arg12[%c0_20, %c0_21, %c0_22] : memref<2x1x32xf32, #tpu.memory_space<vmem>>, vector<1x1x32xf32>
    %28 = vector.shape_cast %27 : vector<1x1x32xf32> to vector<1x32xf32>
    %29 = vector.broadcast %28 : vector<1x32xf32> to vector<16x32xf32>
    %30 = arith.addf %26, %29 : vector<16x32xf32>
    %c0_23 = arith.constant 0 : index
    %c0_24 = arith.constant 0 : index
    %c0_25 = arith.constant 0 : index
    %31 = vector.load %arg13[%c0_23, %c0_24, %c0_25] : memref<2x32x32xf32, #tpu.memory_space<vmem>>, vector<1x32x32xf32>
    %32 = vector.shape_cast %31 : vector<1x32x32xf32> to vector<32x32xf32>
    %cst_26 = arith.constant dense<0.000000e+00> : vector<16x32xf32>
    %33 = tpu.matmul %13, %32, %cst_26 {dimension_numbers = #tpu.dot_dimension_numbers<[1], [0], [0], [1], [0, 0, 1, 1], [], []>} : vector<16x32xf32>, vector<32x32xf32>, vector<16x32xf32> -> vector<16x32xf32>
    %c0_27 = arith.constant 0 : index
    %c0_28 = arith.constant 0 : index
    %c0_29 = arith.constant 0 : index
    %34 = vector.load %arg14[%c0_27, %c0_28, %c0_29] : memref<2x1x32xf32, #tpu.memory_space<vmem>>, vector<1x1x32xf32>
    %35 = vector.shape_cast %34 : vector<1x1x32xf32> to vector<1x32xf32>
    %36 = vector.broadcast %35 : vector<1x32xf32> to vector<16x32xf32>
    %37 = arith.addf %33, %36 : vector<16x32xf32>
    %38 = vector.shape_cast %30 : vector<16x32xf32> to vector<8x2x32xf32>
    %39 = vector.shape_cast %23 : vector<2x32xf32> to vector<1x2x32xf32>
    %40 = vector.broadcast %39 : vector<1x2x32xf32> to vector<8x2x32xf32>
    %41 = arith.mulf %38, %40 : vector<8x2x32xf32>
    %42 = vector.shape_cast %41 : vector<8x2x32xf32> to vector<16x32xf32>
    %cst_30 = arith.constant dense<0.000000e+00> : vector<16x4xf32>
    %43 = tpu.matmul %42, %14, %cst_30 {dimension_numbers = #tpu.dot_dimension_numbers<[1], [0], [0], [1], [0, 0, 1, 1], [], []>} : vector<16x32xf32>, vector<32x4xf32>, vector<16x4xf32> -> vector<16x4xf32>
    %44 = vector.shape_cast %43 : vector<16x4xf32> to vector<8x2x4xf32>
    %cst_31 = arith.constant dense<0xFF800000> : vector<2x4xf32>
    %45 = vector.multi_reduction <maximumf>, %44, %cst_31 [0] : vector<8x2x4xf32> to vector<2x4xf32>
    %46 = vector.shape_cast %45 : vector<2x4xf32> to vector<1x2x4xf32>
    %47 = vector.broadcast %46 : vector<1x2x4xf32> to vector<8x2x4xf32>
    %48 = arith.subf %44, %47 : vector<8x2x4xf32>
    %49 = math.exp %48 : vector<8x2x4xf32>
    %cst_32 = arith.constant dense<0.000000e+00> : vector<2x4xf32>
    %50 = vector.multi_reduction <add>, %49, %cst_32 [0] : vector<8x2x4xf32> to vector<2x4xf32>
    %51 = vector.shape_cast %50 : vector<2x4xf32> to vector<1x2x4xf32>
    %52 = vector.broadcast %51 : vector<1x2x4xf32> to vector<8x2x4xf32>
    %53 = arith.divf %49, %52 : vector<8x2x4xf32>
    %54 = vector.shape_cast %53 : vector<8x2x4xf32> to vector<16x4xf32>
    %cst_33 = arith.constant dense<0.000000e+00> : vector<16x32xf32>
    %55 = tpu.matmul %54, %15, %cst_33 {dimension_numbers = #tpu.dot_dimension_numbers<[1], [0], [0], [1], [0, 0, 1, 1], [], []>} : vector<16x4xf32>, vector<4x32xf32>, vector<16x32xf32> -> vector<16x32xf32>
    %56 = arith.mulf %55, %37 : vector<16x32xf32>
    %57 = vector.shape_cast %56 : vector<16x32xf32> to vector<8x2x32xf32>
    %cst_34 = arith.constant dense<0.000000e+00> : vector<2x32xf32>
    %58 = vector.multi_reduction <add>, %57, %cst_34 [0] : vector<8x2x32xf32> to vector<2x32xf32>
    %c0_35 = arith.constant 0 : index
    %c0_36 = arith.constant 0 : index
    %c0_37 = arith.constant 0 : index
    %59 = vector.load %arg15[%c0_35, %c0_36, %c0_37] : memref<2x32x32xf32, #tpu.memory_space<vmem>>, vector<1x32x32xf32>
    %60 = vector.shape_cast %59 : vector<1x32x32xf32> to vector<32x32xf32>
    %cst_38 = arith.constant dense<0.000000e+00> : vector<2x32xf32>
    %61 = tpu.matmul %58, %60, %cst_38 {dimension_numbers = #tpu.dot_dimension_numbers<[1], [0], [0], [1], [0, 0, 1, 1], [], []>} : vector<2x32xf32>, vector<32x32xf32>, vector<2x32xf32> -> vector<2x32xf32>
    %c0_39 = arith.constant 0 : index
    %c0_40 = arith.constant 0 : index
    %c0_41 = arith.constant 0 : index
    %62 = vector.load %arg16[%c0_39, %c0_40, %c0_41] : memref<2x1x32xf32, #tpu.memory_space<vmem>>, vector<1x1x32xf32>
    %63 = vector.shape_cast %62 : vector<1x1x32xf32> to vector<1x32xf32>
    %64 = vector.broadcast %63 : vector<1x32xf32> to vector<2x32xf32>
    %65 = arith.addf %61, %64 : vector<2x32xf32>
    %66 = vector.shape_cast %13 : vector<16x32xf32> to vector<8x2x32xf32>
    %67 = vector.shape_cast %65 : vector<2x32xf32> to vector<1x2x32xf32>
    %68 = vector.broadcast %67 : vector<1x2x32xf32> to vector<8x2x32xf32>
    %69 = arith.addf %66, %68 : vector<8x2x32xf32>
    %70 = vector.shape_cast %69 : vector<8x2x32xf32> to vector<16x32xf32>
    %cst_42 = arith.constant dense<0.000000e+00> : vector<16xf32>
    %71 = vector.multi_reduction <add>, %70, %cst_42 [1] : vector<16x32xf32> to vector<16xf32>
    %72 = vector.shape_cast %71 : vector<16xf32> to vector<16x1xf32>
    %cst_43 = arith.constant 3.200000e+01 : f32
    %73 = vector.broadcast %cst_43 : f32 to vector<16x1xf32>
    %74 = arith.divf %72, %73 : vector<16x1xf32>
    %75 = vector.broadcast %74 : vector<16x1xf32> to vector<16x32xf32>
    %76 = arith.subf %70, %75 : vector<16x32xf32>
    %77 = arith.mulf %76, %76 : vector<16x32xf32>
    %cst_44 = arith.constant dense<0.000000e+00> : vector<16xf32>
    %78 = vector.multi_reduction <add>, %77, %cst_44 [1] : vector<16x32xf32> to vector<16xf32>
    %79 = vector.shape_cast %78 : vector<16xf32> to vector<16x1xf32>
    %cst_45 = arith.constant 3.200000e+01 : f32
    %80 = vector.broadcast %cst_45 : f32 to vector<16x1xf32>
    %81 = arith.divf %79, %80 : vector<16x1xf32>
    %82 = vector.broadcast %74 : vector<16x1xf32> to vector<16x32xf32>
    %83 = arith.subf %70, %82 : vector<16x32xf32>
    %cst_46 = arith.constant 9.99999974E-6 : f32
    %84 = vector.broadcast %cst_46 : f32 to vector<16x1xf32>
    %85 = arith.addf %81, %84 : vector<16x1xf32>
    %86 = math.rsqrt %85 : vector<16x1xf32>
    %87 = vector.broadcast %86 : vector<16x1xf32> to vector<16x32xf32>
    %88 = arith.mulf %83, %87 : vector<16x32xf32>
    %c0_47 = arith.constant 0 : index
    %c0_48 = arith.constant 0 : index
    %c0_49 = arith.constant 0 : index
    %89 = vector.load %arg17[%c0_47, %c0_48, %c0_49] : memref<2x1x32xf32, #tpu.memory_space<vmem>>, vector<1x1x32xf32>
    %90 = vector.shape_cast %89 : vector<1x1x32xf32> to vector<1x32xf32>
    %91 = vector.broadcast %90 : vector<1x32xf32> to vector<16x32xf32>
    %92 = arith.mulf %88, %91 : vector<16x32xf32>
    %c0_50 = arith.constant 0 : index
    %c0_51 = arith.constant 0 : index
    %c0_52 = arith.constant 0 : index
    %93 = vector.load %arg18[%c0_50, %c0_51, %c0_52] : memref<2x1x32xf32, #tpu.memory_space<vmem>>, vector<1x1x32xf32>
    %94 = vector.shape_cast %93 : vector<1x1x32xf32> to vector<1x32xf32>
    %95 = vector.broadcast %94 : vector<1x32xf32> to vector<16x32xf32>
    %96 = arith.addf %92, %95 : vector<16x32xf32>
    %97 = arith.truncf %96 : vector<16x32xf32> to vector<16x32xbf16>
    %c0_53 = arith.constant 0 : index
    %c0_54 = arith.constant 0 : index
    %c0_55 = arith.constant 0 : index
    %98 = vector.load %arg19[%c0_53, %c0_54, %c0_55] : memref<2x32x2048xbf16, #tpu.memory_space<vmem>>, vector<1x32x2048xbf16>
    %99 = vector.shape_cast %98 : vector<1x32x2048xbf16> to vector<32x2048xbf16>
    %cst_56 = arith.constant dense<0.000000e+00> : vector<16x2048xf32>
    %100 = tpu.matmul %97, %99, %cst_56 {dimension_numbers = #tpu.dot_dimension_numbers<[1], [0], [0], [1], [0, 0, 1, 1], [], []>} : vector<16x32xbf16>, vector<32x2048xbf16>, vector<16x2048xf32> -> vector<16x2048xf32>
    %c0_57 = arith.constant 0 : index
    %c0_58 = arith.constant 0 : index
    %c0_59 = arith.constant 0 : index
    %101 = vector.load %arg20[%c0_57, %c0_58, %c0_59] : memref<2x1x2048xf32, #tpu.memory_space<vmem>>, vector<1x1x2048xf32>
    %102 = vector.shape_cast %101 : vector<1x1x2048xf32> to vector<1x2048xf32>
    %103 = vector.broadcast %102 : vector<1x2048xf32> to vector<16x2048xf32>
    %104 = arith.addf %100, %103 : vector<16x2048xf32>
    %cst_60 = arith.constant 0.000000e+00 : f32
    %105 = vector.broadcast %cst_60 : f32 to vector<16x2048xf32>
    %106 = arith.maximumf %104, %105 : vector<16x2048xf32>
    %107 = arith.truncf %106 : vector<16x2048xf32> to vector<16x2048xbf16>
    %c0_61 = arith.constant 0 : index
    %c0_62 = arith.constant 0 : index
    %c0_63 = arith.constant 0 : index
    %108 = vector.load %arg21[%c0_61, %c0_62, %c0_63] : memref<2x2048x32xbf16, #tpu.memory_space<vmem>>, vector<1x2048x32xbf16>
    %109 = vector.shape_cast %108 : vector<1x2048x32xbf16> to vector<2048x32xbf16>
    %cst_64 = arith.constant dense<0.000000e+00> : vector<16x32xf32>
    %110 = tpu.matmul %107, %109, %cst_64 {dimension_numbers = #tpu.dot_dimension_numbers<[1], [0], [0], [1], [0, 0, 1, 1], [], []>} : vector<16x2048xbf16>, vector<2048x32xbf16>, vector<16x32xf32> -> vector<16x32xf32>
    %c0_65 = arith.constant 0 : index
    %c0_66 = arith.constant 0 : index
    %c0_67 = arith.constant 0 : index
    %111 = vector.load %arg22[%c0_65, %c0_66, %c0_67] : memref<2x1x32xf32, #tpu.memory_space<vmem>>, vector<1x1x32xf32>
    %112 = vector.shape_cast %111 : vector<1x1x32xf32> to vector<1x32xf32>
    %113 = vector.broadcast %112 : vector<1x32xf32> to vector<16x32xf32>
    %114 = arith.addf %110, %113 : vector<16x32xf32>
    %115 = arith.addf %96, %114 : vector<16x32xf32>
    %cst_68 = arith.constant dense<0.000000e+00> : vector<16xf32>
    %116 = vector.multi_reduction <add>, %115, %cst_68 [1] : vector<16x32xf32> to vector<16xf32>
    %117 = vector.shape_cast %116 : vector<16xf32> to vector<16x1xf32>
    %cst_69 = arith.constant 3.200000e+01 : f32
    %118 = vector.broadcast %cst_69 : f32 to vector<16x1xf32>
    %119 = arith.divf %117, %118 : vector<16x1xf32>
    %120 = vector.broadcast %119 : vector<16x1xf32> to vector<16x32xf32>
    %121 = arith.subf %115, %120 : vector<16x32xf32>
    %122 = arith.mulf %121, %121 : vector<16x32xf32>
    %cst_70 = arith.constant dense<0.000000e+00> : vector<16xf32>
    %123 = vector.multi_reduction <add>, %122, %cst_70 [1] : vector<16x32xf32> to vector<16xf32>
    %124 = vector.shape_cast %123 : vector<16xf32> to vector<16x1xf32>
    %cst_71 = arith.constant 3.200000e+01 : f32
    %125 = vector.broadcast %cst_71 : f32 to vector<16x1xf32>
    %126 = arith.divf %124, %125 : vector<16x1xf32>
    %127 = vector.broadcast %119 : vector<16x1xf32> to vector<16x32xf32>
    %128 = arith.subf %115, %127 : vector<16x32xf32>
    %cst_72 = arith.constant 9.99999974E-6 : f32
    %129 = vector.broadcast %cst_72 : f32 to vector<16x1xf32>
    %130 = arith.addf %126, %129 : vector<16x1xf32>
    %131 = math.rsqrt %130 : vector<16x1xf32>
    %132 = vector.broadcast %131 : vector<16x1xf32> to vector<16x32xf32>
    %133 = arith.mulf %128, %132 : vector<16x32xf32>
    %c0_73 = arith.constant 0 : index
    %c0_74 = arith.constant 0 : index
    %c0_75 = arith.constant 0 : index
    %134 = vector.load %arg23[%c0_73, %c0_74, %c0_75] : memref<2x1x32xf32, #tpu.memory_space<vmem>>, vector<1x1x32xf32>
    %135 = vector.shape_cast %134 : vector<1x1x32xf32> to vector<1x32xf32>
    %136 = vector.broadcast %135 : vector<1x32xf32> to vector<16x32xf32>
    %137 = arith.mulf %133, %136 : vector<16x32xf32>
    %c0_76 = arith.constant 0 : index
    %c0_77 = arith.constant 0 : index
    %c0_78 = arith.constant 0 : index
    %138 = vector.load %arg24[%c0_76, %c0_77, %c0_78] : memref<2x1x32xf32, #tpu.memory_space<vmem>>, vector<1x1x32xf32>
    %139 = vector.shape_cast %138 : vector<1x1x32xf32> to vector<1x32xf32>
    %140 = vector.broadcast %139 : vector<1x32xf32> to vector<16x32xf32>
    %141 = arith.addf %137, %140 : vector<16x32xf32>
    %142 = vector.extract_strided_slice %141 {offsets = [0, 0], sizes = [2, 32], strides = [1, 1]} : vector<16x32xf32> to vector<2x32xf32>
    %c1 = arith.constant 1 : index
    %c0_79 = arith.constant 0 : index
    %c0_80 = arith.constant 0 : index
    %143 = vector.load %arg9[%c1, %c0_79, %c0_80] : memref<2x32x32xf32, #tpu.memory_space<vmem>>, vector<1x32x32xf32>
    %144 = vector.shape_cast %143 : vector<1x32x32xf32> to vector<32x32xf32>
    %cst_81 = arith.constant dense<0.000000e+00> : vector<2x32xf32>
    %145 = tpu.matmul %142, %144, %cst_81 {dimension_numbers = #tpu.dot_dimension_numbers<[1], [0], [0], [1], [0, 0, 1, 1], [], []>} : vector<2x32xf32>, vector<32x32xf32>, vector<2x32xf32> -> vector<2x32xf32>
    %c1_82 = arith.constant 1 : index
    %c0_83 = arith.constant 0 : index
    %c0_84 = arith.constant 0 : index
    %146 = vector.load %arg10[%c1_82, %c0_83, %c0_84] : memref<2x1x32xf32, #tpu.memory_space<vmem>>, vector<1x1x32xf32>
    %147 = vector.shape_cast %146 : vector<1x1x32xf32> to vector<1x32xf32>
    %148 = vector.broadcast %147 : vector<1x32xf32> to vector<2x32xf32>
    %149 = arith.addf %145, %148 : vector<2x32xf32>
    %c1_85 = arith.constant 1 : index
    %c0_86 = arith.constant 0 : index
    %c0_87 = arith.constant 0 : index
    %150 = vector.load %arg11[%c1_85, %c0_86, %c0_87] : memref<2x32x32xf32, #tpu.memory_space<vmem>>, vector<1x32x32xf32>
    %151 = vector.shape_cast %150 : vector<1x32x32xf32> to vector<32x32xf32>
    %cst_88 = arith.constant dense<0.000000e+00> : vector<16x32xf32>
    %152 = tpu.matmul %141, %151, %cst_88 {dimension_numbers = #tpu.dot_dimension_numbers<[1], [0], [0], [1], [0, 0, 1, 1], [], []>} : vector<16x32xf32>, vector<32x32xf32>, vector<16x32xf32> -> vector<16x32xf32>
    %c1_89 = arith.constant 1 : index
    %c0_90 = arith.constant 0 : index
    %c0_91 = arith.constant 0 : index
    %153 = vector.load %arg12[%c1_89, %c0_90, %c0_91] : memref<2x1x32xf32, #tpu.memory_space<vmem>>, vector<1x1x32xf32>
    %154 = vector.shape_cast %153 : vector<1x1x32xf32> to vector<1x32xf32>
    %155 = vector.broadcast %154 : vector<1x32xf32> to vector<16x32xf32>
    %156 = arith.addf %152, %155 : vector<16x32xf32>
    %c1_92 = arith.constant 1 : index
    %c0_93 = arith.constant 0 : index
    %c0_94 = arith.constant 0 : index
    %157 = vector.load %arg13[%c1_92, %c0_93, %c0_94] : memref<2x32x32xf32, #tpu.memory_space<vmem>>, vector<1x32x32xf32>
    %158 = vector.shape_cast %157 : vector<1x32x32xf32> to vector<32x32xf32>
    %cst_95 = arith.constant dense<0.000000e+00> : vector<16x32xf32>
    %159 = tpu.matmul %141, %158, %cst_95 {dimension_numbers = #tpu.dot_dimension_numbers<[1], [0], [0], [1], [0, 0, 1, 1], [], []>} : vector<16x32xf32>, vector<32x32xf32>, vector<16x32xf32> -> vector<16x32xf32>
    %c1_96 = arith.constant 1 : index
    %c0_97 = arith.constant 0 : index
    %c0_98 = arith.constant 0 : index
    %160 = vector.load %arg14[%c1_96, %c0_97, %c0_98] : memref<2x1x32xf32, #tpu.memory_space<vmem>>, vector<1x1x32xf32>
    %161 = vector.shape_cast %160 : vector<1x1x32xf32> to vector<1x32xf32>
    %162 = vector.broadcast %161 : vector<1x32xf32> to vector<16x32xf32>
    %163 = arith.addf %159, %162 : vector<16x32xf32>
    %164 = vector.shape_cast %156 : vector<16x32xf32> to vector<8x2x32xf32>
    %165 = vector.shape_cast %149 : vector<2x32xf32> to vector<1x2x32xf32>
    %166 = vector.broadcast %165 : vector<1x2x32xf32> to vector<8x2x32xf32>
    %167 = arith.mulf %164, %166 : vector<8x2x32xf32>
    %168 = vector.shape_cast %167 : vector<8x2x32xf32> to vector<16x32xf32>
    %cst_99 = arith.constant dense<0.000000e+00> : vector<16x4xf32>
    %169 = tpu.matmul %168, %14, %cst_99 {dimension_numbers = #tpu.dot_dimension_numbers<[1], [0], [0], [1], [0, 0, 1, 1], [], []>} : vector<16x32xf32>, vector<32x4xf32>, vector<16x4xf32> -> vector<16x4xf32>
    %170 = vector.shape_cast %169 : vector<16x4xf32> to vector<8x2x4xf32>
    %cst_100 = arith.constant dense<0xFF800000> : vector<2x4xf32>
    %171 = vector.multi_reduction <maximumf>, %170, %cst_100 [0] : vector<8x2x4xf32> to vector<2x4xf32>
    %172 = vector.shape_cast %171 : vector<2x4xf32> to vector<1x2x4xf32>
    %173 = vector.broadcast %172 : vector<1x2x4xf32> to vector<8x2x4xf32>
    %174 = arith.subf %170, %173 : vector<8x2x4xf32>
    %175 = math.exp %174 : vector<8x2x4xf32>
    %cst_101 = arith.constant dense<0.000000e+00> : vector<2x4xf32>
    %176 = vector.multi_reduction <add>, %175, %cst_101 [0] : vector<8x2x4xf32> to vector<2x4xf32>
    %177 = vector.shape_cast %176 : vector<2x4xf32> to vector<1x2x4xf32>
    %178 = vector.broadcast %177 : vector<1x2x4xf32> to vector<8x2x4xf32>
    %179 = arith.divf %175, %178 : vector<8x2x4xf32>
    %180 = vector.shape_cast %179 : vector<8x2x4xf32> to vector<16x4xf32>
    %cst_102 = arith.constant dense<0.000000e+00> : vector<16x32xf32>
    %181 = tpu.matmul %180, %15, %cst_102 {dimension_numbers = #tpu.dot_dimension_numbers<[1], [0], [0], [1], [0, 0, 1, 1], [], []>} : vector<16x4xf32>, vector<4x32xf32>, vector<16x32xf32> -> vector<16x32xf32>
    %182 = arith.mulf %181, %163 : vector<16x32xf32>
    %183 = vector.shape_cast %182 : vector<16x32xf32> to vector<8x2x32xf32>
    %cst_103 = arith.constant dense<0.000000e+00> : vector<2x32xf32>
    %184 = vector.multi_reduction <add>, %183, %cst_103 [0] : vector<8x2x32xf32> to vector<2x32xf32>
    %c1_104 = arith.constant 1 : index
    %c0_105 = arith.constant 0 : index
    %c0_106 = arith.constant 0 : index
    %185 = vector.load %arg15[%c1_104, %c0_105, %c0_106] : memref<2x32x32xf32, #tpu.memory_space<vmem>>, vector<1x32x32xf32>
    %186 = vector.shape_cast %185 : vector<1x32x32xf32> to vector<32x32xf32>
    %cst_107 = arith.constant dense<0.000000e+00> : vector<2x32xf32>
    %187 = tpu.matmul %184, %186, %cst_107 {dimension_numbers = #tpu.dot_dimension_numbers<[1], [0], [0], [1], [0, 0, 1, 1], [], []>} : vector<2x32xf32>, vector<32x32xf32>, vector<2x32xf32> -> vector<2x32xf32>
    %c1_108 = arith.constant 1 : index
    %c0_109 = arith.constant 0 : index
    %c0_110 = arith.constant 0 : index
    %188 = vector.load %arg16[%c1_108, %c0_109, %c0_110] : memref<2x1x32xf32, #tpu.memory_space<vmem>>, vector<1x1x32xf32>
    %189 = vector.shape_cast %188 : vector<1x1x32xf32> to vector<1x32xf32>
    %190 = vector.broadcast %189 : vector<1x32xf32> to vector<2x32xf32>
    %191 = arith.addf %187, %190 : vector<2x32xf32>
    %192 = vector.shape_cast %141 : vector<16x32xf32> to vector<8x2x32xf32>
    %193 = vector.shape_cast %191 : vector<2x32xf32> to vector<1x2x32xf32>
    %194 = vector.broadcast %193 : vector<1x2x32xf32> to vector<8x2x32xf32>
    %195 = arith.addf %192, %194 : vector<8x2x32xf32>
    %196 = vector.shape_cast %195 : vector<8x2x32xf32> to vector<16x32xf32>
    %cst_111 = arith.constant dense<0.000000e+00> : vector<16xf32>
    %197 = vector.multi_reduction <add>, %196, %cst_111 [1] : vector<16x32xf32> to vector<16xf32>
    %198 = vector.shape_cast %197 : vector<16xf32> to vector<16x1xf32>
    %cst_112 = arith.constant 3.200000e+01 : f32
    %199 = vector.broadcast %cst_112 : f32 to vector<16x1xf32>
    %200 = arith.divf %198, %199 : vector<16x1xf32>
    %201 = vector.broadcast %200 : vector<16x1xf32> to vector<16x32xf32>
    %202 = arith.subf %196, %201 : vector<16x32xf32>
    %203 = arith.mulf %202, %202 : vector<16x32xf32>
    %cst_113 = arith.constant dense<0.000000e+00> : vector<16xf32>
    %204 = vector.multi_reduction <add>, %203, %cst_113 [1] : vector<16x32xf32> to vector<16xf32>
    %205 = vector.shape_cast %204 : vector<16xf32> to vector<16x1xf32>
    %cst_114 = arith.constant 3.200000e+01 : f32
    %206 = vector.broadcast %cst_114 : f32 to vector<16x1xf32>
    %207 = arith.divf %205, %206 : vector<16x1xf32>
    %208 = vector.broadcast %200 : vector<16x1xf32> to vector<16x32xf32>
    %209 = arith.subf %196, %208 : vector<16x32xf32>
    %cst_115 = arith.constant 9.99999974E-6 : f32
    %210 = vector.broadcast %cst_115 : f32 to vector<16x1xf32>
    %211 = arith.addf %207, %210 : vector<16x1xf32>
    %212 = math.rsqrt %211 : vector<16x1xf32>
    %213 = vector.broadcast %212 : vector<16x1xf32> to vector<16x32xf32>
    %214 = arith.mulf %209, %213 : vector<16x32xf32>
    %c1_116 = arith.constant 1 : index
    %c0_117 = arith.constant 0 : index
    %c0_118 = arith.constant 0 : index
    %215 = vector.load %arg17[%c1_116, %c0_117, %c0_118] : memref<2x1x32xf32, #tpu.memory_space<vmem>>, vector<1x1x32xf32>
    %216 = vector.shape_cast %215 : vector<1x1x32xf32> to vector<1x32xf32>
    %217 = vector.broadcast %216 : vector<1x32xf32> to vector<16x32xf32>
    %218 = arith.mulf %214, %217 : vector<16x32xf32>
    %c1_119 = arith.constant 1 : index
    %c0_120 = arith.constant 0 : index
    %c0_121 = arith.constant 0 : index
    %219 = vector.load %arg18[%c1_119, %c0_120, %c0_121] : memref<2x1x32xf32, #tpu.memory_space<vmem>>, vector<1x1x32xf32>
    %220 = vector.shape_cast %219 : vector<1x1x32xf32> to vector<1x32xf32>
    %221 = vector.broadcast %220 : vector<1x32xf32> to vector<16x32xf32>
    %222 = arith.addf %218, %221 : vector<16x32xf32>
    %223 = arith.truncf %222 : vector<16x32xf32> to vector<16x32xbf16>
    %c1_122 = arith.constant 1 : index
    %c0_123 = arith.constant 0 : index
    %c0_124 = arith.constant 0 : index
    %224 = vector.load %arg19[%c1_122, %c0_123, %c0_124] : memref<2x32x2048xbf16, #tpu.memory_space<vmem>>, vector<1x32x2048xbf16>
    %225 = vector.shape_cast %224 : vector<1x32x2048xbf16> to vector<32x2048xbf16>
    %cst_125 = arith.constant dense<0.000000e+00> : vector<16x2048xf32>
    %226 = tpu.matmul %223, %225, %cst_125 {dimension_numbers = #tpu.dot_dimension_numbers<[1], [0], [0], [1], [0, 0, 1, 1], [], []>} : vector<16x32xbf16>, vector<32x2048xbf16>, vector<16x2048xf32> -> vector<16x2048xf32>
    %c1_126 = arith.constant 1 : index
    %c0_127 = arith.constant 0 : index
    %c0_128 = arith.constant 0 : index
    %227 = vector.load %arg20[%c1_126, %c0_127, %c0_128] : memref<2x1x2048xf32, #tpu.memory_space<vmem>>, vector<1x1x2048xf32>
    %228 = vector.shape_cast %227 : vector<1x1x2048xf32> to vector<1x2048xf32>
    %229 = vector.broadcast %228 : vector<1x2048xf32> to vector<16x2048xf32>
    %230 = arith.addf %226, %229 : vector<16x2048xf32>
    %cst_129 = arith.constant 0.000000e+00 : f32
    %231 = vector.broadcast %cst_129 : f32 to vector<16x2048xf32>
    %232 = arith.maximumf %230, %231 : vector<16x2048xf32>
    %233 = arith.truncf %232 : vector<16x2048xf32> to vector<16x2048xbf16>
    %c1_130 = arith.constant 1 : index
    %c0_131 = arith.constant 0 : index
    %c0_132 = arith.constant 0 : index
    %234 = vector.load %arg21[%c1_130, %c0_131, %c0_132] : memref<2x2048x32xbf16, #tpu.memory_space<vmem>>, vector<1x2048x32xbf16>
    %235 = vector.shape_cast %234 : vector<1x2048x32xbf16> to vector<2048x32xbf16>
    %cst_133 = arith.constant dense<0.000000e+00> : vector<16x32xf32>
    %236 = tpu.matmul %233, %235, %cst_133 {dimension_numbers = #tpu.dot_dimension_numbers<[1], [0], [0], [1], [0, 0, 1, 1], [], []>} : vector<16x2048xbf16>, vector<2048x32xbf16>, vector<16x32xf32> -> vector<16x32xf32>
    %c1_134 = arith.constant 1 : index
    %c0_135 = arith.constant 0 : index
    %c0_136 = arith.constant 0 : index
    %237 = vector.load %arg22[%c1_134, %c0_135, %c0_136] : memref<2x1x32xf32, #tpu.memory_space<vmem>>, vector<1x1x32xf32>
    %238 = vector.shape_cast %237 : vector<1x1x32xf32> to vector<1x32xf32>
    %239 = vector.broadcast %238 : vector<1x32xf32> to vector<16x32xf32>
    %240 = arith.addf %236, %239 : vector<16x32xf32>
    %241 = arith.addf %222, %240 : vector<16x32xf32>
    %cst_137 = arith.constant dense<0.000000e+00> : vector<16xf32>
    %242 = vector.multi_reduction <add>, %241, %cst_137 [1] : vector<16x32xf32> to vector<16xf32>
    %243 = vector.shape_cast %242 : vector<16xf32> to vector<16x1xf32>
    %cst_138 = arith.constant 3.200000e+01 : f32
    %244 = vector.broadcast %cst_138 : f32 to vector<16x1xf32>
    %245 = arith.divf %243, %244 : vector<16x1xf32>
    %246 = vector.broadcast %245 : vector<16x1xf32> to vector<16x32xf32>
    %247 = arith.subf %241, %246 : vector<16x32xf32>
    %248 = arith.mulf %247, %247 : vector<16x32xf32>
    %cst_139 = arith.constant dense<0.000000e+00> : vector<16xf32>
    %249 = vector.multi_reduction <add>, %248, %cst_139 [1] : vector<16x32xf32> to vector<16xf32>
    %250 = vector.shape_cast %249 : vector<16xf32> to vector<16x1xf32>
    %cst_140 = arith.constant 3.200000e+01 : f32
    %251 = vector.broadcast %cst_140 : f32 to vector<16x1xf32>
    %252 = arith.divf %250, %251 : vector<16x1xf32>
    %253 = vector.broadcast %245 : vector<16x1xf32> to vector<16x32xf32>
    %254 = arith.subf %241, %253 : vector<16x32xf32>
    %cst_141 = arith.constant 9.99999974E-6 : f32
    %255 = vector.broadcast %cst_141 : f32 to vector<16x1xf32>
    %256 = arith.addf %252, %255 : vector<16x1xf32>
    %257 = math.rsqrt %256 : vector<16x1xf32>
    %258 = vector.broadcast %257 : vector<16x1xf32> to vector<16x32xf32>
    %259 = arith.mulf %254, %258 : vector<16x32xf32>
    %c1_142 = arith.constant 1 : index
    %c0_143 = arith.constant 0 : index
    %c0_144 = arith.constant 0 : index
    %260 = vector.load %arg23[%c1_142, %c0_143, %c0_144] : memref<2x1x32xf32, #tpu.memory_space<vmem>>, vector<1x1x32xf32>
    %261 = vector.shape_cast %260 : vector<1x1x32xf32> to vector<1x32xf32>
    %262 = vector.broadcast %261 : vector<1x32xf32> to vector<16x32xf32>
    %263 = arith.mulf %259, %262 : vector<16x32xf32>
    %c1_145 = arith.constant 1 : index
    %c0_146 = arith.constant 0 : index
    %c0_147 = arith.constant 0 : index
    %264 = vector.load %arg24[%c1_145, %c0_146, %c0_147] : memref<2x1x32xf32, #tpu.memory_space<vmem>>, vector<1x1x32xf32>
    %265 = vector.shape_cast %264 : vector<1x1x32xf32> to vector<1x32xf32>
    %266 = vector.broadcast %265 : vector<1x32xf32> to vector<16x32xf32>
    %267 = arith.addf %263, %266 : vector<16x32xf32>
    %c0_148 = arith.constant 0 : index
    %c0_149 = arith.constant 0 : index
    %268 = vector.load %arg26[%c0_148, %c0_149] : memref<16x32xf32, #tpu.memory_space<vmem>>, vector<16x32xf32>
    tpu.vector_store %arg26[%c0_148, %c0_149], %267 {strides = array<i32>} : memref<16x32xf32, #tpu.memory_space<vmem>>, vector<16x32xf32>,
    %269 = tpu.iota {dimensions = array<i32: 1>} : vector<16x128xi32>
    %c0_150 = arith.constant 0 : index
    %c0_151 = arith.constant 0 : index
    %270 = vector.load %arg2[%c0_150, %c0_151] : memref<16x1xi32, #tpu.memory_space<vmem>>, vector<16x1xi32>
    %271 = vector.broadcast %270 : vector<16x1xi32> to vector<16x128xi32>
    %272 = arith.cmpi eq, %269, %271 : vector<16x128xi32>
    %273 = arith.extui %272 : vector<16x128xi1> to vector<16x128xi32>
    %274 = arith.sitofp %273 : vector<16x128xi32> to vector<16x128xf32>
    %cst_152 = arith.constant dense<0.000000e+00> : vector<16x32xf32>
    %275 = tpu.matmul %274, %0, %cst_152 {dimension_numbers = #tpu.dot_dimension_numbers<[1], [0], [0], [1], [0, 0, 1, 1], [], []>} : vector<16x128xf32>, vector<128x32xf32>, vector<16x32xf32> -> vector<16x32xf32>
    %c0_153 = arith.constant 0 : index
    %c0_154 = arith.constant 0 : index
    %276 = vector.load %arg5[%c0_153, %c0_154] : memref<32x128xf32, #tpu.memory_space<vmem>>, vector<32x128xf32>
    %cst_155 = arith.constant dense<0.000000e+00> : vector<16x128xf32>
    %277 = tpu.matmul %275, %276, %cst_155 {dimension_numbers = #tpu.dot_dimension_numbers<[1], [0], [0], [1], [0, 0, 1, 1], [], []>} : vector<16x32xf32>, vector<32x128xf32>, vector<16x128xf32> -> vector<16x128xf32>
    %c0_156 = arith.constant 0 : index
    %c0_157 = arith.constant 0 : index
    %278 = vector.load %arg6[%c0_156, %c0_157] : memref<1x128xf32, #tpu.memory_space<vmem>>, vector<1x128xf32>
    %279 = vector.broadcast %278 : vector<1x128xf32> to vector<16x128xf32>
    %280 = arith.addf %277, %279 : vector<16x128xf32>
    %c0_158 = arith.constant 0 : index
    %c0_159 = arith.constant 0 : index
    %281 = vector.load %arg25[%c0_158, %c0_159] : memref<16x128xf32, #tpu.memory_space<vmem>>, vector<16x128xf32>
    tpu.vector_store %arg25[%c0_158, %c0_159], %280 {strides = array<i32>} : memref<16x128xf32, #tpu.memory_space<vmem>>, vector<16x128xf32>,
    return
  }
  func.func @transform_0(%arg0: i32) -> (i32, i32) {
    %c0_i32 = arith.constant 0 : i32
    %c0_i32_0 = arith.constant 0 : i32
    %c0_i32_1 = arith.constant 0 : i32
    return %c0_i32, %c0_i32_0 : i32, i32
  }
  func.func @transform_1(%arg0: i32) -> (i32, i32) {
    %c0_i32 = arith.constant 0 : i32
    %c0_i32_0 = arith.constant 0 : i32
    %c0_i32_1 = arith.constant 0 : i32
    return %c0_i32, %c0_i32_0 : i32, i32
  }
  func.func @transform_2(%arg0: i32) -> (i32, i32) {
    %c0_i32 = arith.constant 0 : i32
    %c0_i32_0 = arith.constant 0 : i32
    %c0_i32_1 = arith.constant 0 : i32
    return %c0_i32, %c0_i32_0 : i32, i32
  }
  func.func @transform_3(%arg0: i32) -> (i32, i32) {
    %c0_i32 = arith.constant 0 : i32
    %c0_i32_0 = arith.constant 0 : i32
    %c0_i32_1 = arith.constant 0 : i32
    return %c0_i32, %c0_i32_0 : i32, i32
  }
  func.func @transform_4(%arg0: i32) -> (i32, i32) {
    %c0_i32 = arith.constant 0 : i32
    %c0_i32_0 = arith.constant 0 : i32
    %c0_i32_1 = arith.constant 0 : i32
    return %c0_i32, %c0_i32_0 : i32, i32
  }
  func.func @transform_5(%arg0: i32) -> (i32, i32) {
    %c0_i32 = arith.constant 0 : i32
    %c0_i32_0 = arith.constant 0 : i32
    %c0_i32_1 = arith.constant 0 : i32
    return %c0_i32, %c0_i32_0 : i32, i32
  }
  func.func @transform_6(%arg0: i32) -> (i32, i32) {
    %c0_i32 = arith.constant 0 : i32
    %c0_i32_0 = arith.constant 0 : i32
    %c0_i32_1 = arith.constant 0 : i32
    return %c0_i32, %c0_i32_0 : i32, i32
  }
  func.func @transform_7(%arg0: i32) -> (i32, i32) {
    %c0_i32 = arith.constant 0 : i32
    %c0_i32_0 = arith.constant 0 : i32
    %c0_i32_1 = arith.constant 0 : i32
    return %c0_i32, %c0_i32_0 : i32, i32
  }
  func.func @transform_8(%arg0: i32) -> (i32, i32, i32) {
    %c0_i32 = arith.constant 0 : i32
    %c0_i32_0 = arith.constant 0 : i32
    %c0_i32_1 = arith.constant 0 : i32
    %c0_i32_2 = arith.constant 0 : i32
    return %c0_i32, %c0_i32_0, %c0_i32_1 : i32, i32, i32
  }
  func.func @transform_9(%arg0: i32) -> (i32, i32, i32) {
    %c0_i32 = arith.constant 0 : i32
    %c0_i32_0 = arith.constant 0 : i32
    %c0_i32_1 = arith.constant 0 : i32
    %c0_i32_2 = arith.constant 0 : i32
    return %c0_i32, %c0_i32_0, %c0_i32_1 : i32, i32, i32
  }
  func.func @transform_10(%arg0: i32) -> (i32, i32, i32) {
    %c0_i32 = arith.constant 0 : i32
    %c0_i32_0 = arith.constant 0 : i32
    %c0_i32_1 = arith.constant 0 : i32
    %c0_i32_2 = arith.constant 0 : i32
    return %c0_i32, %c0_i32_0, %c0_i32_1 : i32, i32, i32
  }
  func.func @transform_11(%arg0: i32) -> (i32, i32, i32) {
    %c0_i32 = arith.constant 0 : i32
    %c0_i32_0 = arith.constant 0 : i32
    %c0_i32_1 = arith.constant 0 : i32
    %c0_i32_2 = arith.constant 0 : i32
    return %c0_i32, %c0_i32_0, %c0_i32_1 : i32, i32, i32
  }
  func.func @transform_12(%arg0: i32) -> (i32, i32, i32) {
    %c0_i32 = arith.constant 0 : i32
    %c0_i32_0 = arith.constant 0 : i32
    %c0_i32_1 = arith.constant 0 : i32
    %c0_i32_2 = arith.constant 0 : i32
    return %c0_i32, %c0_i32_0, %c0_i32_1 : i32, i32, i32
  }
  func.func @transform_13(%arg0: i32) -> (i32, i32, i32) {
    %c0_i32 = arith.constant 0 : i32
    %c0_i32_0 = arith.constant 0 : i32
    %c0_i32_1 = arith.constant 0 : i32
    %c0_i32_2 = arith.constant 0 : i32
    return %c0_i32, %c0_i32_0, %c0_i32_1 : i32, i32, i32
  }
  func.func @transform_14(%arg0: i32) -> (i32, i32, i32) {
    %c0_i32 = arith.constant 0 : i32
    %c0_i32_0 = arith.constant 0 : i32
    %c0_i32_1 = arith.constant 0 : i32
    %c0_i32_2 = arith.constant 0 : i32
    return %c0_i32, %c0_i32_0, %c0_i32_1 : i32, i32, i32
  }
  func.func @transform_15(%arg0: i32) -> (i32, i32, i32) {
    %c0_i32 = arith.constant 0 : i32
    %c0_i32_0 = arith.constant 0 : i32
    %c0_i32_1 = arith.constant 0 : i32
    %c0_i32_2 = arith.constant 0 : i32
    return %c0_i32, %c0_i32_0, %c0_i32_1 : i32, i32, i32
  }
  func.func @transform_16(%arg0: i32) -> (i32, i32, i32) {
    %c0_i32 = arith.constant 0 : i32
    %c0_i32_0 = arith.constant 0 : i32
    %c0_i32_1 = arith.constant 0 : i32
    %c0_i32_2 = arith.constant 0 : i32
    return %c0_i32, %c0_i32_0, %c0_i32_1 : i32, i32, i32
  }
  func.func @transform_17(%arg0: i32) -> (i32, i32, i32) {
    %c0_i32 = arith.constant 0 : i32
    %c0_i32_0 = arith.constant 0 : i32
    %c0_i32_1 = arith.constant 0 : i32
    %c0_i32_2 = arith.constant 0 : i32
    return %c0_i32, %c0_i32_0, %c0_i32_1 : i32, i32, i32
  }
  func.func @transform_18(%arg0: i32) -> (i32, i32, i32) {
    %c0_i32 = arith.constant 0 : i32
    %c0_i32_0 = arith.constant 0 : i32
    %c0_i32_1 = arith.constant 0 : i32
    %c0_i32_2 = arith.constant 0 : i32
    return %c0_i32, %c0_i32_0, %c0_i32_1 : i32, i32, i32
  }
  func.func @transform_19(%arg0: i32) -> (i32, i32, i32) {
    %c0_i32 = arith.constant 0 : i32
    %c0_i32_0 = arith.constant 0 : i32
    %c0_i32_1 = arith.constant 0 : i32
    %c0_i32_2 = arith.constant 0 : i32
    return %c0_i32, %c0_i32_0, %c0_i32_1 : i32, i32, i32
  }
  func.func @transform_20(%arg0: i32) -> (i32, i32, i32) {
    %c0_i32 = arith.constant 0 : i32
    %c0_i32_0 = arith.constant 0 : i32
    %c0_i32_1 = arith.constant 0 : i32
    %c0_i32_2 = arith.constant 0 : i32
    return %c0_i32, %c0_i32_0, %c0_i32_1 : i32, i32, i32
  }
  func.func @transform_21(%arg0: i32) -> (i32, i32, i32) {
    %c0_i32 = arith.constant 0 : i32
    %c0_i32_0 = arith.constant 0 : i32
    %c0_i32_1 = arith.constant 0 : i32
    %c0_i32_2 = arith.constant 0 : i32
    return %c0_i32, %c0_i32_0, %c0_i32_1 : i32, i32, i32
  }
  func.func @transform_22(%arg0: i32) -> (i32, i32, i32) {
    %c0_i32 = arith.constant 0 : i32
    %c0_i32_0 = arith.constant 0 : i32
    %c0_i32_1 = arith.constant 0 : i32
    %c0_i32_2 = arith.constant 0 : i32
    return %c0_i32, %c0_i32_0, %c0_i32_1 : i32, i32, i32
  }
  func.func @transform_23(%arg0: i32) -> (i32, i32, i32) {
    %c0_i32 = arith.constant 0 : i32
    %c0_i32_0 = arith.constant 0 : i32
    %c0_i32_1 = arith.constant 0 : i32
    %c0_i32_2 = arith.constant 0 : i32
    return %c0_i32, %c0_i32_0, %c0_i32_1 : i32, i32, i32
  }
  func.func @transform_24(%arg0: i32) -> (i32, i32) {
    %c0_i32 = arith.constant 0 : i32
    %c0_i32_0 = arith.constant 0 : i32
    %c0_i32_1 = arith.constant 0 : i32
    return %c0_i32, %c0_i32_0 : i32, i32
  }
  func.func @transform_25(%arg0: i32) -> (i32, i32) {
    %c0_i32 = arith.constant 0 : i32
    %c0_i32_0 = arith.constant 0 : i32
    %c0_i32_1 = arith.constant 0 : i32
    return %c0_i32, %c0_i32_0 : i32, i32
  }
}

</mosaic_0001>

<bundles_post_ra>
// kernel: _lambda_.1
= control target key start
LH: loop header
LB: loop body
LE: loop exit
PB: predicated region body
PF: predicated region fallthrough
CT: control target
= control target key end

     0   :  { %s12018_s0 = inlined_call_operand.vmem [shape: s32[16,1], index: 0, kind: input, shape index: {}]   ;;  %s12019_s1 = inlined_call_operand.vmem [shape: s32[16,1], index: 1, kind: input, shape index: {}]   ;;  %s12020_s2 = inlined_call_operand.vmem [shape: f32[8,32], index: 2, kind: input, shape index: {}]   ;;  %s12021_s3 = inlined_call_operand.vmem [shape: f32[128,32], index: 3, kind: input, shape index: {}]   ;;  %s12022_s4 = inlined_call_operand.vmem [shape: f32[32,128], index: 4, kind: input, shape index: {}]   ;;  %s12023_s5 = inlined_call_operand.vmem [shape: f32[1,128], index: 5, kind: input, shape index: {}]   ;;  %s12024_s6 = inlined_call_operand.vmem [shape: f32[32,4], index: 6, kind: input, shape index: {}]   ;;  %s12025_s7 = inlined_call_operand.vmem [shape: f32[4,32], index: 7, kind: input, shape index: {}]   ;;  %s12026_s8 = inlined_call_operand.vmem [shape: f32[2,32,32], index: 8, kind: input, shape index: {}]   ;;  %s12027_s9 = inlined_call_operand.vmem [shape: f32[2,1,32], index: 9, kind: input, shape index: {}]   ;;  %s12028_s10 = inlined_call_operand.vmem [shape: f32[2,32,32], index: 10, kind: input, shape index: {}]   ;;  %s12029_s11 = inlined_call_operand.vmem [shape: f32[2,1,32], index: 11, kind: input, shape index: {}]   ;;  %s12030_s12 = inlined_call_operand.vmem [shape: f32[2,32,32], index: 12, kind: input, shape index: {}]   ;;  %s12031_s13 = inlined_call_operand.vmem [shape: f32[2,1,32], index: 13, kind: input, shape index: {}]   ;;  %s12032_s14 = inlined_call_operand.vmem [shape: f32[2,32,32], index: 14, kind: input, shape index: {}]   ;;  %s12033_s15 = inlined_call_operand.vmem [shape: f32[2,1,32], index: 15, kind: input, shape index: {}]   ;;  %s12034_s16 = inlined_call_operand.vmem [shape: f32[2,1,32], index: 16, kind: input, shape index: {}]   ;;  %s12035_s17 = inlined_call_operand.vmem [shape: f32[2,1,32], index: 17, kind: input, shape index: {}]   ;;  %s12036_s18 = inlined_call_operand.vmem [shape: bf16[2,32,2048], index: 18, kind: input, shape index: {}]   ;;  %s12037_s19 = inlined_call_operand.vmem [shape: f32[2,1,2048], index: 19, kind: input, shape index: {}]   ;;  %s12038_s20 = inlined_call_operand.vmem [shape: bf16[2,2048,32], index: 20, kind: input, shape index: {}]   ;;  %s12039_s21 = inlined_call_operand.vmem [shape: f32[2,1,32], index: 21, kind: input, shape index: {}]   ;;  %s12040_s22 = inlined_call_operand.vmem [shape: f32[2,1,32], index: 22, kind: input, shape index: {}]   ;;  %s12041_s23 = inlined_call_operand.vmem [shape: f32[2,1,32], index: 23, kind: input, shape index: {}]   ;;  %s12042_s24 = inlined_call_operand.hbm [shape: f32[16,128], index: 24, kind: output, shape index: {0}]   ;;  %s12043_s25 = inlined_call_operand.hbm [shape: f32[16,32], index: 25, kind: output, shape index: {1}]  }
   0x1   :  { %12052 = sst [smem:[#allocation8_spill]] %s12018_s0 }
   0x2   :  { %12053 = sst [smem:[#allocation9_spill]] %s12019_s1 }
   0x3   :  { %12054 = sst [smem:[#allocation10_spill]] %s12020_s2 }
   0x4   :  { %12055 = sst [smem:[#allocation11_spill]] %s12021_s3 }
   0x5   :  { %12056 = sst [smem:[#allocation12_spill]] %s12022_s4 }
   0x6   :  { %12057 = sst [smem:[#allocation13_spill]] %s12023_s5 }
   0x7   :  { %12058 = sst [smem:[#allocation14_spill]] %s12024_s6 }
   0x8   :  { %12059 = sst [smem:[#allocation15_spill]] %s12025_s7 }
   0x9   :  { %12060 = sst [smem:[#allocation16_spill]] %s12026_s8 }
   0xa   :  { %12061 = sst [smem:[#allocation17_spill]] %s12027_s9 }
   0xb   :  { %31 = vsyncpa [#allocation3], 0  ;;  %s12062_s6 = sld [smem:[#allocation8_spill]]  ;;  %v9672_v2 = vmov 0   ;;  %v98_v4 = vlaneseq  ;;  %v9673_v21 = vmov 0.0   ;;  %v9674_v23 = vmov 1.0  }
   0xc   :  { %s12063_s3 = sld [smem:[#allocation11_spill]]  ;;  %9296 = vset.pattern.permute.xlu0 %v9672_v2  ;;  %9297 = vset.pattern.permute.xlu1 %v9672_v2 }
   0xd   :  { %v9840_v9 = vand.u32 127, %v98_v4 }
  0x11   :  { %v100_v0 = vld [vmem:[%s12062_s6] sm:$0xff]  ;;  %v101_v6 = vld [vmem:[%s12062_s6 + $0x8] sm:$0xff] }
  0x12   :  { %v97_v1 = vld [vmem:[%s12063_s3 + $0x78] sm:$0xff]  ;;  %v96_v3 = vld [vmem:[%s12063_s3 + $0x70] sm:$0xff]  ;;  %103 = vperm.xlu0 %9296, %v100_v0   ;;  %v95_v5 = vld [vmem:[%s12063_s3 + $0x68] sm:$0xff] }
  0x13   :  { %9081 = vmatprep.subr.mxu0 %v97_v1  ;;  %v94_v7 = vld [vmem:[%s12063_s3 + $0x60] sm:$0xff]  ;;  %v93_v8 = vld [vmem:[%s12063_s3 + $0x58] sm:$0xff]  ;;  %v92_v10 = vld [vmem:[%s12063_s3 + $0x50] sm:$0xff] }
  0x14   :  { %9082 = vmatpush3.msra.mxu0 %v97_v1  ;;  %v91_v11 = vld [vmem:[%s12063_s3 + $0x48] sm:$0xff]  ;;  %v90_v12 = vld [vmem:[%s12063_s3 + $0x40] sm:$0xff]  ;;  %v89_v13 = vld [vmem:[%s12063_s3 + $0x38] sm:$0xff] }
  0x15   :  { %9083 = vmatprep.subr.mxu0 %v96_v3  ;;  %v88_v14 = vld [vmem:[%s12063_s3 + $0x30] sm:$0xff]  ;;  %v87_v15 = vld [vmem:[%s12063_s3 + $0x28] sm:$0xff]  ;;  %v86_v16 = vld [vmem:[%s12063_s3 + $0x20] sm:$0xff] }
  0x16   :  { %9084 = vmatpush3.msra.mxu0 %v96_v3  ;;  %106 = vperm.xlu0 %9296, %v101_v6   ;;  %v85_v17 = vld [vmem:[%s12063_s3 + $0x18] sm:$0xff]  ;;  %v84_v18 = vld [vmem:[%s12063_s3 + $0x10] sm:$0xff]  ;;  %v83_v19 = vld [vmem:[%s12063_s3 + $0x8] sm:$0xff] }
  0x17   :  { %9085 = vmatprep.subr.mxu0 %v95_v5  ;;  %v82_v20 = vld [vmem:[%s12063_s3] sm:$0xff] }
  0x18   :  { %9086 = vmatpush3.msra.mxu0 %v95_v5 }
  0x19   :  { %9087 = vmatprep.subr.mxu0 %v94_v7 }
  0x1a   :  { %9088 = vmatpush3.msra.mxu0 %v94_v7 }
  0x1b   :  { %9089 = vmatprep.subr.mxu0 %v93_v8 }
  0x1c   :  { %9090 = vmatpush3.msra.mxu0 %v93_v8 }
  0x1d   :  { %9091 = vmatprep.subr.mxu0 %v92_v10 }
  0x1e   :  { %9092 = vmatpush3.msra.mxu0 %v92_v10 }
  0x1f   :  { %9093 = vmatprep.subr.mxu0 %v91_v11 }
  0x20   :  { %9094 = vmatpush3.msra.mxu0 %v91_v11 }
  0x21   :  { %9095 = vmatprep.subr.mxu0 %v90_v12 }
  0x22   :  { %9096 = vmatpush3.msra.mxu0 %v90_v12 }
  0x23   :  { %9097 = vmatprep.subr.mxu0 %v89_v13 }
  0x24   :  { %9098 = vmatpush3.msra.mxu0 %v89_v13 }
  0x25   :  { %9099 = vmatprep.subr.mxu0 %v88_v14 }
  0x26   :  { %9100 = vmatpush3.msra.mxu0 %v88_v14 }
  0x27   :  { %9101 = vmatprep.subr.mxu0 %v87_v15 }
  0x28   :  { %9102 = vmatpush3.msra.mxu0 %v87_v15 }
  0x29   :  { %9103 = vmatprep.subr.mxu0 %v86_v16 }
  0x2a   :  { %9104 = vmatpush3.msra.mxu0 %v86_v16 }
  0x2b   :  { %9105 = vmatprep.subr.mxu0 %v85_v17 }
  0x2c   :  { %9106 = vmatpush3.msra.mxu0 %v85_v17 }
  0x2d   :  { %9107 = vmatprep.subr.mxu0 %v84_v18 }
  0x2e   :  { %9108 = vmatpush3.msra.mxu0 %v84_v18 }
  0x2f   :  { %9109 = vmatprep.subr.mxu0 %v83_v19 }
  0x30   :  { %9110 = vmatpush3.msra.mxu0 %v83_v19 }
  0x31   :  { %9111 = vmatprep.subr.mxu0 %v82_v20 }
  0x32   :  { %9112 = vmatpush3.msra.mxu0 %v82_v20 }
  0x33   :  { %9116 = vmatprep.subr.mxu0 %v9673_v21 }
  0x8d   :  { %v104_v22 = vpop.permute.xlu0 %103 }
  0x8e   :  { %vm108_vm0 = vcmp.eq.s32.totalorder %v9840_v9, %v104_v22 }
  0x8f   :  { %9113 = vmatprep.mubr.msk.f32.mxu0 %vm108_vm0, %v9674_v23 }
  0x91   :  { %v107_v24 = vpop.permute.xlu0 %106 }
  0x92   :  { %vm109_vm1 = vcmp.eq.s32.totalorder %v9840_v9, %v107_v24 }
  0x93   :  { %9114 = vmatmul.mubr.msk.f32.vlgmr.msra.gmra.mxu0 %vm109_vm1, %v9674_v23 }
  0x94   :  { %32 = vsyncpa [#allocation5], 0  ;;  %s12064_s9 = sld [smem:[#allocation16_spill]]  ;;  %vm9675_vm2 = vmmov 0   ;;  %v425_v29 = vld [vmem:[%s12028_s10 + $0x18] sm:$0xff]  ;;  %v424_v30 = vld [vmem:[%s12028_s10 + $0x10] sm:$0xff] }
  0x95   :  { %9124 = vmatprep.mubr.msk.f32.mxu0 %vm9675_vm2, %v9673_v21  ;;  %9127 = vmatprep.subr.mxu1 %v425_v29  ;;  %v423_v31 = vld [vmem:[%s12028_s10 + $0x8] sm:$0xff]  ;;  %v422_v32 = vld [vmem:[%s12028_s10] sm:$0xff]  ;;  %v9912_v33 = vld [vmem:[%s12030_s12 + $0x18] sm:$0xff]  ;;  %v9676_v34 = vmov 1966171168   ;;  %v9916_v36 = vshrl.u32 %v98_v4, 7 }
  0x96   :  { %9128 = vmatpush3.msra.mxu1 %v425_v29  ;;  %v237_v35 = vunpack.c.l.s4 %v9676_v34  ;;  %s12065_s30 = sld [smem:[#allocation10_spill]]  ;;  %v9677_v42 = vmov 1983009808   ;;  %vm348_vm3 = vcmask 261120   ;;  %vm967_vm4 = vcmask 1043456  }
  0x97   :  { %9129 = vmatprep.subr.mxu1 %v424_v30  ;;  %v193_v43 = vunpack.c.l.s4 %v9677_v42  ;;  %v9926_v56 = vsub.s32 0, %v9916_v36  ;;  %s12066_s0 = sld [smem:[#allocation14_spill]]  ;;  %vm856_vm5 = vcmask 25600   ;;  %vm962_vm6 = vcmask 31744  }
  0x98   :  { %9130 = vmatpush3.msra.mxu1 %v424_v30  ;;  %v238_v37 = vunpack.c.0.s8 %v237_v35  ;;  %s12067_s28 = sld [smem:[#allocation17_spill]]  ;;  %vm1092_vm7 = vcmask 254976  }
  0x99   :  { %9131 = vmatprep.subr.mxu1 %v423_v31  ;;  %v194_v46 = vunpack.c.0.s8 %v193_v43  ;;  %s12068_s2 = sld [smem:[#allocation15_spill]] }
  0x9a   :  { %v340_v25 = vld [vmem:[%s12064_s9 + $0x18] sm:$0xff]  ;;  %v339_v26 = vld [vmem:[%s12064_s9 + $0x10] sm:$0xff]  ;;  %v338_v27 = vld [vmem:[%s12064_s9 + $0x8] sm:$0xff]  ;;  %9132 = vmatpush3.msra.mxu1 %v423_v31  ;;  %v241_v40 = vsub.s32 %v238_v37, %v9916_v36 }
  0x9b   :  { %9117 = vmatpush3.msra.mxu0 %v340_v25  ;;  %v337_v28 = vld [vmem:[%s12064_s9] sm:$0xff]  ;;  %9133 = vmatprep.subr.mxu1 %v422_v32  ;;  %v9923_v51 = vsub.s32 %v194_v46, %v9916_v36 }
  0x9c   :  { %9118 = vmatprep.subr.mxu0 %v9673_v21  ;;  %9134 = vmatpush3.msra.mxu1 %v422_v32  ;;  %v233_v38 = vld [vmem:[%s12065_s30] sm:$0xff] }
  0x9d   :  { %9119 = vmatpush3.msra.mxu0 %v339_v26  ;;  %9138 = vmatprep.subr.mxu1 %v9912_v33  ;;  %v235_v39 = vcombine.high %v233_v38, %v233_v38  ;;  %v242_v44 = vrot.slane %v233_v38, %v241_v40  ;;  %v555_v38 = vld [vmem:[%s12030_s12 + $0x10] sm:$0xff]  ;;  %v333_v42 = vld [vmem:[%s12066_s0 + $0x8] sm:$0xff]  ;;  %v332_v43 = vld [vmem:[%s12066_s0] sm:$0xff] }
  0x9e   :  { %9120 = vmatprep.subr.mxu0 %v9673_v21  ;;  %v7929_v46 = vld [vmem:[%s12029_s11] ss:$0 sm:$0xff] }
  0x9f   :  { %9121 = vmatpush3.msra.mxu0 %v338_v27  ;;  %v249_v41 = vrot.slane %v235_v39, %v241_v40  ;;  %v250_v47 = vcombine.high %v242_v44, %v242_v44  ;;  %v258_v50 = vrot.slane %v242_v44, %v241_v40  ;;  %v554_v39 = vld [vmem:[%s12030_s12 + $0x8] sm:$0xff] }
  0xa0   :  { %9122 = vmatprep.subr.mxu0 %v9673_v21 }
  0xa1   :  { %9123 = vmatpush3.msra.mxu0 %v337_v28  ;;  %v251_v45 = vcombine.high %v249_v41, %v249_v41  ;;  %v265_v48 = vrot.slane %v249_v41, %v241_v40  ;;  %v272_v52 = vrot.slane %v250_v47, %v241_v40  ;;  %v280_v57 = vcombine.high %v258_v50, %v258_v50  ;;  %v334_v41 = vld [vmem:[%s12066_s0 + $0x10] sm:$0xff] }
  0xa2   :  { %v287_v0 = vrot.slane %v258_v50, %v9926_v56  ;;  %v7927_v50 = vld [vmem:[%s12067_s28] ss:$0 sm:$0xff] }
  0xa3   :  { %v279_v49 = vrot.slane %v251_v45, %v241_v40  ;;  %v281_v53 = vcombine.high %v265_v48, %v265_v48  ;;  %v282_v60 = vcombine.high %v272_v52, %v272_v52  ;;  %v303_v6 = vrot.slane %v265_v48, %v9926_v56  ;;  %v553_v40 = vld [vmem:[%s12030_s12] sm:$0xff] }
  0xa4   :  { %v291_v8 = vrot.slane %v272_v52, %v9926_v56  ;;  %v295_v10 = vrot.slane %v280_v57, %v9926_v56 }
  0xa5   :  { %v283_v54 = vcombine.high %v279_v49, %v279_v49  ;;  %v307_v61 = vrot.slane %v279_v49, %v9926_v56  ;;  %v311_v62 = vrot.slane %v281_v53, %v9926_v56  ;;  %v299_v13 = vrot.slane %v282_v60, %v9926_v56 }
  0xa7   :  { %v315_v4 = vrot.slane %v283_v54, %v9926_v56 }
 0x153   :  { %v9115_v55 = vpop.f32.mrf.mxu0 }
 0x154   :  { %v208_v58 = vcombine.high %v9115_v55, %v9115_v55  ;;  %v215_v59 = vrot.slane %v9115_v55, %v9923_v51 }
 0x155   :  { %v180_v63 = vpop.f32.mrf.mxu0 }
 0x156   :  { %v222_v1 = vrot.slane %v208_v58, %v9923_v51  ;;  %v223_v3 = vcombine.high %v215_v59, %v215_v59  ;;  %v191_v5 = vcombine.high %v180_v63, %v180_v63  ;;  %v198_v7 = vrot.slane %v180_v63, %v9923_v51 }
 0x157   :  { %v9948_v20 = vadd.f32 %v303_v6, %v215_v59 }
 0x158   :  { %v224_v11 = vcombine.high %v222_v1, %v222_v1  ;;  %v205_v12 = vrot.slane %v191_v5, %v9923_v51  ;;  %v9940_v14 = vadd.f32 %v307_v61, %v223_v3  ;;  %v206_v15 = vcombine.high %v198_v7, %v198_v7 }
 0x159   :  { %v9942_v16 = vadd.f32 %v287_v0, %v198_v7  ;;  %v9944_v17 = vadd.f32 %v311_v62, %v222_v1 }
 0x15a   :  { %v9946_v18 = vadd.f32 %v315_v4, %v224_v11  ;;  %v207_v19 = vcombine.high %v205_v12, %v205_v12  ;;  %v9950_v22 = vadd.f32 %v291_v8, %v206_v15  ;;  %v9956_v25 = vadd.f32 %v295_v10, %v205_v12 }
 0x15b   :  { %9125 = vmatmul.mubr.msk.f32.vlgmr.msra.gmra.mxu0 %vm348_vm3, %v9942_v16  ;;  %v457_v27 = vcombine.low %v9948_v20, %v9940_v14 }
 0x15c   :  { %v458_v24 = vcombine.low %v9944_v17, %v9946_v18  ;;  %v9958_v26 = vadd.f32 %v299_v13, %v207_v19  ;;  %v440_v28 = vcombine.low %v9942_v16, %v9950_v22 }
 0x15d   :  { %v465_v34 = vrot.slane %v457_v27, %v9923_v51 }
 0x15e   :  { %v441_v29 = vcombine.low %v9956_v25, %v9958_v26  ;;  %v472_v30 = vrot.slane %v458_v24, %v9923_v51  ;;  %v448_v31 = vrot.slane %v440_v28, %v9923_v51 }
 0x160   :  { %v455_v32 = vrot.slane %v441_v29, %v9923_v51  ;;  %v473_v37 = vcombine.low %v465_v34, %v472_v30 }
 0x162   :  { %v456_v35 = vcombine.low %v448_v31, %v455_v32  ;;  %v336_v31 = vld [vmem:[%s12068_s2] sm:$0xf] }
 0x163   :  { %9160 = vmatprep.subr.msk.mxu0 %vm967_vm4, %v336_v31 }
 0x164   :  { %9135 = vmatprep.mubr.msk.f32.mxu1 %vm348_vm3, %v456_v35  ;;  %9161 = vmatpush3.msk.msra.mxu0 %vm967_vm4, %v336_v31 }
 0x165   :  { %9136 = vmatmul.mubr.msk.f32.vlgmr.msra.gmra.mxu1 %vm348_vm3, %v473_v37 }
 0x166   :  { %9139 = vmatpush3.msra.mxu1 %v9912_v33  ;;  %9146 = vmatprep.mubr.msk.f32.mxu1 %vm348_vm3, %v456_v35  ;;  %v335_v33 = vld [vmem:[%s12066_s0 + $0x18] sm:$0xff] }
 0x167   :  { %9140 = vmatprep.subr.mxu1 %v555_v38 }
 0x168   :  { %9141 = vmatpush3.msra.mxu1 %v555_v38 }
 0x169   :  { %9142 = vmatprep.subr.mxu1 %v554_v39 }
 0x16a   :  { %9143 = vmatpush3.msra.mxu1 %v554_v39 }
 0x16b   :  { %9144 = vmatprep.subr.mxu1 %v553_v40 }
 0x16c   :  { %9145 = vmatpush3.msra.mxu1 %v553_v40 }
 0x16d   :  { %9147 = vmatmul.mubr.msk.f32.vlgmr.msra.gmra.mxu1 %vm348_vm3, %v473_v37  ;;  %9149 = vmatprep.subr.mxu1 %v335_v33 }
 0x16e   :  { %9150 = vmatpush3.msra.mxu1 %v335_v33 }
 0x16f   :  { %9151 = vmatprep.subr.mxu1 %v334_v41 }
 0x170   :  { %9152 = vmatpush3.msra.mxu1 %v334_v41 }
 0x171   :  { %9153 = vmatprep.subr.mxu1 %v333_v42 }
 0x172   :  { %9154 = vmatpush3.msra.mxu1 %v333_v42 }
 0x173   :  { %9155 = vmatprep.subr.mxu1 %v332_v43 }
 0x174   :  { %9156 = vmatpush3.msra.mxu1 %v332_v43 }
 0x175   :  { %9165 = vmatprep.subr.mxu1 %v9673_v21 }
 0x21b   :  { %v418_v44 = vpop.f32.mrf.mxu0 }
 0x21c   :  { %v419_v59 = vadd.f32 %v7927_v50, %v418_v44 }
 0x21d   :  { %v9126_v45 = vpop.f32.mrf.mxu0 }
 0x225   :  { %v9137_v47 = vpop.f32.mrf.mxu1 }
 0x226   :  { %v550_v48 = vadd.f32 %v9137_v47, %v7929_v46 }
 0x227   :  { %v544_v49 = vpop.f32.mrf.mxu1 }
 0x228   :  { %v658_v52 = vcombine.high %v550_v48, %v550_v48  ;;  %v665_v53 = vrot.slane %v550_v48, %v9923_v51  ;;  %v545_v54 = vadd.f32 %v7929_v46, %v544_v49 }
 0x22a   :  { %v672_v55 = vrot.slane %v658_v52, %v9923_v51  ;;  %v673_v57 = vcombine.high %v665_v53, %v665_v53  ;;  %v641_v58 = vcombine.high %v545_v54, %v545_v54  ;;  %v648_v60 = vrot.slane %v545_v54, %v9923_v51 }
 0x22b   :  { %v687_v5 = vmul.f32 %v665_v53, %v419_v59 }
 0x22c   :  { %v674_v61 = vcombine.high %v672_v55, %v672_v55  ;;  %v655_v62 = vrot.slane %v641_v58, %v9923_v51  ;;  %v688_v63 = vmul.f32 %v673_v57, %v419_v59  ;;  %v656_v0 = vcombine.high %v648_v60, %v648_v60 }
 0x22d   :  { %v689_v1 = vmul.f32 %v672_v55, %v419_v59  ;;  %v683_v6 = vmul.f32 %v648_v60, %v419_v59  ;;  %v10020_v32 = vpop.f32.mrf.mxu1 }
 0x22e   :  { %v690_v3 = vmul.f32 %v674_v61, %v419_v59  ;;  %v657_v4 = vcombine.high %v655_v62, %v655_v62  ;;  %v684_v7 = vmul.f32 %v656_v0, %v419_v59  ;;  %v685_v10 = vmul.f32 %v655_v62, %v419_v59 }
 0x22f   :  { %v716_v12 = vcombine.low %v687_v5, %v688_v63  ;;  %v10022_v34 = vpop.f32.mrf.mxu1 }
 0x230   :  { %v717_v8 = vcombine.low %v689_v1, %v690_v3  ;;  %v686_v11 = vmul.f32 %v657_v4, %v419_v59  ;;  %v699_v13 = vcombine.low %v683_v6, %v684_v7 }
 0x231   :  { %v724_v28 = vrot.slane %v716_v12, %v9923_v51 }
 0x232   :  { %v700_v15 = vcombine.low %v685_v10, %v686_v11  ;;  %v731_v19 = vrot.slane %v717_v8, %v9923_v51  ;;  %v707_v24 = vrot.slane %v699_v13, %v9923_v51 }
 0x234   :  { %v714_v27 = vrot.slane %v700_v15, %v9923_v51  ;;  %v732_v30 = vcombine.low %v724_v28, %v731_v19 }
 0x236   :  { %v715_v29 = vcombine.low %v707_v24, %v714_v27 }
 0x238   :  { %9157 = vmatprep.mubr.msk.f32.mxu1 %vm348_vm3, %v715_v29 }
 0x239   :  { %9158 = vmatmul.mubr.msk.f32.vlgmr.msra.gmra.mxu1 %vm348_vm3, %v732_v30 }
 0x23a   :  { %9173 = vmatprep.mubr.msk.f32.mxu1 %vm9675_vm2, %v9673_v21 }
 0x2f9   :  { %v9159_v35 = vpop.f32.mrf.mxu1 }
 0x2fa   :  { %v831_v37 = vcombine.high %v9159_v35, %v9159_v35  ;;  %v838_v38 = vrot.slane %v9159_v35, %v9923_v51 }
 0x2fb   :  { %v803_v39 = vpop.f32.mrf.mxu1 }
 0x2fc   :  { %v845_v40 = vrot.slane %v831_v37, %v9923_v51  ;;  %v814_v33 = vcombine.high %v803_v39, %v803_v39  ;;  %v846_v41 = vcombine.high %v838_v38, %v838_v38  ;;  %v821_v42 = vrot.slane %v803_v39, %v9923_v51 }
 0x2fd   :  { %v861_v49 = vsel %vm856_vm5, %v838_v38, -inf }
 0x2fe   :  { %v847_v43 = vcombine.high %v845_v40, %v845_v40  ;;  %v828_v44 = vrot.slane %v814_v33, %v9923_v51  ;;  %v829_v45 = vcombine.high %v821_v42, %v821_v42  ;;  %v857_v47 = vsel %vm856_vm5, %v821_v42, -inf }
 0x2ff   :  { %v863_v50 = vsel %vm856_vm5, %v846_v41, -inf  ;;  %v865_v53 = vsel %vm856_vm5, %v845_v40, -inf  ;;  %v862_v58 = vmax.f32 %v857_v47, %v861_v49 }
 0x300   :  { %v830_v46 = vcombine.high %v828_v44, %v828_v44  ;;  %v859_v48 = vsel %vm856_vm5, %v828_v44, -inf  ;;  %v858_v52 = vsel %vm856_vm5, %v829_v45, -inf  ;;  %v867_v54 = vsel %vm856_vm5, %v847_v43, -inf }
 0x301   :  { %v864_v57 = vmax.f32 %v858_v52, %v863_v50  ;;  %v866_v59 = vmax.f32 %v859_v48, %v865_v53 }
 0x302   :  { %v860_v55 = vsel %vm856_vm5, %v830_v46, -inf }
 0x303   :  { %v868_v60 = vmax.f32 %v860_v55, %v867_v54  ;;  %v869_v61 = vmax.f32 %v862_v58, %v864_v57 }
 0x305   :  { %v870_v62 = vmax.f32 %v866_v59, %v868_v60 }
 0x307   :  { %v871_v63 = vmax.f32 %v869_v61, %v870_v62 }
 0x309   :  { %v872_v0 = vsub.f32 %v821_v42, %v871_v63  ;;  %v873_v1 = vsub.f32 %v829_v45, %v871_v63  ;;  %v874_v3 = vsub.f32 %v828_v44, %v871_v63  ;;  %v875_v4 = vsub.f32 %v830_v46, %v871_v63 }
 0x30a   :  { %v876_v5 = vsub.f32 %v838_v38, %v871_v63  ;;  %v877_v10 = vsub.f32 %v846_v41, %v871_v63  ;;  %v878_v12 = vsub.f32 %v845_v40, %v871_v63  ;;  %v879_v15 = vsub.f32 %v847_v43, %v871_v63 }
 0x30b   :  { %v880_v6 = vmul.f32 1.442695, %v872_v0  ;;  %v882_v7 = vmul.f32 1.442695, %v873_v1  ;;  %v884_v8 = vmul.f32 1.442695, %v874_v3 }
 0x30c   :  { %v886_v11 = vmul.f32 1.442695, %v875_v4  ;;  %v888_v13 = vmul.f32 1.442695, %v876_v5  ;;  %v890_v19 = vmul.f32 1.442695, %v877_v10 }
 0x30d   :  { %9555 = vpow2.f32 %v880_v6  ;;  %v892_v24 = vmul.f32 1.442695, %v878_v12  ;;  %v894_v27 = vmul.f32 1.442695, %v879_v15  ;;  %v1110_v15 = vld [vmem:[%s12032_s14 + $0x10] sm:$0xff] }
 0x30e   :  { %9557 = vpow2.f32 %v882_v7 }
 0x30f   :  { %9559 = vpow2.f32 %v884_v8 }
 0x310   :  { %9561 = vpow2.f32 %v886_v11 }
 0x311   :  { %9563 = vpow2.f32 %v888_v13  ;;  %v1111_v13 = vld [vmem:[%s12032_s14 + $0x18] sm:$0xff] }
 0x312   :  { %9565 = vpow2.f32 %v890_v19  ;;  %9166 = vmatpush3.msra.mxu1 %v1111_v13  ;;  %v1109_v19 = vld [vmem:[%s12032_s14 + $0x8] sm:$0xff] }
 0x313   :  { %9567 = vpow2.f32 %v892_v24  ;;  %9167 = vmatprep.subr.mxu1 %v9673_v21  ;;  %v1108_v24 = vld [vmem:[%s12032_s14] sm:$0xff] }
 0x314   :  { %9569 = vpow2.f32 %v894_v27  ;;  %9168 = vmatpush3.msra.mxu1 %v1110_v15  ;;  %v7932_v27 = vld [vmem:[%s12031_s13] ss:$0 sm:$0xff] }
 0x315   :  { %9169 = vmatprep.subr.mxu1 %v9673_v21 }
 0x316   :  { %9170 = vmatpush3.msra.mxu1 %v1109_v19 }
 0x317   :  { %9171 = vmatprep.subr.mxu1 %v9673_v21 }
 0x318   :  { %9172 = vmatpush3.msra.mxu1 %v1108_v24 }
 0x31a   :  { %v9556_v28 = vpop.eup %9555 }
 0x31b   :  { %v9558_v29 = vpop.eup %9557  ;;  %v896_v30 = vsel %vm856_vm5, %v9556_v28, 0.0 }
 0x31c   :  { %v9560_v31 = vpop.eup %9559  ;;  %v897_v35 = vsel %vm856_vm5, %v9558_v29, 0.0 }
 0x31d   :  { %v9562_v37 = vpop.eup %9561  ;;  %v898_v38 = vadd.f32 %v897_v35, %v896_v30  ;;  %v899_v39 = vsel %vm856_vm5, %v9560_v31, 0.0 }
 0x31e   :  { %v9564_v40 = vpop.eup %9563  ;;  %v901_v41 = vsel %vm856_vm5, %v9562_v37, 0.0 }
 0x31f   :  { %v900_v33 = vadd.f32 %v899_v39, %v898_v38  ;;  %v9566_v42 = vpop.eup %9565  ;;  %v903_v44 = vsel %vm856_vm5, %v9564_v40, 0.0 }
 0x320   :  { %v9568_v45 = vpop.eup %9567  ;;  %v905_v47 = vsel %vm856_vm5, %v9566_v42, 0.0 }
 0x321   :  { %v902_v43 = vadd.f32 %v901_v41, %v900_v33  ;;  %v9570_v48 = vpop.eup %9569  ;;  %v907_v50 = vsel %vm856_vm5, %v9568_v45, 0.0 }
 0x322   :  { %v909_v53 = vsel %vm856_vm5, %v9570_v48, 0.0 }
 0x323   :  { %v904_v46 = vadd.f32 %v903_v44, %v902_v43 }
 0x325   :  { %v906_v49 = vadd.f32 %v905_v47, %v904_v46 }
 0x327   :  { %v908_v52 = vadd.f32 %v907_v50, %v906_v49 }
 0x329   :  { %v910_v54 = vadd.f32 %v909_v53, %v908_v52 }
 0x32b   :  { %9571 = vrcp.f32 %v910_v54 }
 0x338   :  { %v9572_v55 = vpop.eup %9571 }
 0x339   :  { %v912_v57 = vmul.f32 %v9572_v55, %v9556_v28  ;;  %v913_v58 = vmul.f32 %v9572_v55, %v9558_v29  ;;  %v914_v59 = vmul.f32 %v9572_v55, %v9560_v31  ;;  %v915_v60 = vmul.f32 %v9572_v55, %v9562_v37 }
 0x33a   :  { %v916_v61 = vmul.f32 %v9572_v55, %v9564_v40  ;;  %v917_v62 = vmul.f32 %v9572_v55, %v9566_v42  ;;  %v918_v63 = vmul.f32 %v9572_v55, %v9568_v45  ;;  %v919_v0 = vmul.f32 %v9572_v55, %v9570_v48 }
 0x33b   :  { %v928_v1 = vcombine.low %v912_v57, %v913_v58  ;;  %v929_v3 = vcombine.low %v914_v59, %v915_v60  ;;  %v631_v29 = vadd.f32 %v7932_v27, %v10022_v34  ;;  %v636_v31 = vadd.f32 %v10020_v32, %v7932_v27 }
 0x33c   :  { %v945_v4 = vcombine.low %v916_v61, %v917_v62  ;;  %v946_v5 = vcombine.low %v918_v63, %v919_v0  ;;  %v7940_v62 = vld [vmem:[%s12033_s15] ss:$0 sm:$0xff] }
 0x33d   :  { %v936_v6 = vrot.slane %v928_v1, %v9923_v51  ;;  %v943_v7 = vrot.slane %v929_v3, %v9923_v51 }
 0x33e   :  { %v953_v8 = vrot.slane %v945_v4, %v9923_v51  ;;  %v960_v10 = vrot.slane %v946_v5, %v9923_v51 }
 0x33f   :  { %v944_v11 = vcombine.low %v936_v6, %v943_v7 }
 0x340   :  { %v961_v12 = vcombine.low %v953_v8, %v960_v10 }
 0x341   :  { %9162 = vmatprep.mubr.msk.f32.mxu0 %vm962_vm6, %v944_v11 }
 0x342   :  { %9163 = vmatmul.mubr.msk.f32.vlgmr.msra.gmra.mxu0 %vm962_vm6, %v961_v12 }
 0x343   :  { %1891 = vmatprep.mubr.bf16.mxu0 %v9672_v2 }
 0x402   :  { %v9164_v28 = vpop.f32.mrf.mxu0 }
 0x403   :  { %v1047_v37 = vmul.f32 %v9164_v28, %v636_v31  ;;  %v9679_v28 = vmov 842150450  }
 0x404   :  { %v1037_v30 = vpop.f32.mrf.mxu0 }
 0x405   :  { %v1046_v35 = vmul.f32 %v1037_v30, %v631_v29  ;;  %v1067_v41 = vcombine.high %v1047_v37, %v1047_v37  ;;  %v1074_v42 = vrot.slane %v1047_v37, %v9923_v51  ;;  %v1263_v29 = vunpack.c.l.s4 %v9679_v28 }
 0x406   :  { %v9680_v30 = vmov 1414812756  }
 0x407   :  { %v1050_v38 = vcombine.high %v1046_v35, %v1046_v35  ;;  %v1057_v39 = vrot.slane %v1046_v35, %v9923_v51  ;;  %v1081_v47 = vrot.slane %v1067_v41, %v9923_v51  ;;  %v1082_v48 = vcombine.high %v1074_v42, %v1074_v42 }
 0x408   :  { %v1100_v52 = vsel %vm1092_vm7, %v1074_v42, 0.0  ;;  %v1270_v31 = vunpack.c.l.s4 %v9680_v30  ;;  %v9681_v35 = vmov 1987475062   ;;  %v1605_v30 = vld [vmem:[%s12036_s18 + $0xc8] sm:$0xff] }
 0x409   :  { %v1064_v40 = vrot.slane %v1050_v38, %v9923_v51  ;;  %v1065_v33 = vcombine.high %v1057_v39, %v1057_v39  ;;  %v1093_v44 = vsel %vm1092_vm7, %v1057_v39, 0.0  ;;  %v1083_v54 = vcombine.high %v1081_v47, %v1081_v47 }
 0x40a   :  { %v1102_v55 = vsel %vm1092_vm7, %v1082_v48, 0.0  ;;  %v1104_v58 = vsel %vm1092_vm7, %v1081_v47, 0.0  ;;  %v1277_v37 = vunpack.c.l.s4 %v9681_v35  ;;  %v1264_v39 = vunpack.c.0.s8 %v1263_v29  ;;  %v1588_v35 = vld [vmem:[%s12036_s18 + $0x40] sm:$0xff] }
 0x40b   :  { %v1066_v43 = vcombine.high %v1064_v40, %v1064_v40  ;;  %v1094_v34 = vsel %vm1092_vm7, %v1065_v33, 0.0  ;;  %v1096_v32 = vsel %vm1092_vm7, %v1064_v40, 0.0  ;;  %v1106_v60 = vsel %vm1092_vm7, %v1083_v54, 0.0 }
 0x40c   :  { %v1095_v45 = vadd.f32 %v1094_v34, %v1093_v44  ;;  %v1271_v40 = vunpack.c.0.s8 %v1270_v31  ;;  %v1278_v33 = vunpack.c.0.s8 %v1277_v37  ;;  %v10106_v42 = vsub.s32 %v1264_v39, %v9916_v36  ;;  %v1580_v31 = vld [vmem:[%s12036_s18] sm:$0xff] }
 0x40d   :  { %v1098_v49 = vsel %vm1092_vm7, %v1066_v43, 0.0  ;;  %v7945_v39 = vcombine.high %v1580_v31, %v1588_v35 }
 0x40e   :  { %v1097_v46 = vadd.f32 %v1096_v32, %v1095_v45  ;;  %v10109_v43 = vsub.s32 %v1271_v40, %v9916_v36  ;;  %v10112_v44 = vsub.s32 %v1278_v33, %v9916_v36  ;;  %v1581_v40 = vld [vmem:[%s12036_s18 + $0x8] sm:$0xff] }
 0x40f   :  { %v1589_v33 = vld [vmem:[%s12036_s18 + $0x48] sm:$0xff] }
 0x410   :  { %v1099_v50 = vadd.f32 %v1098_v49, %v1097_v46 }
 0x412   :  { %v1101_v53 = vadd.f32 %v1100_v52, %v1099_v50 }
 0x414   :  { %v1103_v57 = vadd.f32 %v1102_v55, %v1101_v53 }
 0x416   :  { %v1105_v59 = vadd.f32 %v1104_v58, %v1103_v57 }
 0x418   :  { %v1107_v61 = vadd.f32 %v1106_v60, %v1105_v59 }
 0x41a   :  { %9174 = vmatmul.mubr.msk.f32.vlgmr.msra.gmra.mxu1 %vm348_vm3, %v1107_v61 }
 0x41b   :  { %1934 = vmatprep.mubr.bf16.mxu1 %v9672_v2 }
 0x4da   :  { %v1188_v63 = vpop.f32.mrf.mxu1 }
 0x4db   :  { %v1189_v0 = vadd.f32 %v7940_v62, %v1188_v63 }
 0x4dc   :  { %v9175_v1 = vpop.f32.mrf.mxu1 }
 0x4dd   :  { %v1192_v3 = vadd.f32 %v1189_v0, %v9942_v16  ;;  %v1193_v4 = vadd.f32 %v1189_v0, %v9950_v22  ;;  %v1194_v5 = vadd.f32 %v1189_v0, %v9956_v25  ;;  %v1195_v6 = vadd.f32 %v1189_v0, %v9958_v26 }
 0x4de   :  { %v1196_v7 = vadd.f32 %v1189_v0, %v9948_v20  ;;  %v1197_v8 = vadd.f32 %v1189_v0, %v9940_v14  ;;  %v1198_v10 = vadd.f32 %v1189_v0, %v9944_v17  ;;  %v1199_v11 = vadd.f32 %v1189_v0, %v9946_v18 }
 0x4df   :  { %v1208_v12 = vcombine.low %v1192_v3, %v1193_v4  ;;  %v1209_v13 = vcombine.low %v1194_v5, %v1195_v6  ;;  %v9678_v18 = vmov 269488144  }
 0x4e0   :  { %v1225_v15 = vcombine.low %v1196_v7, %v1197_v8  ;;  %v1226_v19 = vcombine.low %v1198_v10, %v1199_v11  ;;  %v1256_v27 = vunpack.c.l.s4 %v9678_v18  ;;  %v1604_v18 = vld [vmem:[%s12036_s18 + $0xc0] sm:$0xff] }
 0x4e1   :  { %v1216_v16 = vrot.slane %v1208_v12, %v9923_v51  ;;  %v1223_v22 = vrot.slane %v1209_v13, %v9923_v51 }
 0x4e2   :  { %v1233_v25 = vrot.slane %v1225_v15, %v9923_v51  ;;  %v1240_v26 = vrot.slane %v1226_v19, %v9923_v51  ;;  %v1257_v38 = vunpack.c.0.s8 %v1256_v27  ;;  %v1597_v27 = vld [vmem:[%s12036_s18 + $0x88] sm:$0xff] }
 0x4e3   :  { %v1224_v24 = vcombine.low %v1216_v16, %v1223_v22  ;;  %v7962_v37 = vcombine.low %v1597_v27, %v1605_v30 }
 0x4e4   :  { %v1241_v14 = vcombine.low %v1233_v25, %v1240_v26  ;;  %v10103_v41 = vsub.s32 %v1257_v38, %v9916_v36  ;;  %v7963_v38 = vcombine.high %v1597_v27, %v1605_v30 }
 0x4e5   :  { %v1244_v20 = vsel %vm348_vm3, %v1224_v24, 0.0 }
 0x4e6   :  { %1245 = vadd.xlane.f32.xlu1 %v1244_v20  ;;  %v1247_v17 = vsel %vm348_vm3, %v1241_v14, 0.0  ;;  %1914 = vmatprep.subr.bf16.mxu1 %v7963_v38 }
 0x4e7   :  { %1915 = vmatpush1.bf16.msra.mxu1 %v7962_v37 }
 0x4ea   :  { %1248 = vadd.xlane.f32.xlu1 %v1247_v17  ;;  %v1596_v17 = vld [vmem:[%s12036_s18 + $0x80] sm:$0xff] }
 0x4eb   :  { %v7960_v28 = vcombine.low %v1596_v17, %v1604_v18  ;;  %v7961_v29 = vcombine.high %v1596_v17, %v1604_v18 }
 0x4ed   :  { %1871 = vmatprep.subr.bf16.mxu0 %v7961_v29 }
 0x4ee   :  { %1872 = vmatpush1.bf16.msra.mxu0 %v7960_v28 }
 0x4ef   :  { %1873 = vmatprep.subr.bf16.mxu0 %v7945_v39 }
 0x56f   :  { %v1246_v34 = vpop.xlane.xlu1 %1245 }
 0x570   :  { %v1251_v45 = vmul.f32 0.03125, %v1246_v34  ;;  %v7947_v34 = vcombine.high %v1581_v40, %v1589_v33 }
 0x572   :  { %v1261_v32 = vrot.slane %v1251_v45, %v10103_v41  ;;  %v1268_v46 = vrot.slane %v1251_v45, %v10106_v42  ;;  %v1275_v47 = vrot.slane %v1251_v45, %v10109_v43  ;;  %v1282_v48 = vrot.slane %v1251_v45, %v10112_v44  ;;  %1916 = vmatprep.subr.bf16.mxu1 %v7947_v34 }
 0x573   :  { %v1249_v49 = vpop.xlane.xlu1 %1248  ;;  %v7944_v45 = vcombine.low %v1580_v31, %v1588_v35 }
 0x574   :  { %v1252_v50 = vmul.f32 0.03125, %v1249_v49  ;;  %v10118_v52 = vsub.f32 %v1192_v3, %v1261_v32  ;;  %v10120_v53 = vsub.f32 %v1193_v4, %v1268_v46  ;;  %v10122_v54 = vsub.f32 %v1194_v5, %v1275_v47  ;;  %v10187_v46 = vld [vmem:[%s12036_s18 + $0x90] sm:$0xff] }
 0x575   :  { %v10124_v55 = vsub.f32 %v1195_v6, %v1282_v48  ;;  %v7946_v32 = vcombine.low %v1581_v40, %v1589_v33  ;;  %1874 = vmatpush1.bf16.msra.mxu0 %v7944_v45  ;;  %v10192_v47 = vld [vmem:[%s12036_s18 + $0xd0] sm:$0xff]  ;;  %v10197_v48 = vld [vmem:[%s12036_s18 + $0x98] sm:$0xff] }
 0x576   :  { %v1289_v57 = vrot.slane %v1252_v50, %v10103_v41  ;;  %v1296_v58 = vrot.slane %v1252_v50, %v10106_v42  ;;  %v1303_v59 = vrot.slane %v1252_v50, %v10109_v43  ;;  %v1310_v60 = vrot.slane %v1252_v50, %v10112_v44 }
 0x577   :  { %v1327_v61 = vmul.f32 %v10118_v52, %v10118_v52  ;;  %v1328_v62 = vmul.f32 %v10120_v53, %v10120_v53  ;;  %v1329_v63 = vmul.f32 %v10122_v54, %v10122_v54  ;;  %v1330_v0 = vmul.f32 %v10124_v55, %v10124_v55  ;;  %1917 = vmatpush1.bf16.msra.mxu1 %v7946_v32 }
 0x578   :  { %v10138_v1 = vsub.f32 %v1196_v7, %v1289_v57  ;;  %v10140_v3 = vsub.f32 %v1197_v8, %v1296_v58  ;;  %v10142_v4 = vsub.f32 %v1198_v10, %v1303_v59  ;;  %v10144_v5 = vsub.f32 %v1199_v11, %v1310_v60  ;;  %v10206_v57 = vld [vmem:[%s12036_s18 + $0xd8] sm:$0xff] }
 0x579   :  { %v1343_v6 = vcombine.low %v1327_v61, %v1328_v62  ;;  %v1344_v12 = vcombine.low %v1329_v63, %v1330_v0  ;;  %v7964_v49 = vcombine.low %v10187_v46, %v10192_v47  ;;  %v7965_v50 = vcombine.high %v10187_v46, %v10192_v47  ;;  %v1592_v46 = vld [vmem:[%s12036_s18 + $0x60] sm:$0xff]  ;;  %v1585_v47 = vld [vmem:[%s12036_s18 + $0x28] sm:$0xff] }
 0x57a   :  { %v1331_v13 = vmul.f32 %v10138_v1, %v10138_v1  ;;  %v1332_v15 = vmul.f32 %v10140_v3, %v10140_v3  ;;  %v1333_v19 = vmul.f32 %v10142_v4, %v10142_v4  ;;  %v1334_v7 = vmul.f32 %v10144_v5, %v10144_v5 }
 0x57b   :  { %v1351_v8 = vrot.slane %v1343_v6, %v9923_v51  ;;  %v1358_v10 = vrot.slane %v1344_v12, %v9923_v51  ;;  %v7966_v58 = vcombine.low %v10197_v48, %v10206_v57  ;;  %v7967_v59 = vcombine.high %v10197_v48, %v10206_v57  ;;  %1957 = vmatprep.subr.bf16.mxu0 %v7965_v50  ;;  %v7942_v12 = vld [vmem:[%s12034_s16] ss:$0 sm:$0xff]  ;;  %v1593_v48 = vld [vmem:[%s12036_s18 + $0x68] sm:$0xff] }
 0x57c   :  { %v1360_v11 = vcombine.low %v1331_v13, %v1332_v15  ;;  %v1361_v16 = vcombine.low %v1333_v19, %v1334_v7  ;;  %v7943_v13 = vld [vmem:[%s12035_s17] ss:$0 sm:$0xff]  ;;  %v1471_v15 = vcombine.high %v7942_v12, %v7942_v12  ;;  %v1478_v7 = vrot.slane %v7942_v12, %v9923_v51 }
 0x57d   :  { %v1359_v22 = vcombine.low %v1351_v8, %v1358_v10  ;;  %2000 = vmatprep.subr.bf16.mxu1 %v7967_v59  ;;  %v1506_v19 = vcombine.high %v7943_v13, %v7943_v13  ;;  %v1513_v10 = vrot.slane %v7943_v13, %v9923_v51 }
 0x57e   :  { %v1368_v25 = vrot.slane %v1360_v11, %v9923_v51  ;;  %v1375_v26 = vrot.slane %v1361_v16, %v9923_v51  ;;  %v1485_v8 = vrot.slane %v1471_v15, %v9923_v51 }
 0x57f   :  { %v1379_v24 = vsel %vm348_vm3, %v1359_v22, 0.0  ;;  %v1520_v11 = vrot.slane %v1506_v19, %v9923_v51  ;;  %v1486_v22 = vcombine.high %v1478_v7, %v1478_v7  ;;  %v1521_v17 = vcombine.high %v1513_v10, %v1513_v10 }
 0x580   :  { %1380 = vadd.xlane.f32.xlu0 %v1379_v24  ;;  %v1376_v20 = vcombine.low %v1368_v25, %v1375_v26  ;;  %v1487_v25 = vcombine.high %v1485_v8, %v1485_v8 }
 0x581   :  { %v1522_v18 = vcombine.high %v1520_v11, %v1520_v11 }
 0x582   :  { %v1382_v14 = vsel %vm348_vm3, %v1376_v20, 0.0 }
 0x583   :  { %1383 = vadd.xlane.f32.xlu1 %v1382_v14 }
 0x609   :  { %v1381_v60 = vpop.xlane.xlu0 %1380 }
 0x60a   :  { %v1385_v61 = vmul.f32 0.03125, %v1381_v60 }
 0x60c   :  { %v1387_v62 = vadd.f32 1e-05, %v1385_v61  ;;  %v1384_v63 = vpop.xlane.xlu1 %1383 }
 0x60d   :  { %v1386_v0 = vmul.f32 0.03125, %v1384_v63 }
 0x60e   :  { %9573 = vrsqrt.f32 %v1387_v62 }
 0x60f   :  { %v1388_v6 = vadd.f32 1e-05, %v1386_v0 }
 0x611   :  { %9575 = vrsqrt.f32 %v1388_v6 }
 0x61b   :  { %v9574_v16 = vpop.eup %9573 }
 0x61c   :  { %v1399_v26 = vrot.slane %v9574_v16, %v10103_v41  ;;  %v1406_v24 = vrot.slane %v9574_v16, %v10106_v42  ;;  %v1413_v20 = vrot.slane %v9574_v16, %v10109_v43  ;;  %v1420_v14 = vrot.slane %v9574_v16, %v10112_v44  ;;  %v1590_v16 = vld [vmem:[%s12036_s18 + $0x50] sm:$0xff] }
 0x61e   :  { %v9576_v27 = vpop.eup %9575  ;;  %v1457_v28 = vmul.f32 %v1399_v26, %v10118_v52  ;;  %v1458_v29 = vmul.f32 %v1406_v24, %v10120_v53  ;;  %v1459_v30 = vmul.f32 %v1413_v20, %v10122_v54  ;;  %v1460_v31 = vmul.f32 %v1420_v14, %v10124_v55 }
 0x61f   :  { %v1427_v35 = vrot.slane %v9576_v27, %v10103_v41  ;;  %v1434_v37 = vrot.slane %v9576_v27, %v10106_v42  ;;  %v1441_v38 = vrot.slane %v9576_v27, %v10109_v43  ;;  %v1448_v39 = vrot.slane %v9576_v27, %v10112_v44  ;;  %v1608_v27 = vld [vmem:[%s12036_s18 + $0xe0] sm:$0xff] }
 0x620   :  { %v1492_v40 = vmul.f32 %v1478_v7, %v1457_v28  ;;  %v1493_v33 = vmul.f32 %v1486_v22, %v1458_v29  ;;  %v1494_v34 = vmul.f32 %v1485_v8, %v1459_v30  ;;  %v1495_v45 = vmul.f32 %v1487_v25, %v1460_v31  ;;  %v1601_v28 = vld [vmem:[%s12036_s18 + $0xa8] sm:$0xff] }
 0x621   :  { %v1461_v52 = vmul.f32 %v1427_v35, %v10138_v1  ;;  %v1462_v53 = vmul.f32 %v1434_v37, %v10140_v3  ;;  %v1463_v54 = vmul.f32 %v1441_v38, %v10142_v4  ;;  %v1464_v55 = vmul.f32 %v1448_v39, %v10144_v5  ;;  %v1609_v29 = vld [vmem:[%s12036_s18 + $0xe8] sm:$0xff]  ;;  %v1584_v38 = vld [vmem:[%s12036_s18 + $0x20] sm:$0xff] }
 0x622   :  { %v10238_v32 = vadd.f32 %v1513_v10, %v1492_v40  ;;  %v10240_v50 = vadd.f32 %v1521_v17, %v1493_v33  ;;  %v10242_v59 = vadd.f32 %v1520_v11, %v1494_v34  ;;  %v10244_v60 = vadd.f32 %v1522_v18, %v1495_v45  ;;  %v1602_v40 = vld [vmem:[%s12036_s18 + $0xb0] sm:$0xff]  ;;  %v1603_v34 = vld [vmem:[%s12036_s18 + $0xb8] sm:$0xff] }
 0x623   :  { %v1496_v61 = vmul.f32 %v1478_v7, %v1461_v52  ;;  %v1497_v62 = vmul.f32 %v1486_v22, %v1462_v53  ;;  %v1498_v63 = vmul.f32 %v1485_v8, %v1463_v54  ;;  %v1499_v0 = vmul.f32 %v1487_v25, %v1464_v55  ;;  %v1583_v22 = vld [vmem:[%s12036_s18 + $0x18] sm:$0xff]  ;;  %v1610_v33 = vld [vmem:[%s12036_s18 + $0xf0] sm:$0xff] }
 0x624   :  { %v1543_v1 = vcombine.low %v10238_v32, %v10240_v50  ;;  %v1544_v3 = vcombine.low %v10242_v59, %v10244_v60  ;;  %v1591_v25 = vld [vmem:[%s12036_s18 + $0x58] sm:$0xff]  ;;  %v7971_v37 = vcombine.high %v1601_v28, %v1609_v29  ;;  %v7970_v57 = vcombine.low %v1601_v28, %v1609_v29  ;;  %v9312_v28 = vld [vmem:[%s12038_s20 + $0xe0] sm:$0xff]  }
 0x625   :  { %v10250_v4 = vadd.f32 %v1513_v10, %v1496_v61  ;;  %v10252_v5 = vadd.f32 %v1521_v17, %v1497_v62  ;;  %v10254_v6 = vadd.f32 %v1520_v11, %v1498_v63  ;;  %v10256_v12 = vadd.f32 %v1522_v18, %v1499_v0  ;;  %v1582_v11 = vld [vmem:[%s12036_s18 + $0x10] sm:$0xff]  ;;  %v1600_v18 = vld [vmem:[%s12036_s18 + $0xa0] sm:$0xff]  ;;  %v1611_v45 = vld [vmem:[%s12036_s18 + $0xf8] sm:$0xff] }
 0x626   :  { %v1551_v13 = vrot.slane %v1543_v1, %v9923_v51  ;;  %v1558_v15 = vrot.slane %v1544_v3, %v9923_v51  ;;  %v7949_v14 = vcombine.high %v1582_v11, %v1590_v16  ;;  %v7951_v17 = vcombine.high %v1583_v22, %v1591_v25  ;;  %v1586_v61 = vld [vmem:[%s12036_s18 + $0x30] sm:$0xff]  ;;  %v1587_v63 = vld [vmem:[%s12036_s18 + $0x38] sm:$0xff]  ;;  %v9313_v29 = vld [vmem:[%s12038_s20 + $0x20] sm:$0xff]  }
 0x627   :  { %v1560_v19 = vcombine.low %v10250_v4, %v10252_v5  ;;  %v1561_v7 = vcombine.low %v10254_v6, %v10256_v12  ;;  %v7948_v30 = vcombine.low %v1582_v11, %v1590_v16  ;;  %v7950_v31 = vcombine.low %v1583_v22, %v1591_v25  ;;  %v1594_v62 = vld [vmem:[%s12036_s18 + $0x70] sm:$0xff]  ;;  %v1595_v0 = vld [vmem:[%s12036_s18 + $0x78] sm:$0xff] }
 0x628   :  { %v1559_v26 = vcombine.low %v1551_v13, %v1558_v15  ;;  %v7969_v35 = vcombine.high %v1600_v18, %v1608_v27  ;;  %v7955_v39 = vcombine.high %v1585_v47, %v1593_v48  ;;  %v7952_v52 = vcombine.low %v1584_v38, %v1592_v46  ;;  %v9301_v11 = vld [vmem:[%s12038_s20 + $0x38] sm:$0xff]   ;;  %v9303_v22 = vld [vmem:[%s12038_s20 + $0x70] sm:$0xff]  }
 0x629   :  { %v1568_v8 = vrot.slane %v1560_v19, %v9923_v51  ;;  %v1575_v10 = vrot.slane %v1561_v7, %v9923_v51  ;;  %v7954_v53 = vcombine.low %v1585_v47, %v1593_v48  ;;  %v7973_v54 = vcombine.high %v1602_v40, %v1610_v33  ;;  %v9302_v16 = vld [vmem:[%s12038_s20 + $0xb8] sm:$0xff]   ;;  %v9304_v25 = vld [vmem:[%s12038_s20 + $0xf0] sm:$0xff]  }
 0x62a   :  { %v7975_v55 = vcombine.high %v1603_v34, %v1611_v45  ;;  %v7972_v1 = vcombine.low %v1602_v40, %v1610_v33  ;;  %v7974_v3 = vcombine.low %v1603_v34, %v1611_v45  ;;  %v7957_v13 = vcombine.high %v1586_v61, %v1594_v62  ;;  %v9320_v47 = vld [vmem:[%s12038_s20 + $0xd0] sm:$0xff]   ;;  %v9326_v40 = vld [vmem:[%s12038_s20 + $0x88] sm:$0xff]   ;;  %v9327_v33 = vld [vmem:[%s12038_s20 + $0x40] sm:$0xff]  }
 0x62b   :  { %v1576_v24 = vcombine.low %v1568_v8, %v1575_v10  ;;  %v7959_v15 = vcombine.high %v1587_v63, %v1595_v0  ;;  %v7956_v19 = vcombine.low %v1586_v61, %v1594_v62  ;;  %v7958_v7 = vcombine.low %v1587_v63, %v1595_v0  ;;  %v9299_v8 = vld [vmem:[%s12038_s20 + $0x78] sm:$0xff]   ;;  %v9321_v48 = vld [vmem:[%s12038_s20 + $0x10] sm:$0xff]   ;;  %v9328_v34 = vld [vmem:[%s12038_s20 + $0xc0] sm:$0xff]  }
 0x62c   :  { %v9300_v10 = vld [vmem:[%s12038_s20 + $0xf8] sm:$0xff]   ;;  %v9329_v45 = vld [vmem:[%s12038_s20] sm:$0xff]   ;;  %v10462_v61 = vsub.s32 3, %v9916_v36  ;;  %v10465_v62 = vsub.s32 2, %v9916_v36 }
 0x62d   :  { %v10278_v20 = vpack.c.bf16 %v1576_v24, %v1559_v26  ;;  %v9305_v26 = vld [vmem:[%s12038_s20 + $0x30] sm:$0xff]   ;;  %v10470_v63 = vld [vmem:[%s12037_s19] sm:$0xff] }
 0x62e   :  { %v9306_v24 = vld [vmem:[%s12038_s20 + $0xb0] sm:$0xff]  }
 0x62f   :  { %7976 = vmatmul.mubr.msk.bf16.vlgmr.msra.gmra.mxu0 %vm348_vm3, %v10278_v20  ;;  %7977 = vmatmul.mubr.msk.bf16.vlgmr.msra.gmra.mxu1 %vm348_vm3, %v10278_v20 }
 0x630   :  { %1958 = vmatpush1.bf16.msra.mxu0 %v7964_v49  ;;  %2001 = vmatpush1.bf16.msra.mxu1 %v7966_v58  ;;  %v7968_v49 = vcombine.low %v1600_v18, %v1608_v27  ;;  %v7953_v58 = vcombine.high %v1584_v38, %v1592_v46  ;;  %v9310_v18 = vld [vmem:[%s12038_s20 + $0xa8] sm:$0xff]   ;;  %v9311_v27 = vld [vmem:[%s12038_s20 + $0x60] sm:$0xff]   ;;  %v9318_v38 = vld [vmem:[%s12038_s20 + $0x98] sm:$0xff]  }
 0x631   :  { %1959 = vmatprep.subr.bf16.mxu0 %v7949_v14  ;;  %2002 = vmatprep.subr.bf16.mxu1 %v7951_v17  ;;  %v9307_v14 = vld [vmem:[%s12038_s20 + $0x68] sm:$0xff]   ;;  %v9319_v46 = vld [vmem:[%s12038_s20 + $0x50] sm:$0xff]  }
 0x632   :  { %1977 = vmatprep.mubr.bf16.mxu0 %v9672_v2  ;;  %2020 = vmatprep.mubr.bf16.mxu1 %v9672_v2  ;;  %v9309_v17 = vld [vmem:[%s12038_s20 + $0x28] sm:$0xff]  }
 0x634   :  { %1960 = vmatpush1.bf16.msra.mxu0 %v7948_v30  ;;  %2003 = vmatpush1.bf16.msra.mxu1 %v7950_v31  ;;  %v9314_v30 = vld [vmem:[%s12038_s20 + $0xa0] sm:$0xff]   ;;  %v9315_v31 = vld [vmem:[%s12038_s20 + $0x58] sm:$0xff]  }
 0x635   :  { %2043 = vmatprep.subr.bf16.mxu0 %v7969_v35  ;;  %2086 = vmatprep.subr.bf16.mxu1 %v7971_v37  ;;  %v9316_v35 = vld [vmem:[%s12038_s20 + $0xd8] sm:$0xff]  }
 0x636   :  { %v9317_v37 = vld [vmem:[%s12038_s20 + $0x18] sm:$0xff]  }
 0x637   :  { %7978 = vmatmul.mubr.msk.bf16.vlgmr.msra.gmra.mxu0 %vm348_vm3, %v10278_v20  ;;  %7979 = vmatmul.mubr.msk.bf16.vlgmr.msra.gmra.mxu1 %vm348_vm3, %v10278_v20 }
 0x638   :  { %2044 = vmatpush1.bf16.msra.mxu0 %v7968_v49  ;;  %2087 = vmatpush1.bf16.msra.mxu1 %v7970_v57  ;;  %v9322_v49 = vld [vmem:[%s12038_s20 + $0x90] sm:$0xff]   ;;  %v9323_v57 = vld [vmem:[%s12038_s20 + $0x48] sm:$0xff]  }
 0x639   :  { %2045 = vmatprep.subr.bf16.mxu0 %v7953_v58  ;;  %2088 = vmatprep.subr.bf16.mxu1 %v7955_v39  ;;  %v9324_v58 = vld [vmem:[%s12038_s20 + $0xc8] sm:$0xff]  }
 0x63a   :  { %2063 = vmatprep.mubr.bf16.mxu0 %v9672_v2  ;;  %2106 = vmatprep.mubr.bf16.mxu1 %v9672_v2  ;;  %v9325_v39 = vld [vmem:[%s12038_s20 + $0x8] sm:$0xff]  }
 0x63c   :  { %2046 = vmatpush1.bf16.msra.mxu0 %v7952_v52  ;;  %2089 = vmatpush1.bf16.msra.mxu1 %v7954_v53  ;;  %v9330_v52 = vld [vmem:[%s12038_s20 + $0x80] sm:$0xff]   ;;  %v9331_v53 = vld [vmem:[%s12038_s20 + $0x178] sm:$0xff]  }
 0x63d   :  { %2129 = vmatprep.subr.bf16.mxu0 %v7973_v54  ;;  %2172 = vmatprep.subr.bf16.mxu1 %v7975_v55  ;;  %v9332_v54 = vld [vmem:[%s12038_s20 + $0x1f8] sm:$0xff]   ;;  %v10459_v55 = vsub.s32 1, %v9916_v36 }
 0x63f   :  { %7980 = vmatmul.mubr.msk.bf16.vlgmr.msra.gmra.mxu0 %vm348_vm3, %v10278_v20  ;;  %7981 = vmatmul.mubr.msk.bf16.vlgmr.msra.gmra.mxu1 %vm348_vm3, %v10278_v20 }
 0x640   :  { %2130 = vmatpush1.bf16.msra.mxu0 %v7972_v1  ;;  %2173 = vmatpush1.bf16.msra.mxu1 %v7974_v3  ;;  %v1623_v3 = vrot.slane %v10470_v63, %v10459_v55 }
 0x641   :  { %2131 = vmatprep.subr.bf16.mxu0 %v7957_v13  ;;  %2174 = vmatprep.subr.bf16.mxu1 %v7959_v15  ;;  %v1631_v13 = vrot.slane %v10470_v63, %v10462_v61  ;;  %v1619_v15 = vrot.slane %v10470_v63, %v9926_v56 }
 0x642   :  { %2149 = vmatprep.mubr.bf16.mxu0 %v9672_v2  ;;  %2192 = vmatprep.mubr.bf16.mxu1 %v9672_v2 }
 0x644   :  { %2132 = vmatpush1.bf16.msra.mxu0 %v7956_v19  ;;  %2175 = vmatpush1.bf16.msra.mxu1 %v7958_v7  ;;  %v1627_v19 = vrot.slane %v10470_v63, %v10465_v62 }
 0x645   :  { %8674 = vmatprep.subr.bf16.mxu0 %v9299_v8  ;;  %8696 = vmatprep.subr.bf16.mxu1 %v9300_v10 }
 0x647   :  { %7982 = vmatmul.mubr.msk.bf16.vlgmr.msra.gmra.mxu0 %vm348_vm3, %v10278_v20  ;;  %7983 = vmatmul.mubr.msk.bf16.vlgmr.msra.gmra.mxu1 %vm348_vm3, %v10278_v20  ;;  %v9308_v20 = vld [vmem:[%s12038_s20 + $0xe8] sm:$0xff]  }
 0x648   :  { %8675 = vmatpush3.bf16.msra.mxu0 %v9301_v11  ;;  %8697 = vmatpush3.bf16.msra.mxu1 %v9302_v16  ;;  %v10481_v16 = vsub.s32 5, %v9916_v36 }
 0x649   :  { %8676 = vmatprep.subr.bf16.mxu0 %v9303_v22  ;;  %8698 = vmatprep.subr.bf16.mxu1 %v9304_v25  ;;  %v10484_v22 = vsub.s32 7, %v9916_v36 }
 0x64c   :  { %8677 = vmatpush3.bf16.msra.mxu0 %v9305_v26  ;;  %8699 = vmatpush3.bf16.msra.mxu1 %v9306_v24 }
 0x64d   :  { %8678 = vmatprep.subr.bf16.mxu0 %v9307_v14  ;;  %8700 = vmatprep.subr.bf16.mxu1 %v9308_v20 }
 0x650   :  { %8679 = vmatpush3.bf16.msra.mxu0 %v9309_v17  ;;  %8701 = vmatpush3.bf16.msra.mxu1 %v9310_v18 }
 0x651   :  { %8680 = vmatprep.subr.bf16.mxu0 %v9311_v27  ;;  %8702 = vmatprep.subr.bf16.mxu1 %v9312_v28 }
 0x654   :  { %8681 = vmatpush3.bf16.msra.mxu0 %v9313_v29  ;;  %8703 = vmatpush3.bf16.msra.mxu1 %v9314_v30 }
 0x655   :  { %8682 = vmatprep.subr.bf16.mxu0 %v9315_v31  ;;  %8704 = vmatprep.subr.bf16.mxu1 %v9316_v35 }
 0x658   :  { %8683 = vmatpush3.bf16.msra.mxu0 %v9317_v37  ;;  %8705 = vmatpush3.bf16.msra.mxu1 %v9318_v38  ;;  %v1639_v38 = vrot.slane %v10470_v63, %v10481_v16 }
 0x659   :  { %8684 = vmatprep.subr.bf16.mxu0 %v9319_v46  ;;  %8706 = vmatprep.subr.bf16.mxu1 %v9320_v47  ;;  %v1647_v46 = vrot.slane %v10470_v63, %v10484_v22 }
 0x65c   :  { %8685 = vmatpush3.bf16.msra.mxu0 %v9321_v48  ;;  %8707 = vmatpush3.bf16.msra.mxu1 %v9322_v49 }
 0x65d   :  { %8686 = vmatprep.subr.bf16.mxu0 %v9323_v57  ;;  %8708 = vmatprep.subr.bf16.mxu1 %v9324_v58 }
 0x660   :  { %8687 = vmatpush3.bf16.msra.mxu0 %v9325_v39  ;;  %8709 = vmatpush3.bf16.msra.mxu1 %v9326_v40 }
 0x661   :  { %8688 = vmatprep.subr.bf16.mxu0 %v9327_v33  ;;  %8710 = vmatprep.subr.bf16.mxu1 %v9328_v34 }
 0x664   :  { %8689 = vmatpush3.bf16.msra.mxu0 %v9329_v45  ;;  %8711 = vmatpush3.bf16.msra.mxu1 %v9330_v52  ;;  %v9333_v52 = vld [vmem:[%s12038_s20 + $0x138] sm:$0xff]  }
 0x665   :  { %8718 = vmatprep.subr.bf16.mxu0 %v9331_v53  ;;  %8740 = vmatprep.subr.bf16.mxu1 %v9332_v54  ;;  %v9334_v53 = vld [vmem:[%s12038_s20 + $0x1b8] sm:$0xff]  }
 0x6ef   :  { %v1893_v0 = vpop.f32.mrf.mxu0  ;;  %v1936_v1 = vpop.f32.mrf.mxu1 }
 0x6f0   :  { %v1894_v20 = vadd.f32 %v1893_v0, %v1619_v15  ;;  %v1937_v17 = vadd.f32 %v1936_v1, %v1627_v19 }
 0x6f1   :  { %v1895_v7 = vpop.f32.mrf.mxu0  ;;  %v1938_v8 = vpop.f32.mrf.mxu1 }
 0x6f2   :  { %v1896_v25 = vadd.f32 %v1895_v7, %v1623_v3  ;;  %v1939_v26 = vadd.f32 %v1938_v8, %v1631_v13  ;;  %v2203_v58 = vmax.f32 %v1894_v20, 0.0  ;;  %v2205_v39 = vmax.f32 %v1937_v17, 0.0 }
 0x6f3   :  { %v1897_v10 = vpop.f32.mrf.mxu0  ;;  %v1940_v11 = vpop.f32.mrf.mxu1 }
 0x6f4   :  { %v1898_v24 = vadd.f32 %v1897_v10, %v1619_v15  ;;  %v1941_v14 = vadd.f32 %v1940_v11, %v1627_v19  ;;  %v2204_v47 = vmax.f32 %v1896_v25, 0.0  ;;  %v2206_v48 = vmax.f32 %v1939_v26, 0.0  ;;  %v9336_v15 = vld [vmem:[%s12038_s20 + $0x1f0] sm:$0xff]  }
 0x6f5   :  { %v1899_v18 = vpop.f32.mrf.mxu0  ;;  %v1942_v27 = vpop.f32.mrf.mxu1  ;;  %v9337_v26 = vld [vmem:[%s12038_s20 + $0x130] sm:$0xff]  }
 0x6f6   :  { %v1900_v28 = vadd.f32 %v1899_v18, %v1623_v3  ;;  %v1943_v29 = vadd.f32 %v1942_v27, %v1631_v13  ;;  %v2219_v30 = vmax.f32 %v1898_v24, 0.0  ;;  %v2221_v31 = vmax.f32 %v1941_v14, 0.0  ;;  %v9335_v13 = vld [vmem:[%s12038_s20 + $0x170] sm:$0xff]   ;;  %v9339_v14 = vld [vmem:[%s12038_s20 + $0x168] sm:$0xff]  }
 0x6f7   :  { %v10486_v35 = vpop.f32.mrf.mxu0  ;;  %v10488_v37 = vpop.f32.mrf.mxu1  ;;  %v9338_v24 = vld [vmem:[%s12038_s20 + $0x1b0] sm:$0xff]  }
 0x6f8   :  { %v2220_v49 = vmax.f32 %v1900_v28, 0.0  ;;  %v2222_v57 = vmax.f32 %v1943_v29, 0.0  ;;  %v2235_v54 = vpack.c.bf16 %v2219_v30, %v2203_v58  ;;  %v2237_v0 = vpack.c.bf16 %v2221_v31, %v2205_v39  ;;  %v9340_v28 = vld [vmem:[%s12038_s20 + $0x1e8] sm:$0xff]   ;;  %v9346_v58 = vld [vmem:[%s12038_s20 + $0x1a0] sm:$0xff]   ;;  %v9347_v39 = vld [vmem:[%s12038_s20 + $0x158] sm:$0xff]  }
 0x6f9   :  { %v1981_v40 = vpop.f32.mrf.mxu0  ;;  %v2024_v33 = vpop.f32.mrf.mxu1  ;;  %v9341_v31 = vld [vmem:[%s12038_s20 + $0x128] sm:$0xff]  }
 0x6fa   :  { %v2236_v34 = vpack.c.bf16 %v2220_v49, %v2204_v47  ;;  %v2238_v45 = vpack.c.bf16 %v2222_v57, %v2206_v48  ;;  %v1982_v19 = vadd.f32 %v1981_v40, %v1639_v38  ;;  %v2025_v7 = vadd.f32 %v2024_v33, %v1647_v46  ;;  %v9344_v47 = vld [vmem:[%s12038_s20 + $0x1e0] sm:$0xff]   ;;  %v9348_v40 = vld [vmem:[%s12038_s20 + $0x1d8] sm:$0xff]  }
 0x6fb   :  { %v10500_v1 = vpop.f32.mrf.mxu0  ;;  %v10502_v3 = vpop.f32.mrf.mxu1  ;;  %v9345_v49 = vld [vmem:[%s12038_s20 + $0x120] sm:$0xff]  }
 0x6fc   :  { %3314 = vmatprep.mubr.bf16.mxu0 %v2236_v34  ;;  %3355 = vmatprep.mubr.bf16.mxu1 %v2238_v45  ;;  %v2208_v20 = vmax.f32 %v1982_v19, 0.0  ;;  %v2210_v17 = vmax.f32 %v2025_v7, 0.0  ;;  %v9349_v34 = vld [vmem:[%s12038_s20 + $0x118] sm:$0xff]   ;;  %v9353_v19 = vld [vmem:[%s12038_s20 + $0x110] sm:$0xff]  }
 0x6fd   :  { %v1985_v8 = vpop.f32.mrf.mxu0  ;;  %v2028_v10 = vpop.f32.mrf.mxu1  ;;  %3315 = vmatmul.mubr.bf16.vlgmr.msra.gmra.mxu0 %v2235_v54  ;;  %3356 = vmatmul.mubr.bf16.vlgmr.msra.gmra.mxu1 %v2237_v0  ;;  %v9352_v54 = vld [vmem:[%s12038_s20 + $0x1d0] sm:$0xff]   ;;  %v10563_v0 = vsub.s32 4, %v9916_v36 }
 0x6fe   :  { %v1986_v11 = vadd.f32 %v1985_v8, %v1639_v38  ;;  %v2029_v25 = vadd.f32 %v2028_v10, %v1647_v46  ;;  %8719 = vmatpush3.bf16.msra.mxu0 %v9333_v52  ;;  %8741 = vmatpush3.bf16.msra.mxu1 %v9334_v53  ;;  %v9342_v38 = vld [vmem:[%s12038_s20 + $0x1a8] sm:$0xff]   ;;  %v9343_v46 = vld [vmem:[%s12038_s20 + $0x160] sm:$0xff]   ;;  %v9350_v52 = vld [vmem:[%s12038_s20 + $0x198] sm:$0xff]  }
 0x6ff   :  { %8720 = vmatprep.subr.bf16.mxu0 %v9335_v13  ;;  %8742 = vmatprep.subr.bf16.mxu1 %v9336_v15  ;;  %v10534_v48 = vpop.f32.mrf.mxu0  ;;  %v10539_v57 = vpop.f32.mrf.mxu1  ;;  %v9351_v53 = vld [vmem:[%s12038_s20 + $0x150] sm:$0xff]   ;;  %v10566_v13 = vsub.s32 6, %v9916_v36  ;;  %v9355_v36 = vld [vmem:[%s12038_s20 + $0x148] sm:$0xff]  }
 0x700   :  { %v2224_v18 = vmax.f32 %v1986_v11, 0.0  ;;  %v2226_v27 = vmax.f32 %v2029_v25, 0.0  ;;  %v9354_v8 = vld [vmem:[%s12038_s20 + $0x190] sm:$0xff]   ;;  %v9356_v10 = vld [vmem:[%s12038_s20 + $0x1c8] sm:$0xff]   ;;  %v1635_v11 = vrot.slane %v10470_v63, %v10563_v0 }
 0x701   :  { %v2067_v33 = vpop.f32.mrf.mxu0  ;;  %v2110_v45 = vpop.f32.mrf.mxu1  ;;  %v1643_v25 = vrot.slane %v10470_v63, %v10566_v13  ;;  %v9358_v63 = vld [vmem:[%s12038_s20 + $0x188] sm:$0xff]  }
 0x702   :  { %v2240_v29 = vpack.c.bf16 %v2224_v18, %v2208_v20  ;;  %v2242_v30 = vpack.c.bf16 %v2226_v27, %v2210_v17  ;;  %8721 = vmatpush3.bf16.msra.mxu0 %v9337_v26  ;;  %8743 = vmatpush3.bf16.msra.mxu1 %v9338_v24  ;;  %v10591_v26 = vld [vmem:[%s12037_s19 + $0x8] sm:$0xff]  ;;  %v1984_v20 = vadd.f32 %v10500_v1, %v1635_v11  ;;  %v9359_v27 = vld [vmem:[%s12038_s20 + $0x140] sm:$0xff]  }
 0x703   :  { %8722 = vmatprep.subr.bf16.mxu0 %v9339_v14  ;;  %8744 = vmatprep.subr.bf16.mxu1 %v9340_v28  ;;  %v10568_v15 = vpop.f32.mrf.mxu0  ;;  %v10573_v7 = vpop.f32.mrf.mxu1  ;;  %v9357_v14 = vld [vmem:[%s12038_s20 + $0x108] sm:$0xff]   ;;  %v1655_v17 = vrot.slane %v10591_v26, %v10459_v55  ;;  %v2027_v28 = vadd.f32 %v10502_v3, %v1643_v25  ;;  %v9360_v1 = vld [vmem:[%s12038_s20 + $0x1c0] sm:$0xff]  }
 0x704   :  { %3396 = vmatprep.mubr.bf16.mxu0 %v2240_v29  ;;  %3437 = vmatprep.mubr.bf16.mxu1 %v2242_v30  ;;  %v1663_v29 = vrot.slane %v10591_v26, %v10462_v61  ;;  %v1980_v30 = vadd.f32 %v10486_v35, %v1635_v11  ;;  %v2223_v3 = vmax.f32 %v1984_v20, 0.0  ;;  %v9363_v35 = vld [vmem:[%s12038_s20 + $0x278] sm:$0xff]   ;;  %v9367_v11 = vld [vmem:[%s12038_s20 + $0x270] sm:$0xff]  }
 0x705   :  { %v2071_v24 = vpop.f32.mrf.mxu0  ;;  %v2114_v18 = vpop.f32.mrf.mxu1  ;;  %v9369_v20 = vld [vmem:[%s12038_s20 + $0x230] sm:$0xff]  }
 0x706   :  { %8723 = vmatpush3.bf16.msra.mxu0 %v9341_v31  ;;  %8745 = vmatpush3.bf16.msra.mxu1 %v9342_v38  ;;  %v2072_v31 = vadd.f32 %v2071_v24, %v1655_v17  ;;  %v2023_v38 = vadd.f32 %v10488_v37, %v1643_v25  ;;  %v2111_v37 = vadd.f32 %v2110_v45, %v1663_v29  ;;  %v9366_v45 = vld [vmem:[%s12038_s20 + $0x2b8] sm:$0xff]   ;;  %v9368_v24 = vld [vmem:[%s12038_s20 + $0x2f0] sm:$0xff]  }
 0x707   :  { %8724 = vmatprep.subr.bf16.mxu0 %v9343_v46  ;;  %8746 = vmatprep.subr.bf16.mxu1 %v9344_v47  ;;  %v2115_v46 = vadd.f32 %v2114_v18, %v1663_v29  ;;  %v9361_v47 = vld [vmem:[%s12038_s20 + $0x100] sm:$0xff]   ;;  %v9371_v18 = vld [vmem:[%s12038_s20 + $0x268] sm:$0xff]  }
 0x708   :  { %v9375_v29 = vld [vmem:[%s12038_s20 + $0x260] sm:$0xff]  }
 0x70a   :  { %8725 = vmatpush3.bf16.msra.mxu0 %v9345_v49  ;;  %8747 = vmatpush3.bf16.msra.mxu1 %v9346_v58  ;;  %v2068_v49 = vadd.f32 %v2067_v33, %v1655_v17  ;;  %v9362_v58 = vld [vmem:[%s12038_s20 + $0x180] sm:$0xff]   ;;  %v2209_v33 = vmax.f32 %v2023_v38, 0.0  ;;  %v9370_v17 = vld [vmem:[%s12038_s20 + $0x2b0] sm:$0xff]   ;;  %v10666_v38 = vpop.f32.mrf.mxu1 }
 0x70b   :  { %8726 = vmatprep.subr.bf16.mxu0 %v9347_v39  ;;  %8748 = vmatprep.subr.bf16.mxu1 %v9348_v40  ;;  %v2225_v39 = vmax.f32 %v2027_v28, 0.0  ;;  %v9364_v40 = vld [vmem:[%s12038_s20 + $0x2f8] sm:$0xff]   ;;  %v9374_v28 = vld [vmem:[%s12038_s20 + $0x2a8] sm:$0xff]  }
 0x70e   :  { %8727 = vmatpush3.bf16.msra.mxu0 %v9349_v34  ;;  %8749 = vmatpush3.bf16.msra.mxu1 %v9350_v52  ;;  %v2207_v34 = vmax.f32 %v1980_v30, 0.0  ;;  %v2228_v52 = vmax.f32 %v2072_v31, 0.0  ;;  %v10661_v30 = vpop.f32.mrf.mxu0  ;;  %v9377_v31 = vld [vmem:[%s12038_s20 + $0x220] sm:$0xff]  }
 0x70f   :  { %8728 = vmatprep.subr.bf16.mxu0 %v9351_v53  ;;  %8750 = vmatprep.subr.bf16.mxu1 %v9352_v54  ;;  %v2230_v53 = vmax.f32 %v2115_v46, 0.0  ;;  %v9365_v54 = vld [vmem:[%s12038_s20 + $0x238] sm:$0xff]   ;;  %v9378_v46 = vld [vmem:[%s12038_s20 + $0x2a0] sm:$0xff]  }
 0x712   :  { %8729 = vmatpush3.bf16.msra.mxu0 %v9353_v19  ;;  %8751 = vmatpush3.bf16.msra.mxu1 %v9354_v8  ;;  %v2239_v19 = vpack.c.bf16 %v2223_v3, %v2207_v34  ;;  %v2212_v8 = vmax.f32 %v2068_v49, 0.0  ;;  %v9380_v3 = vld [vmem:[%s12038_s20 + $0x2d8] sm:$0xff]   ;;  %v2153_v49 = vpop.f32.mrf.mxu0 }
 0x713   :  { %8730 = vmatprep.subr.bf16.mxu0 %v9355_v36  ;;  %8752 = vmatprep.subr.bf16.mxu1 %v9356_v10  ;;  %v2241_v36 = vpack.c.bf16 %v2225_v39, %v2209_v33  ;;  %v2214_v10 = vmax.f32 %v2111_v37, 0.0  ;;  %v9382_v39 = vld [vmem:[%s12038_s20 + $0x298] sm:$0xff]   ;;  %v9383_v37 = vld [vmem:[%s12038_s20 + $0x250] sm:$0xff]  }
 0x714   :  { %v2244_v25 = vpack.c.bf16 %v2228_v52, %v2212_v8  ;;  %v10689_v34 = vpop.f32.mrf.mxu0  ;;  %v9385_v52 = vld [vmem:[%s12038_s20 + $0x210] sm:$0xff]   ;;  %v1651_v8 = vrot.slane %v10591_v26, %v9926_v56 }
 0x716   :  { %8731 = vmatpush3.bf16.msra.mxu0 %v9357_v14  ;;  %8753 = vmatpush3.bf16.msra.mxu1 %v9358_v63  ;;  %v2246_v14 = vpack.c.bf16 %v2230_v53, %v2214_v10  ;;  %v9372_v63 = vld [vmem:[%s12038_s20 + $0x2e8] sm:$0xff]   ;;  %v9386_v53 = vld [vmem:[%s12038_s20 + $0x290] sm:$0xff]  }
 0x717   :  { %8732 = vmatprep.subr.bf16.mxu0 %v9359_v27  ;;  %8754 = vmatprep.subr.bf16.mxu1 %v9360_v1  ;;  %v9373_v27 = vld [vmem:[%s12038_s20 + $0x228] sm:$0xff]   ;;  %v9376_v1 = vld [vmem:[%s12038_s20 + $0x2e0] sm:$0xff]  }
 0x718   :  { %v9389_v10 = vld [vmem:[%s12038_s20 + $0x208] sm:$0xff]  }
 0x71a   :  { %8733 = vmatpush3.bf16.msra.mxu0 %v9361_v47  ;;  %8755 = vmatpush3.bf16.msra.mxu1 %v9362_v58  ;;  %v9379_v47 = vld [vmem:[%s12038_s20 + $0x258] sm:$0xff]  }
 0x71b   :  { %8762 = vmatprep.subr.bf16.mxu0 %v9363_v35  ;;  %8784 = vmatprep.subr.bf16.mxu1 %v9364_v40  ;;  %v9381_v58 = vld [vmem:[%s12038_s20 + $0x218] sm:$0xff]   ;;  %v2196_v35 = vpop.f32.mrf.mxu1  ;;  %v9384_v40 = vld [vmem:[%s12038_s20 + $0x2d0] sm:$0xff]  }
 0x71d   :  { %3397 = vmatmul.mubr.bf16.vlgmr.msra.gmra.mxu0 %v2239_v19  ;;  %3438 = vmatmul.mubr.bf16.vlgmr.msra.gmra.mxu1 %v2241_v36  ;;  %v10694_v33 = vpop.f32.mrf.mxu1  ;;  %v9388_v19 = vld [vmem:[%s12038_s20 + $0x2c8] sm:$0xff]   ;;  %v2157_v36 = vpop.f32.mrf.mxu0 }
 0x71e   :  { %8763 = vmatpush3.bf16.msra.mxu0 %v9365_v54  ;;  %3478 = vmatprep.mubr.bf16.mxu0 %v2244_v25  ;;  %v9387_v54 = vld [vmem:[%s12038_s20 + $0x248] sm:$0xff]   ;;  %v1671_v25 = vrot.slane %v10591_v26, %v10481_v16 }
 0x71f   :  { %8785 = vmatpush3.bf16.msra.mxu1 %v9366_v45  ;;  %3519 = vmatprep.mubr.bf16.mxu1 %v2246_v14  ;;  %v1659_v45 = vrot.slane %v10591_v26, %v10465_v62  ;;  %v9390_v14 = vld [vmem:[%s12038_s20 + $0x288] sm:$0xff]  }
 0x720   :  { %8764 = vmatprep.subr.bf16.mxu0 %v9367_v11  ;;  %8786 = vmatprep.subr.bf16.mxu1 %v9368_v24  ;;  %v2070_v11 = vadd.f32 %v10568_v15, %v1651_v8  ;;  %v2200_v24 = vpop.f32.mrf.mxu1  ;;  %v9392_v15 = vld [vmem:[%s12038_s20 + $0x2c0] sm:$0xff]  }
 0x722   :  { %8765 = vmatpush3.bf16.msra.mxu0 %v9369_v20  ;;  %v9391_v20 = vld [vmem:[%s12038_s20 + $0x240] sm:$0xff]  }
 0x723   :  { %8787 = vmatpush3.bf16.msra.mxu1 %v9370_v17  ;;  %8766 = vmatprep.subr.bf16.mxu0 %v9371_v18  ;;  %v2113_v17 = vadd.f32 %v10573_v7, %v1659_v45  ;;  %v1679_v18 = vrot.slane %v10591_v26, %v10484_v22  ;;  %v2227_v7 = vmax.f32 %v2070_v11, 0.0  ;;  %v9401_v11 = vld [vmem:[%s12038_s20 + $0x330] sm:$0xff]  }
 0x724   :  { %8788 = vmatprep.subr.bf16.mxu1 %v9372_v63  ;;  %v2066_v63 = vadd.f32 %v10534_v48, %v1651_v8  ;;  %v9395_v48 = vld [vmem:[%s12038_s20 + $0x378] sm:$0xff]   ;;  %v9399_v8 = vld [vmem:[%s12038_s20 + $0x370] sm:$0xff]  }
 0x726   :  { %8767 = vmatpush3.bf16.msra.mxu0 %v9373_v27  ;;  %v2158_v27 = vadd.f32 %v2157_v36, %v1671_v25  ;;  %v9400_v36 = vld [vmem:[%s12038_s20 + $0x3f0] sm:$0xff]  }
 0x727   :  { %8789 = vmatpush3.bf16.msra.mxu1 %v9374_v28  ;;  %8768 = vmatprep.subr.bf16.mxu0 %v9375_v29  ;;  %v2109_v28 = vadd.f32 %v10539_v57, %v1659_v45  ;;  %v2201_v29 = vadd.f32 %v2200_v24, %v1679_v18  ;;  %v2197_v57 = vadd.f32 %v2196_v35, %v1679_v18  ;;  %v9398_v35 = vld [vmem:[%s12038_s20 + $0x3b8] sm:$0xff]   ;;  %v9403_v24 = vld [vmem:[%s12038_s20 + $0x368] sm:$0xff]   ;;  %v9407_v18 = vld [vmem:[%s12038_s20 + $0x360] sm:$0xff]  }
 0x728   :  { %8790 = vmatprep.subr.bf16.mxu1 %v9376_v1  ;;  %v9393_v1 = vld [vmem:[%s12038_s20 + $0x200] sm:$0xff]  }
 0x72a   :  { %8769 = vmatpush3.bf16.msra.mxu0 %v9377_v31  ;;  %v2154_v31 = vadd.f32 %v2153_v49, %v1671_v25  ;;  %v2213_v49 = vmax.f32 %v2109_v28, 0.0  ;;  %v9402_v25 = vld [vmem:[%s12038_s20 + $0x3b0] sm:$0xff]   ;;  %v9411_v28 = vld [vmem:[%s12038_s20 + $0x358] sm:$0xff]  }
 0x72b   :  { %8791 = vmatpush3.bf16.msra.mxu1 %v9378_v46  ;;  %8770 = vmatprep.subr.bf16.mxu0 %v9379_v47  ;;  %v9394_v46 = vld [vmem:[%s12038_s20 + $0x280] sm:$0xff]   ;;  %v2229_v47 = vmax.f32 %v2113_v17, 0.0  ;;  %v9406_v17 = vld [vmem:[%s12038_s20 + $0x3a8] sm:$0xff]  }
 0x72c   :  { %8792 = vmatprep.subr.bf16.mxu1 %v9380_v3  ;;  %v9396_v3 = vld [vmem:[%s12038_s20 + $0x3f8] sm:$0xff]  }
 0x72e   :  { %8771 = vmatpush3.bf16.msra.mxu0 %v9381_v58  ;;  %v2211_v58 = vmax.f32 %v2066_v63, 0.0  ;;  %v9409_v63 = vld [vmem:[%s12038_s20 + $0x320] sm:$0xff]  }
 0x72f   :  { %8793 = vmatpush3.bf16.msra.mxu1 %v9382_v39  ;;  %8772 = vmatprep.subr.bf16.mxu0 %v9383_v37  ;;  %v2232_v39 = vmax.f32 %v2158_v27, 0.0  ;;  %v2234_v37 = vmax.f32 %v2201_v29, 0.0  ;;  %v9410_v27 = vld [vmem:[%s12038_s20 + $0x3a0] sm:$0xff]   ;;  %v9412_v29 = vld [vmem:[%s12038_s20 + $0x3d8] sm:$0xff]  }
 0x730   :  { %8794 = vmatprep.subr.bf16.mxu1 %v9384_v40  ;;  %v9397_v40 = vld [vmem:[%s12038_s20 + $0x338] sm:$0xff]  }
 0x732   :  { %8773 = vmatpush3.bf16.msra.mxu0 %v9385_v52  ;;  %v2243_v52 = vpack.c.bf16 %v2227_v7, %v2211_v58  ;;  %v9414_v7 = vld [vmem:[%s12038_s20 + $0x398] sm:$0xff]   ;;  %v1667_v58 = vrot.slane %v10591_v26, %v10563_v0 }
 0x733   :  { %8795 = vmatpush3.bf16.msra.mxu1 %v9386_v53  ;;  %8774 = vmatprep.subr.bf16.mxu0 %v9387_v54  ;;  %v2216_v53 = vmax.f32 %v2154_v31, 0.0  ;;  %v2245_v54 = vpack.c.bf16 %v2229_v47, %v2213_v49  ;;  %v9415_v31 = vld [vmem:[%s12038_s20 + $0x350] sm:$0xff]   ;;  %v9421_v49 = vld [vmem:[%s12038_s20 + $0x308] sm:$0xff]  }
 0x734   :  { %8796 = vmatprep.subr.bf16.mxu1 %v9388_v19  ;;  %v2218_v19 = vmax.f32 %v2197_v57, 0.0  ;;  %v9418_v47 = vld [vmem:[%s12038_s20 + $0x390] sm:$0xff]   ;;  %v9419_v57 = vld [vmem:[%s12038_s20 + $0x348] sm:$0xff]  }
 0x735   :  { %v2248_v45 = vpack.c.bf16 %v2232_v39, %v2216_v53  ;;  %v1675_v39 = vrot.slane %v10591_v26, %v10566_v13  ;;  %v9424_v26 = vld [vmem:[%s12038_s20 + $0x3c0] sm:$0xff]  }
 0x736   :  { %8775 = vmatpush3.bf16.msra.mxu0 %v9389_v10  ;;  %v2250_v10 = vpack.c.bf16 %v2234_v37, %v2218_v19  ;;  %v2156_v37 = vadd.f32 %v10689_v34, %v1667_v58 }
 0x737   :  { %8797 = vmatpush3.bf16.msra.mxu1 %v9390_v14  ;;  %8776 = vmatprep.subr.bf16.mxu0 %v9391_v20  ;;  %v9404_v14 = vld [vmem:[%s12038_s20 + $0x3e8] sm:$0xff]   ;;  %v2199_v53 = vadd.f32 %v10694_v33, %v1675_v39  ;;  %v2195_v34 = vadd.f32 %v10666_v38, %v1675_v39  ;;  %v9426_v33 = vld [vmem:[%s12038_s20 + $0x380] sm:$0xff]  }
 0x738   :  { %8798 = vmatprep.subr.bf16.mxu1 %v9392_v15  ;;  %v9405_v20 = vld [vmem:[%s12038_s20 + $0x328] sm:$0xff]   ;;  %v9408_v15 = vld [vmem:[%s12038_s20 + $0x3e0] sm:$0xff]   ;;  %v2231_v19 = vmax.f32 %v2156_v37, 0.0 }
 0x73a   :  { %8777 = vmatpush3.bf16.msra.mxu0 %v9393_v1  ;;  %v9413_v1 = vld [vmem:[%s12038_s20 + $0x318] sm:$0xff]  }
 0x73b   :  { %8799 = vmatpush3.bf16.msra.mxu1 %v9394_v46  ;;  %8806 = vmatprep.subr.bf16.mxu0 %v9395_v48  ;;  %v9416_v46 = vld [vmem:[%s12038_s20 + $0x3d0] sm:$0xff]  }
 0x73c   :  { %8828 = vmatprep.subr.bf16.mxu1 %v9396_v3  ;;  %v9417_v48 = vld [vmem:[%s12038_s20 + $0x310] sm:$0xff]   ;;  %v9420_v3 = vld [vmem:[%s12038_s20 + $0x3c8] sm:$0xff]  }
 0x73d   :  { %3479 = vmatmul.mubr.bf16.vlgmr.msra.gmra.mxu0 %v2243_v52  ;;  %v9423_v52 = vld [vmem:[%s12038_s20 + $0x340] sm:$0xff]  }
 0x73e   :  { %3520 = vmatmul.mubr.bf16.vlgmr.msra.gmra.mxu1 %v2245_v54  ;;  %8807 = vmatpush3.bf16.msra.mxu0 %v9397_v40  ;;  %v9422_v40 = vld [vmem:[%s12038_s20 + $0x388] sm:$0xff]   ;;  %v9425_v54 = vld [vmem:[%s12038_s20 + $0x300] sm:$0xff]  }
 0x73f   :  { %3560 = vmatprep.mubr.bf16.mxu0 %v2248_v45  ;;  %8829 = vmatpush3.bf16.msra.mxu1 %v9398_v35  ;;  %v2152_v35 = vadd.f32 %v10661_v30, %v1667_v58 }
 0x740   :  { %3601 = vmatprep.mubr.bf16.mxu1 %v2250_v10  ;;  %8808 = vmatprep.subr.bf16.mxu0 %v9399_v8  ;;  %v2233_v8 = vmax.f32 %v2199_v53, 0.0 }
 0x741   :  { %8830 = vmatprep.subr.bf16.mxu1 %v9400_v36  ;;  %v2215_v45 = vmax.f32 %v2152_v35, 0.0  ;;  %v2217_v36 = vmax.f32 %v2195_v34, 0.0 }
 0x742   :  { %8809 = vmatpush3.bf16.msra.mxu0 %v9401_v11 }
 0x743   :  { %8831 = vmatpush3.bf16.msra.mxu1 %v9402_v25  ;;  %8810 = vmatprep.subr.bf16.mxu0 %v9403_v24  ;;  %v2247_v30 = vpack.c.bf16 %v2231_v19, %v2215_v45  ;;  %v2249_v38 = vpack.c.bf16 %v2233_v8, %v2217_v36 }
 0x744   :  { %8832 = vmatprep.subr.bf16.mxu1 %v9404_v14 }
 0x746   :  { %8811 = vmatpush3.bf16.msra.mxu0 %v9405_v20 }
 0x747   :  { %8833 = vmatpush3.bf16.msra.mxu1 %v9406_v17  ;;  %8812 = vmatprep.subr.bf16.mxu0 %v9407_v18 }
 0x748   :  { %8834 = vmatprep.subr.bf16.mxu1 %v9408_v15 }
 0x74a   :  { %8813 = vmatpush3.bf16.msra.mxu0 %v9409_v63 }
 0x74b   :  { %8835 = vmatpush3.bf16.msra.mxu1 %v9410_v27  ;;  %8814 = vmatprep.subr.bf16.mxu0 %v9411_v28 }
 0x74c   :  { %8836 = vmatprep.subr.bf16.mxu1 %v9412_v29 }
 0x74e   :  { %8815 = vmatpush3.bf16.msra.mxu0 %v9413_v1 }
 0x74f   :  { %8837 = vmatpush3.bf16.msra.mxu1 %v9414_v7  ;;  %8816 = vmatprep.subr.bf16.mxu0 %v9415_v31 }
 0x750   :  { %8838 = vmatprep.subr.bf16.mxu1 %v9416_v46  ;;  %v7984_v46 = vld [vmem:[%s12039_s21] ss:$0 sm:$0xff] }
 0x752   :  { %8817 = vmatpush3.bf16.msra.mxu0 %v9417_v48 }
 0x753   :  { %8839 = vmatpush3.bf16.msra.mxu1 %v9418_v47  ;;  %8818 = vmatprep.subr.bf16.mxu0 %v9419_v57 }
 0x754   :  { %8840 = vmatprep.subr.bf16.mxu1 %v9420_v3 }
 0x756   :  { %8819 = vmatpush3.bf16.msra.mxu0 %v9421_v49 }
 0x757   :  { %8841 = vmatpush3.bf16.msra.mxu1 %v9422_v40  ;;  %8820 = vmatprep.subr.bf16.mxu0 %v9423_v52 }
 0x758   :  { %8842 = vmatprep.subr.bf16.mxu1 %v9424_v26 }
 0x75a   :  { %8821 = vmatpush3.bf16.msra.mxu0 %v9425_v54 }
 0x75b   :  { %8843 = vmatpush3.bf16.msra.mxu1 %v9426_v33  ;;  %9176 = vmatprep.subr.mxu0 %v9673_v21 }
 0x75d   :  { %3561 = vmatmul.mubr.bf16.vlgmr.msra.gmra.mxu0 %v2247_v30 }
 0x75e   :  { %3602 = vmatmul.mubr.bf16.vlgmr.msra.gmra.mxu1 %v2249_v38  ;;  %9184 = vmatprep.mubr.msk.f32.mxu0 %vm9675_vm2, %v9673_v21 }
 0x7bd   :  { %v8690_v10 = vpop.f32.mrf.mxu0  ;;  %v8712_v11 = vpop.f32.mrf.mxu1 }
 0x7bf   :  { %v8691_v25 = vpop.f32.mrf.mxu0  ;;  %v8713_v24 = vpop.f32.mrf.mxu1 }
 0x7c0   :  { %v8692_v31 = vadd.f32 %v8691_v25, %v8690_v10  ;;  %v8714_v49 = vadd.f32 %v8713_v24, %v8712_v11 }
 0x7c1   :  { %v8693_v14 = vpop.f32.mrf.mxu0  ;;  %v8715_v20 = vpop.f32.mrf.mxu1 }
 0x7c2   :  { %v3317_v57 = vadd.f32 %v8692_v31, %v7984_v46 }
 0x7c3   :  { %v8694_v17 = vpop.f32.mrf.mxu0  ;;  %v8716_v15 = vpop.f32.mrf.mxu1 }
 0x7c4   :  { %v8695_v3 = vadd.f32 %v8694_v17, %v8693_v14  ;;  %v3358_v40 = vadd.f32 %v8714_v49, %v3317_v57  ;;  %v8717_v35 = vadd.f32 %v8716_v15, %v8715_v20 }
 0x7c6   :  { %v3320_v52 = vadd.f32 %v8695_v3, %v7984_v46 }
 0x7c8   :  { %v3361_v19 = vadd.f32 %v8717_v35, %v3320_v52 }
 0x7dd   :  { %v8734_v18 = vpop.f32.mrf.mxu0  ;;  %v8756_v63 = vpop.f32.mrf.mxu1 }
 0x7df   :  { %v8735_v27 = vpop.f32.mrf.mxu0  ;;  %v8757_v28 = vpop.f32.mrf.mxu1 }
 0x7e0   :  { %v8736_v37 = vadd.f32 %v8735_v27, %v8734_v18  ;;  %v8758_v33 = vadd.f32 %v8757_v28, %v8756_v63 }
 0x7e1   :  { %v8737_v29 = vpop.f32.mrf.mxu0  ;;  %v8759_v1 = vpop.f32.mrf.mxu1 }
 0x7e2   :  { %v3399_v34 = vadd.f32 %v8736_v37, %v3358_v40 }
 0x7e3   :  { %v8738_v7 = vpop.f32.mrf.mxu0  ;;  %v8760_v47 = vpop.f32.mrf.mxu1 }
 0x7e4   :  { %v8739_v54 = vadd.f32 %v8738_v7, %v8737_v29  ;;  %v3440_v30 = vadd.f32 %v8758_v33, %v3399_v34  ;;  %v8761_v10 = vadd.f32 %v8760_v47, %v8759_v1 }
 0x7e6   :  { %v3402_v38 = vadd.f32 %v8739_v54, %v3361_v19 }
 0x7e8   :  { %v3443_v24 = vadd.f32 %v8761_v10, %v3402_v38 }
 0x7fd   :  { %v8778_v48 = vpop.f32.mrf.mxu0 }
 0x7fe   :  { %v8800_v58 = vpop.f32.mrf.mxu1 }
 0x7ff   :  { %v8779_v39 = vpop.f32.mrf.mxu0 }
 0x800   :  { %v8801_v53 = vpop.f32.mrf.mxu1  ;;  %v8780_v8 = vadd.f32 %v8779_v39, %v8778_v48 }
 0x801   :  { %v8781_v26 = vpop.f32.mrf.mxu0  ;;  %v8802_v18 = vadd.f32 %v8801_v53, %v8800_v58 }
 0x802   :  { %v8803_v45 = vpop.f32.mrf.mxu1  ;;  %v3481_v25 = vadd.f32 %v8780_v8, %v3440_v30 }
 0x803   :  { %v8782_v36 = vpop.f32.mrf.mxu0 }
 0x804   :  { %v8783_v14 = vadd.f32 %v8782_v36, %v8781_v26  ;;  %v8804_v17 = vpop.f32.mrf.mxu1  ;;  %v3522_v46 = vadd.f32 %v8802_v18, %v3481_v25 }
 0x805   :  { %v8805_v63 = vadd.f32 %v8804_v17, %v8803_v45 }
 0x806   :  { %v3484_v20 = vadd.f32 %v8783_v14, %v3443_v24 }
 0x808   :  { %v3525_v39 = vadd.f32 %v8805_v63, %v3484_v20 }
 0x81d   :  { %v8822_v11 = vpop.f32.mrf.mxu0 }
 0x81e   :  { %v8844_v27 = vpop.f32.mrf.mxu1 }
 0x81f   :  { %v8823_v31 = vpop.f32.mrf.mxu0 }
 0x820   :  { %v8824_v15 = vadd.f32 %v8823_v31, %v8822_v11  ;;  %v8845_v29 = vpop.f32.mrf.mxu1 }
 0x821   :  { %v8825_v7 = vpop.f32.mrf.mxu0  ;;  %v8846_v48 = vadd.f32 %v8845_v29, %v8844_v27 }
 0x822   :  { %v3563_v28 = vadd.f32 %v8824_v15, %v3522_v46  ;;  %v8847_v57 = vpop.f32.mrf.mxu1 }
 0x823   :  { %v8826_v3 = vpop.f32.mrf.mxu0 }
 0x824   :  { %v3604_v1 = vadd.f32 %v8846_v48, %v3563_v28  ;;  %v8827_v47 = vadd.f32 %v8826_v3, %v8825_v7  ;;  %v8848_v49 = vpop.f32.mrf.mxu1 }
 0x825   :  { %v8849_v52 = vadd.f32 %v8848_v49, %v8847_v57 }
 0x826   :  { %v3612_v37 = vcombine.high %v3604_v1, %v3604_v1  ;;  %v3619_v40 = vrot.slane %v3604_v1, %v9923_v51  ;;  %v3566_v58 = vadd.f32 %v8827_v47, %v3525_v39 }
 0x828   :  { %v3626_v53 = vrot.slane %v3612_v37, %v9923_v51  ;;  %v3627_v26 = vcombine.high %v3619_v40, %v3619_v40  ;;  %v3607_v35 = vadd.f32 %v8849_v52, %v3566_v58  ;;  %v3654_v8 = vadd.f32 %v3619_v40, %v10238_v32 }
 0x82a   :  { %v3628_v34 = vcombine.high %v3626_v53, %v3626_v53  ;;  %v3629_v54 = vcombine.high %v3607_v35, %v3607_v35  ;;  %v3636_v19 = vrot.slane %v3607_v35, %v9923_v51  ;;  %v3655_v33 = vadd.f32 %v3627_v26, %v10240_v50 }
 0x82b   :  { %v3656_v30 = vadd.f32 %v3626_v53, %v10242_v59 }
 0x82c   :  { %v3643_v45 = vrot.slane %v3629_v54, %v9923_v51  ;;  %v3644_v36 = vcombine.high %v3636_v19, %v3636_v19  ;;  %v3657_v38 = vadd.f32 %v3628_v34, %v10244_v60  ;;  %v3670_v10 = vcombine.low %v3654_v8, %v3655_v33 }
 0x82d   :  { %v3658_v14 = vadd.f32 %v3636_v19, %v10250_v4 }
 0x82e   :  { %v3645_v25 = vcombine.high %v3643_v45, %v3643_v45  ;;  %v3671_v17 = vcombine.low %v3656_v30, %v3657_v38  ;;  %v3659_v11 = vadd.f32 %v3644_v36, %v10252_v5  ;;  %v3660_v24 = vadd.f32 %v3643_v45, %v10254_v6 }
 0x82f   :  { %v3678_v50 = vrot.slane %v3670_v10, %v9923_v51 }
 0x830   :  { %v3685_v32 = vrot.slane %v3671_v17, %v9923_v51  ;;  %v3661_v18 = vadd.f32 %v3645_v25, %v10256_v12  ;;  %v3687_v27 = vcombine.low %v3658_v14, %v3659_v11 }
 0x832   :  { %v3686_v31 = vcombine.low %v3678_v50, %v3685_v32  ;;  %v3688_v59 = vcombine.low %v3660_v24, %v3661_v18  ;;  %v3695_v46 = vrot.slane %v3687_v27, %v9923_v51 }
 0x834   :  { %v3706_v60 = vsel %vm348_vm3, %v3686_v31, 0.0  ;;  %v3702_v4 = vrot.slane %v3688_v59, %v9923_v51  ;;  %v8118_v31 = vld [vmem:[%s12064_s9 + $0x38] sm:$0xff]  ;;  %v8117_v59 = vld [vmem:[%s12064_s9 + $0x30] sm:$0xff] }
 0x835   :  { %3707 = vadd.xlane.f32.xlu1 %v3706_v60  ;;  %9177 = vmatpush3.msra.mxu0 %v8118_v31  ;;  %v8116_v60 = vld [vmem:[%s12064_s9 + $0x28] sm:$0xff] }
 0x836   :  { %v3703_v20 = vcombine.low %v3695_v46, %v3702_v4  ;;  %9178 = vmatprep.subr.mxu0 %v9673_v21  ;;  %v8115_v46 = vld [vmem:[%s12064_s9 + $0x20] sm:$0xff]  ;;  %v8125_v4 = vld [vmem:[%s12028_s10 + $0x38] sm:$0xff] }
 0x837   :  { %9179 = vmatpush3.msra.mxu0 %v8117_v59  ;;  %9187 = vmatprep.subr.mxu1 %v8125_v4 }
 0x838   :  { %v3709_v5 = vsel %vm348_vm3, %v3703_v20, 0.0  ;;  %9180 = vmatprep.subr.mxu0 %v9673_v21  ;;  %v10930_v20 = vld [vmem:[%s12030_s12 + $0x38] sm:$0xff]  ;;  %9188 = vmatpush3.msra.mxu1 %v8125_v4 }
 0x839   :  { %3710 = vadd.xlane.f32.xlu1 %v3709_v5  ;;  %9181 = vmatpush3.msra.mxu0 %v8116_v60  ;;  %v8124_v5 = vld [vmem:[%s12028_s10 + $0x30] sm:$0xff] }
 0x83a   :  { %9182 = vmatprep.subr.mxu0 %v9673_v21  ;;  %9189 = vmatprep.subr.mxu1 %v8124_v5 }
 0x83b   :  { %9183 = vmatpush3.msra.mxu0 %v8115_v46  ;;  %9190 = vmatpush3.msra.mxu1 %v8124_v5 }
 0x83c   :  { %9198 = vmatprep.subr.mxu0 %v10930_v20 }
 0x8be   :  { %v3708_v6 = vpop.xlane.xlu1 %3707 }
 0x8bf   :  { %v3712_v15 = vmul.f32 0.03125, %v3708_v6  ;;  %v8123_v6 = vld [vmem:[%s12028_s10 + $0x28] sm:$0xff] }
 0x8c0   :  { %9191 = vmatprep.subr.mxu1 %v8123_v6 }
 0x8c1   :  { %v3722_v29 = vrot.slane %v3712_v15, %v10103_v41  ;;  %v3729_v12 = vrot.slane %v3712_v15, %v10106_v42  ;;  %v3736_v7 = vrot.slane %v3712_v15, %v10109_v43  ;;  %v3743_v63 = vrot.slane %v3712_v15, %v10112_v44  ;;  %9192 = vmatpush3.msra.mxu1 %v8123_v6  ;;  %v8122_v15 = vld [vmem:[%s12028_s10 + $0x20] sm:$0xff]  ;;  %s12069_s10 = sld [smem:[#allocation9_spill]] }
 0x8c2   :  { %v3711_v28 = vpop.xlane.xlu1 %3710  ;;  %9193 = vmatprep.subr.mxu1 %v8122_v15 }
 0x8c3   :  { %v3713_v48 = vmul.f32 0.03125, %v3711_v28  ;;  %v10867_v57 = vsub.f32 %v3654_v8, %v3722_v29  ;;  %v10869_v3 = vsub.f32 %v3655_v33, %v3729_v12  ;;  %v10871_v39 = vsub.f32 %v3656_v30, %v3736_v7  ;;  %9194 = vmatpush3.msra.mxu1 %v8122_v15  ;;  %v10945_v29 = vld [vmem:[%s12066_s0 + $0x18] sm:$0xff]  ;;  %v8132_v15 = vld [vmem:[%s12030_s12 + $0x30] sm:$0xff] }
 0x8c4   :  { %v10873_v1 = vsub.f32 %v3657_v38, %v3743_v63  ;;  %9209 = vmatprep.subr.mxu1 %v10945_v29 }
 0x8c5   :  { %v3750_v47 = vrot.slane %v3713_v48, %v10103_v41  ;;  %v3757_v49 = vrot.slane %v3713_v48, %v10106_v42  ;;  %v3764_v37 = vrot.slane %v3713_v48, %v10109_v43  ;;  %v3771_v40 = vrot.slane %v3713_v48, %v10112_v44 }
 0x8c6   :  { %v3788_v58 = vmul.f32 %v10867_v57, %v10867_v57  ;;  %v3789_v52 = vmul.f32 %v10869_v3, %v10869_v3  ;;  %v3790_v53 = vmul.f32 %v10871_v39, %v10871_v39  ;;  %v3791_v26 = vmul.f32 %v10873_v1, %v10873_v1 }
 0x8c7   :  { %v10887_v35 = vsub.f32 %v3658_v14, %v3750_v47  ;;  %v10889_v34 = vsub.f32 %v3659_v11, %v3757_v49  ;;  %v10891_v54 = vsub.f32 %v3660_v24, %v3764_v37  ;;  %v10893_v19 = vsub.f32 %v3661_v18, %v3771_v40  ;;  %v8113_v49 = vld [vmem:[%s12040_s22] ss:$0 sm:$0xff] }
 0x8c8   :  { %v3804_v33 = vcombine.low %v3788_v58, %v3789_v52  ;;  %v3805_v8 = vcombine.low %v3790_v53, %v3791_v26  ;;  %v8114_v37 = vld [vmem:[%s12041_s23] ss:$0 sm:$0xff]  ;;  %v3932_v40 = vcombine.high %v8113_v49, %v8113_v49  ;;  %v3939_v58 = vrot.slane %v8113_v49, %v9923_v51  ;;  %v8131_v49 = vld [vmem:[%s12030_s12 + $0x28] sm:$0xff] }
 0x8c9   :  { %v3792_v45 = vmul.f32 %v10887_v35, %v10887_v35  ;;  %v3793_v36 = vmul.f32 %v10889_v34, %v10889_v34  ;;  %v3794_v30 = vmul.f32 %v10891_v54, %v10891_v54  ;;  %v3795_v38 = vmul.f32 %v10893_v19, %v10893_v19 }
 0x8ca   :  { %v3812_v10 = vrot.slane %v3804_v33, %v9923_v51  ;;  %v3819_v25 = vrot.slane %v3805_v8, %v9923_v51  ;;  %v3967_v52 = vcombine.high %v8114_v37, %v8114_v37  ;;  %v3974_v53 = vrot.slane %v8114_v37, %v9923_v51 }
 0x8cb   :  { %v3821_v14 = vcombine.low %v3792_v45, %v3793_v36  ;;  %v3822_v17 = vcombine.low %v3794_v30, %v3795_v38  ;;  %v3946_v26 = vrot.slane %v3932_v40, %v9923_v51  ;;  %v3947_v8 = vcombine.high %v3939_v58, %v3939_v58 }
 0x8cc   :  { %v3820_v11 = vcombine.low %v3812_v10, %v3819_v25  ;;  %v3981_v45 = vrot.slane %v3967_v52, %v9923_v51 }
 0x8cd   :  { %v3829_v24 = vrot.slane %v3821_v14, %v9923_v51  ;;  %v3836_v50 = vrot.slane %v3822_v17, %v9923_v51  ;;  %v3948_v25 = vcombine.high %v3946_v26, %v3946_v26  ;;  %v3982_v14 = vcombine.high %v3974_v53, %v3974_v53 }
 0x8ce   :  { %v3840_v32 = vsel %vm348_vm3, %v3820_v11, 0.0 }
 0x8cf   :  { %3841 = vadd.xlane.f32.xlu1 %v3840_v32  ;;  %v3837_v18 = vcombine.low %v3829_v24, %v3836_v50 }
 0x8d1   :  { %v3843_v27 = vsel %vm348_vm3, %v3837_v18, 0.0  ;;  %v3983_v18 = vcombine.high %v3981_v45, %v3981_v45 }
 0x8d3   :  { %3844 = vadd.xlane.f32.xlu1 %v3843_v27 }
 0x958   :  { %v3842_v12 = vpop.xlane.xlu1 %3841 }
 0x959   :  { %v3846_v7 = vmul.f32 0.03125, %v3842_v12 }
 0x95b   :  { %v3848_v63 = vadd.f32 1e-05, %v3846_v7 }
 0x95c   :  { %v3845_v28 = vpop.xlane.xlu1 %3844 }
 0x95d   :  { %9577 = vrsqrt.f32 %v3848_v63  ;;  %v3847_v48 = vmul.f32 0.03125, %v3845_v28 }
 0x95f   :  { %v3849_v47 = vadd.f32 1e-05, %v3847_v48 }
 0x961   :  { %9579 = vrsqrt.f32 %v3849_v47 }
 0x96a   :  { %v9578_v33 = vpop.eup %9577 }
 0x96b   :  { %v3860_v36 = vrot.slane %v9578_v33, %v10103_v41  ;;  %v3867_v30 = vrot.slane %v9578_v33, %v10106_v42  ;;  %v3874_v38 = vrot.slane %v9578_v33, %v10109_v43  ;;  %v3881_v10 = vrot.slane %v9578_v33, %v10112_v44 }
 0x96d   :  { %v3918_v17 = vmul.f32 %v3860_v36, %v10867_v57  ;;  %v3919_v11 = vmul.f32 %v3867_v30, %v10869_v3  ;;  %v3920_v24 = vmul.f32 %v3874_v38, %v10871_v39  ;;  %v3921_v50 = vmul.f32 %v3881_v10, %v10873_v1  ;;  %v9608_v10 = vld [vmem:[%s12068_s2] sm:$0xf] }
 0x96e   :  { %v9580_v32 = vpop.eup %9579 }
 0x96f   :  { %v3953_v27 = vmul.f32 %v3939_v58, %v3918_v17  ;;  %v3895_v31 = vrot.slane %v9580_v32, %v10106_v42  ;;  %v3909_v59 = vrot.slane %v9580_v32, %v10112_v44  ;;  %v3954_v60 = vmul.f32 %v3947_v8, %v3919_v11 }
 0x970   :  { %v3955_v46 = vmul.f32 %v3946_v26, %v3920_v24  ;;  %v3956_v4 = vmul.f32 %v3948_v25, %v3921_v50  ;;  %v3888_v5 = vrot.slane %v9580_v32, %v10103_v41  ;;  %v3902_v57 = vrot.slane %v9580_v32, %v10109_v43  ;;  %v8127_v24 = vld [vmem:[%s12029_s11 + $0x1] ss:$0 sm:$0xff] }
 0x971   :  { %v10970_v6 = vadd.f32 %v3974_v53, %v3953_v27  ;;  %v3923_v3 = vmul.f32 %v3895_v31, %v10889_v34  ;;  %v3925_v39 = vmul.f32 %v3909_v59, %v10893_v19  ;;  %v10974_v1 = vadd.f32 %v3982_v14, %v3954_v60  ;;  %v8120_v27 = vld [vmem:[%s12067_s28 + $0x1] ss:$0 sm:$0xff] }
 0x972   :  { %v10979_v12 = vadd.f32 %v3981_v45, %v3955_v46  ;;  %v10981_v7 = vadd.f32 %v3983_v18, %v3956_v4  ;;  %v3922_v63 = vmul.f32 %v3888_v5, %v10887_v35  ;;  %v3924_v28 = vmul.f32 %v3902_v57, %v10891_v54 }
 0x973   :  { %9185 = vmatmul.mubr.msk.f32.vlgmr.msra.gmra.mxu0 %vm348_vm3, %v10970_v6  ;;  %v3958_v34 = vmul.f32 %v3947_v8, %v3923_v3  ;;  %v3960_v48 = vmul.f32 %v3948_v25, %v3925_v39  ;;  %v4102_v19 = vcombine.low %v10970_v6, %v10974_v1  ;;  %v9609_v25 = vld [vmem:[%s12066_s0 + $0x10] sm:$0xff] }
 0x974   :  { %9199 = vmatpush3.msra.mxu0 %v10930_v20  ;;  %v4103_v47 = vcombine.low %v10979_v12, %v10981_v7  ;;  %v3957_v35 = vmul.f32 %v3939_v58, %v3922_v63  ;;  %v3959_v37 = vmul.f32 %v3946_v26, %v3924_v28  ;;  %v8130_v20 = vld [vmem:[%s12030_s12 + $0x20] sm:$0xff] }
 0x975   :  { %9200 = vmatprep.subr.mxu0 %v8132_v15  ;;  %v10995_v54 = vadd.f32 %v3982_v14, %v3958_v34  ;;  %v10997_v40 = vadd.f32 %v3983_v18, %v3960_v48  ;;  %v4110_v52 = vrot.slane %v4102_v19, %v9923_v51  ;;  %v9610_v14 = vld [vmem:[%s12066_s0 + $0x8] sm:$0xff] }
 0x976   :  { %9201 = vmatpush3.msra.mxu0 %v8132_v15  ;;  %v4117_v33 = vrot.slane %v4103_v47, %v9923_v51  ;;  %v11004_v8 = vadd.f32 %v3974_v53, %v3957_v35  ;;  %v11006_v36 = vadd.f32 %v3981_v45, %v3959_v37 }
 0x977   :  { %9202 = vmatprep.subr.mxu0 %v8131_v49 }
 0x978   :  { %v4118_v58 = vcombine.low %v4110_v52, %v4117_v33  ;;  %9203 = vmatpush3.msra.mxu0 %v8131_v49  ;;  %v4119_v26 = vcombine.low %v11004_v8, %v10995_v54  ;;  %v4120_v30 = vcombine.low %v11006_v36, %v10997_v40 }
 0x979   :  { %9204 = vmatprep.subr.mxu0 %v8130_v20 }
 0x97a   :  { %9195 = vmatprep.mubr.msk.f32.mxu1 %vm348_vm3, %v4118_v58  ;;  %9206 = vmatprep.mubr.msk.f32.mxu0 %vm348_vm3, %v4118_v58  ;;  %v4127_v38 = vrot.slane %v4119_v26, %v9923_v51  ;;  %v4134_v53 = vrot.slane %v4120_v30, %v9923_v51 }
 0x97b   :  { %9205 = vmatpush3.msra.mxu0 %v8130_v20 }
 0x97c   :  { %v4135_v45 = vcombine.low %v4127_v38, %v4134_v53  ;;  %9220 = vmatprep.subr.msk.mxu0 %vm967_vm4, %v9608_v10 }
 0x97e   :  { %9196 = vmatmul.mubr.msk.f32.vlgmr.msra.gmra.mxu1 %vm348_vm3, %v4135_v45  ;;  %9207 = vmatmul.mubr.msk.f32.vlgmr.msra.gmra.mxu0 %vm348_vm3, %v4135_v45 }
 0x97f   :  { %9210 = vmatpush3.msra.mxu1 %v10945_v29  ;;  %9221 = vmatpush3.msk.msra.mxu0 %vm967_vm4, %v9608_v10  ;;  %v9611_v29 = vld [vmem:[%s12066_s0] sm:$0xff]  ;;  %s12071_s0 = sld [smem:[#allocation13_spill]] }
 0x980   :  { %9211 = vmatprep.subr.mxu1 %v9609_v25  ;;  %9225 = vmatprep.subr.mxu0 %v9673_v21 }
 0x981   :  { %9212 = vmatpush3.msra.mxu1 %v9609_v25 }
 0x982   :  { %9213 = vmatprep.subr.mxu1 %v9610_v14 }
 0x983   :  { %9214 = vmatpush3.msra.mxu1 %v9610_v14 }
 0x984   :  { %9215 = vmatprep.subr.mxu1 %v9611_v29 }
 0x985   :  { %9216 = vmatpush3.msra.mxu1 %v9611_v29 }
 0xa33   :  { %v4078_v17 = vpop.f32.mrf.mxu0 }
 0xa34   :  { %v4079_v57 = vadd.f32 %v8120_v27, %v4078_v17 }
 0xa35   :  { %v9186_v11 = vpop.f32.mrf.mxu0 }
 0xa3e   :  { %v9197_v50 = vpop.f32.mrf.mxu1 }
 0xa3f   :  { %v4212_v32 = vadd.f32 %v9197_v50, %v8127_v24 }
 0xa40   :  { %v4206_v18 = vpop.f32.mrf.mxu1 }
 0xa41   :  { %v4322_v31 = vcombine.high %v4212_v32, %v4212_v32  ;;  %v4329_v59 = vrot.slane %v4212_v32, %v9923_v51  ;;  %v4207_v60 = vadd.f32 %v8127_v24, %v4206_v18 }
 0xa43   :  { %v4336_v46 = vrot.slane %v4322_v31, %v9923_v51  ;;  %v4337_v4 = vcombine.high %v4329_v59, %v4329_v59  ;;  %v4305_v5 = vcombine.high %v4207_v60, %v4207_v60  ;;  %v4312_v3 = vrot.slane %v4207_v60, %v9923_v51 }
 0xa44   :  { %v4351_v47 = vmul.f32 %v4329_v59, %v4079_v57 }
 0xa45   :  { %v4338_v39 = vcombine.high %v4336_v46, %v4336_v46  ;;  %v4319_v15 = vrot.slane %v4305_v5, %v9923_v51  ;;  %v4352_v63 = vmul.f32 %v4337_v4, %v4079_v57  ;;  %v4320_v28 = vcombine.high %v4312_v3, %v4312_v3 }
 0xa46   :  { %v4353_v34 = vmul.f32 %v4336_v46, %v4079_v57  ;;  %v4347_v49 = vmul.f32 %v4312_v3, %v4079_v57 }
 0xa47   :  { %v4354_v48 = vmul.f32 %v4338_v39, %v4079_v57  ;;  %v4321_v19 = vcombine.high %v4319_v15, %v4319_v15  ;;  %v4348_v35 = vmul.f32 %v4320_v28, %v4079_v57  ;;  %v4349_v52 = vmul.f32 %v4319_v15, %v4079_v57 }
 0xa48   :  { %v4380_v20 = vcombine.low %v4351_v47, %v4352_v63 }
 0xa49   :  { %v4381_v37 = vcombine.low %v4353_v34, %v4354_v48  ;;  %v4350_v33 = vmul.f32 %v4321_v19, %v4079_v57  ;;  %v4363_v58 = vcombine.low %v4347_v49, %v4348_v35 }
 0xa4a   :  { %v4388_v45 = vrot.slane %v4380_v20, %v9923_v51 }
 0xa4b   :  { %v4364_v26 = vcombine.low %v4349_v52, %v4350_v33  ;;  %v4395_v30 = vrot.slane %v4381_v37, %v9923_v51  ;;  %v4371_v38 = vrot.slane %v4363_v58, %v9923_v51 }
 0xa4d   :  { %v4378_v53 = vrot.slane %v4364_v26, %v9923_v51  ;;  %v4396_v25 = vcombine.low %v4388_v45, %v4395_v30 }
 0xa4f   :  { %v4379_v10 = vcombine.low %v4371_v38, %v4378_v53 }
 0xa51   :  { %9217 = vmatprep.mubr.msk.f32.mxu1 %vm348_vm3, %v4379_v10 }
 0xa52   :  { %9218 = vmatmul.mubr.msk.f32.vlgmr.msra.gmra.mxu1 %vm348_vm3, %v4396_v25 }
 0xa53   :  { %5553 = vmatprep.mubr.bf16.mxu1 %v9672_v2 }
 0xb12   :  { %v9219_v14 = vpop.f32.mrf.mxu1 }
 0xb13   :  { %v4495_v29 = vcombine.high %v9219_v14, %v9219_v14  ;;  %v4502_v17 = vrot.slane %v9219_v14, %v9923_v51 }
 0xb14   :  { %v4467_v11 = vpop.f32.mrf.mxu1 }
 0xb15   :  { %v4509_v24 = vrot.slane %v4495_v29, %v9923_v51  ;;  %v4478_v50 = vcombine.high %v4467_v11, %v4467_v11  ;;  %v4510_v32 = vcombine.high %v4502_v17, %v4502_v17  ;;  %v4485_v18 = vrot.slane %v4467_v11, %v9923_v51 }
 0xb16   :  { %v4524_v5 = vsel %vm856_vm5, %v4502_v17, -inf }
 0xb17   :  { %v4511_v27 = vcombine.high %v4509_v24, %v4509_v24  ;;  %v4492_v31 = vrot.slane %v4478_v50, %v9923_v51  ;;  %v4493_v59 = vcombine.high %v4485_v18, %v4485_v18  ;;  %v4520_v46 = vsel %vm856_vm5, %v4485_v18, -inf }
 0xb18   :  { %v4526_v57 = vsel %vm856_vm5, %v4510_v32, -inf  ;;  %v4528_v39 = vsel %vm856_vm5, %v4509_v24, -inf  ;;  %v4525_v34 = vmax.f32 %v4520_v46, %v4524_v5 }
 0xb19   :  { %v4494_v60 = vcombine.high %v4492_v31, %v4492_v31  ;;  %v4522_v4 = vsel %vm856_vm5, %v4492_v31, -inf  ;;  %v4521_v3 = vsel %vm856_vm5, %v4493_v59, -inf  ;;  %v4530_v15 = vsel %vm856_vm5, %v4511_v27, -inf }
 0xb1a   :  { %v4527_v28 = vmax.f32 %v4521_v3, %v4526_v57  ;;  %v4529_v48 = vmax.f32 %v4522_v4, %v4528_v39 }
 0xb1b   :  { %v4523_v63 = vsel %vm856_vm5, %v4494_v60, -inf }
 0xb1c   :  { %v4531_v19 = vmax.f32 %v4523_v63, %v4530_v15  ;;  %v4532_v47 = vmax.f32 %v4525_v34, %v4527_v28 }
 0xb1e   :  { %v4533_v49 = vmax.f32 %v4529_v48, %v4531_v19 }
 0xb20   :  { %v4534_v35 = vmax.f32 %v4532_v47, %v4533_v49 }
 0xb22   :  { %v4535_v37 = vsub.f32 %v4485_v18, %v4534_v35  ;;  %v4536_v52 = vsub.f32 %v4493_v59, %v4534_v35  ;;  %v4537_v33 = vsub.f32 %v4492_v31, %v4534_v35  ;;  %v4538_v20 = vsub.f32 %v4494_v60, %v4534_v35 }
 0xb23   :  { %v4539_v58 = vsub.f32 %v4502_v17, %v4534_v35  ;;  %v4540_v53 = vsub.f32 %v4510_v32, %v4534_v35  ;;  %v4541_v10 = vsub.f32 %v4509_v24, %v4534_v35  ;;  %v4542_v14 = vsub.f32 %v4511_v27, %v4534_v35 }
 0xb24   :  { %v4543_v26 = vmul.f32 1.442695, %v4535_v37  ;;  %v4545_v30 = vmul.f32 1.442695, %v4536_v52  ;;  %v4547_v38 = vmul.f32 1.442695, %v4537_v33 }
 0xb25   :  { %v4549_v45 = vmul.f32 1.442695, %v4538_v20  ;;  %v4551_v25 = vmul.f32 1.442695, %v4539_v58  ;;  %v4553_v29 = vmul.f32 1.442695, %v4540_v53 }
 0xb26   :  { %9581 = vpow2.f32 %v4543_v26  ;;  %v4555_v11 = vmul.f32 1.442695, %v4541_v10  ;;  %v4557_v50 = vmul.f32 1.442695, %v4542_v14 }
 0xb27   :  { %9583 = vpow2.f32 %v4545_v30 }
 0xb28   :  { %9585 = vpow2.f32 %v4547_v38 }
 0xb29   :  { %9587 = vpow2.f32 %v4549_v45 }
 0xb2a   :  { %9589 = vpow2.f32 %v4551_v25 }
 0xb2b   :  { %9591 = vpow2.f32 %v4553_v29 }
 0xb2c   :  { %9593 = vpow2.f32 %v4555_v11 }
 0xb2d   :  { %9595 = vpow2.f32 %v4557_v50 }
 0xb33   :  { %v9582_v17 = vpop.eup %9581 }
 0xb34   :  { %v9584_v18 = vpop.eup %9583  ;;  %v4559_v31 = vsel %vm856_vm5, %v9582_v17, 0.0 }
 0xb35   :  { %v9586_v32 = vpop.eup %9585  ;;  %v4560_v59 = vsel %vm856_vm5, %v9584_v18, 0.0 }
 0xb36   :  { %v9588_v24 = vpop.eup %9587  ;;  %v4561_v60 = vadd.f32 %v4560_v59, %v4559_v31  ;;  %v4562_v46 = vsel %vm856_vm5, %v9586_v32, 0.0  ;;  %v8145_v59 = vld [vmem:[%s12032_s14 + $0x30] sm:$0xff] }
 0xb37   :  { %v9590_v27 = vpop.eup %9589  ;;  %v4564_v5 = vsel %vm856_vm5, %v9588_v24, 0.0 }
 0xb38   :  { %v4563_v4 = vadd.f32 %v4562_v46, %v4561_v60  ;;  %v9592_v57 = vpop.eup %9591  ;;  %v4566_v39 = vsel %vm856_vm5, %v9590_v27, 0.0  ;;  %v8143_v60 = vld [vmem:[%s12032_s14 + $0x20] sm:$0xff]  ;;  %v9208_v46 = vpop.f32.mrf.mxu0 }
 0xb39   :  { %v9594_v15 = vpop.eup %9593  ;;  %v4568_v28 = vsel %vm856_vm5, %v9592_v57, 0.0 }
 0xb3a   :  { %v4565_v3 = vadd.f32 %v4564_v5, %v4563_v4  ;;  %v9596_v34 = vpop.eup %9595  ;;  %v4570_v19 = vsel %vm856_vm5, %v9594_v15, 0.0  ;;  %v8135_v4 = vld [vmem:[%s12031_s13 + $0x1] ss:$0 sm:$0xff] }
 0xb3b   :  { %v4572_v49 = vsel %vm856_vm5, %v9596_v34, 0.0 }
 0xb3c   :  { %v4567_v63 = vadd.f32 %v4566_v39, %v4565_v3  ;;  %v4300_v39 = vadd.f32 %v9208_v46, %v8135_v4 }
 0xb3e   :  { %v4569_v48 = vadd.f32 %v4568_v28, %v4567_v63 }
 0xb40   :  { %v4571_v47 = vadd.f32 %v4570_v19, %v4569_v48 }
 0xb42   :  { %v4573_v35 = vadd.f32 %v4572_v49, %v4571_v47 }
 0xb44   :  { %9597 = vrcp.f32 %v4573_v35 }
 0xb51   :  { %v9598_v37 = vpop.eup %9597 }
 0xb52   :  { %v4575_v52 = vmul.f32 %v9598_v37, %v9582_v17  ;;  %v4576_v33 = vmul.f32 %v9598_v37, %v9584_v18  ;;  %v4577_v20 = vmul.f32 %v9598_v37, %v9586_v32  ;;  %v4578_v58 = vmul.f32 %v9598_v37, %v9588_v24  ;;  %v8146_v32 = vld [vmem:[%s12032_s14 + $0x38] sm:$0xff]  ;;  %v8144_v24 = vld [vmem:[%s12032_s14 + $0x28] sm:$0xff] }
 0xb53   :  { %v4579_v26 = vmul.f32 %v9598_v37, %v9590_v27  ;;  %v4580_v30 = vmul.f32 %v9598_v37, %v9592_v57  ;;  %v4581_v38 = vmul.f32 %v9598_v37, %v9594_v15  ;;  %v4582_v53 = vmul.f32 %v9598_v37, %v9596_v34  ;;  %v4294_v27 = vpop.f32.mrf.mxu0 }
 0xb54   :  { %v4591_v45 = vcombine.low %v4575_v52, %v4576_v33  ;;  %v4592_v10 = vcombine.low %v4577_v20, %v4578_v58  ;;  %v4295_v57 = vadd.f32 %v8135_v4, %v4294_v27 }
 0xb55   :  { %v4608_v25 = vcombine.low %v4579_v26, %v4580_v30  ;;  %v4609_v14 = vcombine.low %v4581_v38, %v4582_v53 }
 0xb56   :  { %v4599_v29 = vrot.slane %v4591_v45, %v9923_v51  ;;  %v4606_v11 = vrot.slane %v4592_v10, %v9923_v51 }
 0xb57   :  { %v4616_v50 = vrot.slane %v4608_v25, %v9923_v51  ;;  %v4623_v31 = vrot.slane %v4609_v14, %v9923_v51 }
 0xb58   :  { %v4607_v17 = vcombine.low %v4599_v29, %v4606_v11 }
 0xb59   :  { %v4624_v18 = vcombine.low %v4616_v50, %v4623_v31 }
 0xb5a   :  { %9222 = vmatprep.mubr.msk.f32.mxu0 %vm962_vm6, %v4607_v17  ;;  %v8148_v17 = vld [vmem:[%s12033_s15 + $0x1] ss:$0 sm:$0xff] }
 0xb5b   :  { %9223 = vmatmul.mubr.msk.f32.vlgmr.msra.gmra.mxu0 %vm962_vm6, %v4624_v18 }
 0xb5c   :  { %9233 = vmatprep.mubr.msk.f32.mxu0 %vm9675_vm2, %v9673_v21  ;;  %9226 = vmatpush3.msra.mxu0 %v8146_v32 }
 0xb5d   :  { %9227 = vmatprep.subr.mxu0 %v9673_v21 }
 0xb5e   :  { %9228 = vmatpush3.msra.mxu0 %v8145_v59 }
 0xb5f   :  { %9229 = vmatprep.subr.mxu0 %v9673_v21 }
 0xb60   :  { %9230 = vmatpush3.msra.mxu0 %v8144_v24 }
 0xb61   :  { %9231 = vmatprep.subr.mxu0 %v9673_v21 }
 0xb62   :  { %9232 = vmatpush3.msra.mxu0 %v8143_v60 }
 0xc1b   :  { %v9224_v5 = vpop.f32.mrf.mxu0 }
 0xc1c   :  { %v4705_v63 = vmul.f32 %v9224_v5, %v4300_v39 }
 0xc1d   :  { %v4695_v3 = vpop.f32.mrf.mxu0 }
 0xc1e   :  { %v4704_v15 = vmul.f32 %v4695_v3, %v4295_v57  ;;  %v4725_v21 = vcombine.high %v4705_v63, %v4705_v63  ;;  %v4732_v47 = vrot.slane %v4705_v63, %v9923_v51 }
 0xc20   :  { %v4708_v28 = vcombine.high %v4704_v15, %v4704_v15  ;;  %v4715_v34 = vrot.slane %v4704_v15, %v9923_v51  ;;  %v4739_v58 = vrot.slane %v4725_v21, %v9923_v51  ;;  %v4740_v26 = vcombine.high %v4732_v47, %v4732_v47 }
 0xc21   :  { %v4757_v53 = vsel %vm1092_vm7, %v4732_v47, 0.0 }
 0xc22   :  { %v4722_v48 = vrot.slane %v4708_v28, %v9923_v51  ;;  %v4723_v19 = vcombine.high %v4715_v34, %v4715_v34  ;;  %v4750_v35 = vsel %vm1092_vm7, %v4715_v34, 0.0  ;;  %v4741_v10 = vcombine.high %v4739_v58, %v4739_v58 }
 0xc23   :  { %v4759_v25 = vsel %vm1092_vm7, %v4740_v26, 0.0  ;;  %v4761_v29 = vsel %vm1092_vm7, %v4739_v58, 0.0 }
 0xc24   :  { %v4724_v49 = vcombine.high %v4722_v48, %v4722_v48  ;;  %v4751_v37 = vsel %vm1092_vm7, %v4723_v19, 0.0  ;;  %v4753_v33 = vsel %vm1092_vm7, %v4722_v48, 0.0  ;;  %v4763_v50 = vsel %vm1092_vm7, %v4741_v10, 0.0 }
 0xc25   :  { %v4752_v52 = vadd.f32 %v4751_v37, %v4750_v35 }
 0xc26   :  { %v4755_v30 = vsel %vm1092_vm7, %v4724_v49, 0.0 }
 0xc27   :  { %v4754_v20 = vadd.f32 %v4753_v33, %v4752_v52 }
 0xc29   :  { %v4756_v38 = vadd.f32 %v4755_v30, %v4754_v20 }
 0xc2b   :  { %v4758_v45 = vadd.f32 %v4757_v53, %v4756_v38 }
 0xc2d   :  { %v4760_v14 = vadd.f32 %v4759_v25, %v4758_v45 }
 0xc2f   :  { %v4762_v11 = vadd.f32 %v4761_v29, %v4760_v14 }
 0xc31   :  { %v4764_v31 = vadd.f32 %v4763_v50, %v4762_v11 }
 0xc33   :  { %9234 = vmatmul.mubr.msk.f32.vlgmr.msra.gmra.mxu0 %vm348_vm3, %v4764_v31 }
 0xc34   :  { %5596 = vmatprep.mubr.bf16.mxu0 %v9672_v2 }
 0xcf3   :  { %v4847_v18 = vpop.f32.mrf.mxu0 }
 0xcf4   :  { %v4848_v32 = vadd.f32 %v8148_v17, %v4847_v18 }
 0xcf5   :  { %v9235_v59 = vpop.f32.mrf.mxu0 }
 0xcf6   :  { %v4851_v24 = vadd.f32 %v4848_v32, %v10970_v6  ;;  %v4852_v60 = vadd.f32 %v4848_v32, %v10974_v1  ;;  %v4853_v46 = vadd.f32 %v4848_v32, %v10979_v12  ;;  %v4854_v27 = vadd.f32 %v4848_v32, %v10981_v7 }
 0xcf7   :  { %v4855_v4 = vadd.f32 %v4848_v32, %v11004_v8  ;;  %v4856_v5 = vadd.f32 %v4848_v32, %v10995_v54  ;;  %v4857_v57 = vadd.f32 %v4848_v32, %v11006_v36  ;;  %v4858_v3 = vadd.f32 %v4848_v32, %v10997_v40 }
 0xcf8   :  { %v4867_v39 = vcombine.low %v4851_v24, %v4852_v60  ;;  %v4868_v15 = vcombine.low %v4853_v46, %v4854_v27 }
 0xcf9   :  { %v4884_v63 = vcombine.low %v4855_v4, %v4856_v5  ;;  %v4885_v28 = vcombine.low %v4857_v57, %v4858_v3 }
 0xcfa   :  { %v4875_v6 = vrot.slane %v4867_v39, %v9923_v51  ;;  %v4882_v1 = vrot.slane %v4868_v15, %v9923_v51 }
 0xcfb   :  { %v4892_v12 = vrot.slane %v4884_v63, %v9923_v51  ;;  %v4899_v7 = vrot.slane %v4885_v28, %v9923_v51 }
 0xcfc   :  { %v4883_v34 = vcombine.low %v4875_v6, %v4882_v1  ;;  %v7709_v6 = vld [vmem:[%s12069_s10 + $0x8] sm:$0xff]  ;;  %v8170_v1 = vld [vmem:[%s12036_s18 + $0x180] sm:$0xff] }
 0xcfd   :  { %v4900_v54 = vcombine.low %v4892_v12, %v4899_v7  ;;  %v8178_v12 = vld [vmem:[%s12036_s18 + $0x1c0] sm:$0xff]  ;;  %v8171_v7 = vld [vmem:[%s12036_s18 + $0x188] sm:$0xff] }
 0xcfe   :  { %v4903_v8 = vsel %vm348_vm3, %v4883_v34, 0.0  ;;  %v8204_v34 = vcombine.low %v8170_v1, %v8178_v12 }
 0xcff   :  { %4904 = vadd.xlane.f32.xlu1 %v4903_v8  ;;  %v4906_v36 = vsel %vm348_vm3, %v4900_v54, 0.0  ;;  %v8205_v8 = vcombine.high %v8170_v1, %v8178_v12  ;;  %v8179_v54 = vld [vmem:[%s12036_s18 + $0x1c8] sm:$0xff] }
 0xd01   :  { %5533 = vmatprep.subr.bf16.mxu1 %v8205_v8 }
 0xd02   :  { %5534 = vmatpush1.bf16.msra.mxu1 %v8204_v34 }
 0xd03   :  { %4907 = vadd.xlane.f32.xlu1 %v4906_v36  ;;  %v8154_v36 = vld [vmem:[%s12036_s18 + $0x100] sm:$0xff] }
 0xd88   :  { %v4905_v40 = vpop.xlane.xlu1 %4904 }
 0xd89   :  { %v4909_v48 = vmul.f32 0.03125, %v4905_v40  ;;  %v8162_v40 = vld [vmem:[%s12036_s18 + $0x140] sm:$0xff] }
 0xd8b   :  { %v4919_v19 = vrot.slane %v4909_v48, %v10103_v41  ;;  %v4926_v21 = vrot.slane %v4909_v48, %v10106_v42  ;;  %v4933_v47 = vrot.slane %v4909_v48, %v10109_v43  ;;  %v4940_v49 = vrot.slane %v4909_v48, %v10112_v44 }
 0xd8c   :  { %v4908_v35 = vpop.xlane.xlu1 %4907  ;;  %v8206_v48 = vcombine.low %v8171_v7, %v8179_v54 }
 0xd8d   :  { %v4910_v37 = vmul.f32 0.03125, %v4908_v35  ;;  %v11132_v52 = vsub.f32 %v4851_v24, %v4919_v19  ;;  %v11134_v33 = vsub.f32 %v4852_v60, %v4926_v21  ;;  %v11136_v20 = vsub.f32 %v4853_v46, %v4933_v47  ;;  %v8155_v47 = vld [vmem:[%s12036_s18 + $0x108] sm:$0xff] }
 0xd8e   :  { %v11138_v58 = vsub.f32 %v4854_v27, %v4940_v49  ;;  %v8207_v19 = vcombine.high %v8171_v7, %v8179_v54  ;;  %v8189_v21 = vcombine.high %v8154_v36, %v8162_v40  ;;  %v8163_v49 = vld [vmem:[%s12036_s18 + $0x148] sm:$0xff] }
 0xd8f   :  { %v4947_v26 = vrot.slane %v4910_v37, %v10103_v41  ;;  %v4954_v30 = vrot.slane %v4910_v37, %v10106_v42  ;;  %v4961_v38 = vrot.slane %v4910_v37, %v10109_v43  ;;  %v4968_v53 = vrot.slane %v4910_v37, %v10112_v44 }
 0xd90   :  { %v4985_v45 = vmul.f32 %v11132_v52, %v11132_v52  ;;  %v4986_v10 = vmul.f32 %v11134_v33, %v11134_v33  ;;  %v4987_v25 = vmul.f32 %v11136_v20, %v11136_v20  ;;  %v4988_v14 = vmul.f32 %v11138_v58, %v11138_v58  ;;  %5576 = vmatprep.subr.bf16.mxu0 %v8207_v19 }
 0xd91   :  { %v11152_v29 = vsub.f32 %v4855_v4, %v4947_v26  ;;  %v11154_v11 = vsub.f32 %v4856_v5, %v4954_v30  ;;  %v11156_v50 = vsub.f32 %v4857_v57, %v4961_v38  ;;  %v11158_v31 = vsub.f32 %v4858_v3, %v4968_v53  ;;  %5577 = vmatpush1.bf16.msra.mxu0 %v8206_v48  ;;  %v11204_v30 = vld [vmem:[%s12036_s18 + $0x190] sm:$0xff]  ;;  %v11214_v53 = vld [vmem:[%s12036_s18 + $0x198] sm:$0xff] }
 0xd92   :  { %v5001_v17 = vcombine.low %v4985_v45, %v4986_v10  ;;  %v5002_v18 = vcombine.low %v4987_v25, %v4988_v14  ;;  %v8191_v35 = vcombine.high %v8155_v47, %v8163_v49  ;;  %v8188_v37 = vcombine.low %v8154_v36, %v8162_v40  ;;  %5535 = vmatprep.subr.bf16.mxu1 %v8189_v21  ;;  %v11209_v38 = vld [vmem:[%s12036_s18 + $0x1d0] sm:$0xff]  ;;  %v11223_v25 = vld [vmem:[%s12036_s18 + $0x1d8] sm:$0xff] }
 0xd93   :  { %v4989_v32 = vmul.f32 %v11152_v29, %v11152_v29  ;;  %v4990_v59 = vmul.f32 %v11154_v11, %v11154_v11  ;;  %v4991_v24 = vmul.f32 %v11156_v50, %v11156_v50  ;;  %v4992_v60 = vmul.f32 %v11158_v31, %v11158_v31 }
 0xd94   :  { %v5009_v46 = vrot.slane %v5001_v17, %v9923_v51  ;;  %v5016_v27 = vrot.slane %v5002_v18, %v9923_v51  ;;  %v8190_v26 = vcombine.low %v8155_v47, %v8163_v49  ;;  %5578 = vmatprep.subr.bf16.mxu0 %v8191_v35  ;;  %5536 = vmatpush1.bf16.msra.mxu1 %v8188_v37 }
 0xd95   :  { %v5018_v4 = vcombine.low %v4989_v32, %v4990_v59  ;;  %v5019_v5 = vcombine.low %v4991_v24, %v4992_v60  ;;  %v8208_v45 = vcombine.low %v11204_v30, %v11209_v38  ;;  %v8209_v10 = vcombine.high %v11204_v30, %v11209_v38  ;;  %v8166_v30 = vld [vmem:[%s12036_s18 + $0x160] sm:$0xff]  ;;  %v8159_v38 = vld [vmem:[%s12036_s18 + $0x128] sm:$0xff] }
 0xd96   :  { %v5017_v57 = vcombine.low %v5009_v46, %v5016_v27  ;;  %5579 = vmatpush1.bf16.msra.mxu0 %v8190_v26  ;;  %v8210_v14 = vcombine.low %v11214_v53, %v11223_v25  ;;  %v8211_v17 = vcombine.high %v11214_v53, %v11223_v25  ;;  %v8151_v27 = vld [vmem:[%s12034_s16 + $0x1] ss:$0 sm:$0xff]  ;;  %v8167_v53 = vld [vmem:[%s12036_s18 + $0x168] sm:$0xff] }
 0xd97   :  { %v5026_v3 = vrot.slane %v5018_v4, %v9923_v51  ;;  %v5033_v39 = vrot.slane %v5019_v5, %v9923_v51  ;;  %5619 = vmatprep.subr.bf16.mxu1 %v8209_v10  ;;  %v8153_v4 = vld [vmem:[%s12035_s17 + $0x1] ss:$0 sm:$0xff]  ;;  %v5130_v5 = vcombine.high %v8151_v27, %v8151_v27 }
 0xd98   :  { %v5037_v15 = vsel %vm348_vm3, %v5017_v57, 0.0  ;;  %5662 = vmatprep.subr.bf16.mxu0 %v8211_v17  ;;  %v5166_v57 = vcombine.high %v8153_v4, %v8153_v4 }
 0xd99   :  { %5038 = vadd.xlane.f32.xlu1 %v5037_v15  ;;  %v5034_v63 = vcombine.low %v5026_v3, %v5033_v39  ;;  %v5137_v3 = vrot.slane %v8151_v27, %v9923_v51  ;;  %v5144_v39 = vrot.slane %v5130_v5, %v9923_v51  ;;  %v5173_v15 = vrot.slane %v8153_v4, %v9923_v51 }
 0xd9b   :  { %v5040_v28 = vsel %vm348_vm3, %v5034_v63, 0.0  ;;  %v5180_v63 = vrot.slane %v5166_v57, %v9923_v51  ;;  %v5146_v1 = vcombine.high %v5144_v39, %v5144_v39  ;;  %v5181_v54 = vcombine.high %v5173_v15, %v5173_v15 }
 0xd9c   :  { %5041 = vadd.xlane.f32.xlu0 %v5040_v28 }
 0xd9d   :  { %v5182_v36 = vcombine.high %v5180_v63, %v5180_v63 }
 0xdb2   :  { %7714 = vperm.xlu0 %9296, %v7709_v6   ;;  %v5145_v6 = vcombine.high %v5137_v3, %v5137_v3 }
 0xe22   :  { %v5039_v18 = vpop.xlane.xlu1 %5038 }
 0xe23   :  { %v5043_v32 = vmul.f32 0.03125, %v5039_v18 }
 0xe25   :  { %v5045_v59 = vadd.f32 1e-05, %v5043_v32  ;;  %v5042_v24 = vpop.xlane.xlu0 %5041 }
 0xe26   :  { %v5044_v60 = vmul.f32 0.03125, %v5042_v24 }
 0xe27   :  { %9599 = vrsqrt.f32 %v5045_v59 }
 0xe28   :  { %v5046_v46 = vadd.f32 1e-05, %v5044_v60 }
 0xe2a   :  { %9601 = vrsqrt.f32 %v5046_v46 }
 0xe34   :  { %v9600_v28 = vpop.eup %9599 }
 0xe35   :  { %v5057_v12 = vrot.slane %v9600_v28, %v10103_v41  ;;  %v5064_v7 = vrot.slane %v9600_v28, %v10106_v42  ;;  %v5071_v34 = vrot.slane %v9600_v28, %v10109_v43  ;;  %v5078_v8 = vrot.slane %v9600_v28, %v10112_v44 }
 0xe37   :  { %v9602_v40 = vpop.eup %9601  ;;  %v5115_v48 = vmul.f32 %v5057_v12, %v11132_v52  ;;  %v5116_v19 = vmul.f32 %v5064_v7, %v11134_v33  ;;  %v5117_v21 = vmul.f32 %v5071_v34, %v11136_v20  ;;  %v5118_v47 = vmul.f32 %v5078_v8, %v11138_v58  ;;  %v8164_v34 = vld [vmem:[%s12036_s18 + $0x150] sm:$0xff]  ;;  %v8157_v8 = vld [vmem:[%s12036_s18 + $0x118] sm:$0xff] }
 0xe38   :  { %v5085_v49 = vrot.slane %v9602_v40, %v10103_v41  ;;  %v5092_v35 = vrot.slane %v9602_v40, %v10106_v42  ;;  %v5099_v37 = vrot.slane %v9602_v40, %v10109_v43  ;;  %v5106_v26 = vrot.slane %v9602_v40, %v10112_v44 }
 0xe39   :  { %v5151_v10 = vmul.f32 %v5137_v3, %v5115_v48  ;;  %v5152_v17 = vmul.f32 %v5145_v6, %v5116_v19  ;;  %v5153_v18 = vmul.f32 %v5144_v39, %v5117_v21  ;;  %v5154_v32 = vmul.f32 %v5146_v1, %v5118_v47  ;;  %v8174_v47 = vld [vmem:[%s12036_s18 + $0x1a0] sm:$0xff] }
 0xe3a   :  { %v5119_v52 = vmul.f32 %v5085_v49, %v11152_v29  ;;  %v5120_v33 = vmul.f32 %v5092_v35, %v11154_v11  ;;  %v5121_v20 = vmul.f32 %v5099_v37, %v11156_v50  ;;  %v5122_v58 = vmul.f32 %v5106_v26, %v11158_v31  ;;  %v8182_v49 = vld [vmem:[%s12036_s18 + $0x1e0] sm:$0xff]  ;;  %v8175_v35 = vld [vmem:[%s12036_s18 + $0x1a8] sm:$0xff] }
 0xe3b   :  { %v11255_v59 = vadd.f32 %v5173_v15, %v5151_v10  ;;  %v11257_v24 = vadd.f32 %v5181_v54, %v5152_v17  ;;  %v11259_v60 = vadd.f32 %v5180_v63, %v5153_v18  ;;  %v11261_v46 = vadd.f32 %v5182_v36, %v5154_v32  ;;  %v8183_v37 = vld [vmem:[%s12036_s18 + $0x1e8] sm:$0xff]  ;;  %v8158_v32 = vld [vmem:[%s12036_s18 + $0x120] sm:$0xff] }
 0xe3c   :  { %v5155_v27 = vmul.f32 %v5137_v3, %v5119_v52  ;;  %v5156_v4 = vmul.f32 %v5145_v6, %v5120_v33  ;;  %v5157_v5 = vmul.f32 %v5144_v39, %v5121_v20  ;;  %v5158_v57 = vmul.f32 %v5146_v1, %v5122_v58  ;;  %v8176_v33 = vld [vmem:[%s12036_s18 + $0x1b0] sm:$0xff]  ;;  %v8177_v58 = vld [vmem:[%s12036_s18 + $0x1b8] sm:$0xff] }
 0xe3d   :  { %v5203_v29 = vcombine.low %v11255_v59, %v11257_v24  ;;  %v5204_v11 = vcombine.low %v11259_v60, %v11261_v46  ;;  %v8213_v17 = vcombine.high %v8174_v47, %v8182_v49  ;;  %v8215_v18 = vcombine.high %v8175_v35, %v8183_v37  ;;  %v8184_v20 = vld [vmem:[%s12036_s18 + $0x1f0] sm:$0xff] }
 0xe3e   :  { %v11267_v50 = vadd.f32 %v5173_v15, %v5155_v27  ;;  %v11269_v31 = vadd.f32 %v5181_v54, %v5156_v4  ;;  %v11271_v28 = vadd.f32 %v5180_v63, %v5157_v5  ;;  %v11273_v12 = vadd.f32 %v5182_v36, %v5158_v57  ;;  %v8156_v63 = vld [vmem:[%s12036_s18 + $0x110] sm:$0xff]  ;;  %v8165_v54 = vld [vmem:[%s12036_s18 + $0x158] sm:$0xff] }
 0xe3f   :  { %v5211_v7 = vrot.slane %v5203_v29, %v9923_v51  ;;  %v5218_v3 = vrot.slane %v5204_v11, %v9923_v51  ;;  %v8193_v19 = vcombine.high %v8156_v63, %v8164_v34  ;;  %v8195_v21 = vcombine.high %v8157_v8, %v8165_v54  ;;  %v8185_v27 = vld [vmem:[%s12036_s18 + $0x1f8] sm:$0xff]  ;;  %v8160_v11 = vld [vmem:[%s12036_s18 + $0x130] sm:$0xff] }
 0xe40   :  { %v5220_v39 = vcombine.low %v11267_v50, %v11269_v31  ;;  %v5221_v6 = vcombine.low %v11271_v28, %v11273_v12  ;;  %v8192_v26 = vcombine.low %v8156_v63, %v8164_v34  ;;  %v8194_v10 = vcombine.low %v8157_v8, %v8165_v54  ;;  %v9427_v54 = vld [vmem:[%s12038_s20 + $0x478] sm:$0xff]  }
 0xe41   :  { %v5219_v36 = vcombine.low %v5211_v7, %v5218_v3  ;;  %v8214_v25 = vcombine.low %v8175_v35, %v8183_v37  ;;  %v8199_v52 = vcombine.high %v8159_v38, %v8167_v53  ;;  %v8196_v4 = vcombine.low %v8158_v32, %v8166_v30  ;;  %v8168_v7 = vld [vmem:[%s12036_s18 + $0x170] sm:$0xff]  ;;  %v8161_v3 = vld [vmem:[%s12036_s18 + $0x138] sm:$0xff]  ;;  %v9435_v35 = vld [vmem:[%s12038_s20 + $0x468] sm:$0xff]  }
 0xe42   :  { %v5228_v1 = vrot.slane %v5220_v39, %v9923_v51  ;;  %v5235_v15 = vrot.slane %v5221_v6, %v9923_v51  ;;  %v8198_v5 = vcombine.low %v8159_v38, %v8167_v53  ;;  %v8217_v57 = vcombine.high %v8176_v33, %v8184_v20  ;;  %v8169_v39 = vld [vmem:[%s12036_s18 + $0x178] sm:$0xff]  ;;  %v9437_v37 = vld [vmem:[%s12038_s20 + $0x428] sm:$0xff]   ;;  %s9682_s18 = smov [#allocation2]  }
 0xe43   :  { %v8219_v29 = vcombine.high %v8177_v58, %v8185_v27  ;;  %v8216_v6 = vcombine.low %v8176_v33, %v8184_v20  ;;  %v8203_v63 = vcombine.high %v8161_v3, %v8169_v39  ;;  %v8200_v34 = vcombine.low %v8160_v11, %v8168_v7  ;;  %v9444_v38 = vld [vmem:[%s12038_s20 + $0x4d8] sm:$0xff]   ;;  %v9450_v33 = vld [vmem:[%s12038_s20 + $0x490] sm:$0xff]   ;;  %v9451_v20 = vld [vmem:[%s12038_s20 + $0x448] sm:$0xff]   ;;  %s7896_s28 = sshll.u32 %s9682_s18, 4  ;;  %s7897_s28 = int_to_ptr.vmem [resolvable:$true] %s7896_s28 }
 0xe44   :  { %v5236_v40 = vcombine.low %v5228_v1, %v5235_v15  ;;  %v8218_v1 = vcombine.low %v8177_v58, %v8185_v27  ;;  %v8201_v15 = vcombine.high %v8160_v11, %v8168_v7  ;;  %v8202_v8 = vcombine.low %v8161_v3, %v8169_v39  ;;  %v9445_v53 = vld [vmem:[%s12038_s20 + $0x418] sm:$0xff]   ;;  %v9452_v58 = vld [vmem:[%s12038_s20 + $0x4c8] sm:$0xff]   ;;  %v9458_v11 = vld [vmem:[%s12038_s20 + $0x480] sm:$0xff]   ;;  %s9628_s4 = scalar_lea.vmem %s7897_s28, 256  ;;  %p9633_p1 = scmp.lt.s32.totalorder %s7897_s28, %s7897_s28 }
 0xe45   :  { %v9453_v27 = vld [vmem:[%s12038_s20 + $0x408] sm:$0xff]   ;;  %v9459_v7 = vld [vmem:[%s12038_s20 + $0x578] sm:$0xff]   ;;  %v7708_v39 = vld [vmem:[%s12069_s10] sm:$0xff]  ;;  %p9629_p0 = scmp.ne.s32.totalorder %s7897_s28, %s9628_s4  ;;  %p9634_p2 = scmp.lt.s32.totalorder %s9628_s4, %s9628_s4 }
 0xe46   :  { %v11295_v48 = vpack.c.bf16 %v5236_v40, %v5219_v36  ;;  %v9428_v36 = vld [vmem:[%s12038_s20 + $0x4f8] sm:$0xff]   ;;  %7711 = vperm.xlu1 %9297, %v7708_v39  }
 0xe47   :  { %v9429_v40 = vld [vmem:[%s12038_s20 + $0x438] sm:$0xff]   ;;  %p9635_p3 = por %p9634_p2, %p9633_p1 }
 0xe48   :  { %8220 = vmatmul.mubr.msk.bf16.vlgmr.msra.gmra.mxu1 %vm348_vm3, %v11295_v48  ;;  %8221 = vmatmul.mubr.msk.bf16.vlgmr.msra.gmra.mxu0 %vm348_vm3, %v11295_v48  ;;  %v9460_v3 = vld [vmem:[%s12038_s20 + $0x5f8] sm:$0xff]  }
 0xe49   :  { %5620 = vmatpush1.bf16.msra.mxu1 %v8208_v45  ;;  %5663 = vmatpush1.bf16.msra.mxu0 %v8210_v14  ;;  %v8212_v45 = vcombine.low %v8174_v47, %v8182_v49  ;;  %v8197_v14 = vcombine.high %v8158_v32, %v8166_v30  ;;  %v9433_v47 = vld [vmem:[%s12038_s20 + $0x430] sm:$0xff]   ;;  %v9442_v32 = vld [vmem:[%s12038_s20 + $0x4a0] sm:$0xff]   ;;  %v9443_v30 = vld [vmem:[%s12038_s20 + $0x458] sm:$0xff]   ;;  %p9636_p4 = pnand %p9635_p3, %p9629_p0 }
 0xe4a   :  { %5621 = vmatprep.subr.bf16.mxu1 %v8193_v19  ;;  %5664 = vmatprep.subr.bf16.mxu0 %v8195_v21  ;;  %v9430_v19 = vld [vmem:[%s12038_s20 + $0x4b8] sm:$0xff]   ;;  %v9431_v21 = vld [vmem:[%s12038_s20 + $0x470] sm:$0xff]  }
 0xe4b   :  { %5639 = vmatprep.mubr.bf16.mxu1 %v9672_v2  ;;  %5682 = vmatprep.mubr.bf16.mxu0 %v9672_v2  ;;  %v9434_v49 = vld [vmem:[%s12038_s20 + $0x4b0] sm:$0xff]  }
 0xe4d   :  { %5622 = vmatpush1.bf16.msra.mxu1 %v8192_v26  ;;  %5665 = vmatpush1.bf16.msra.mxu0 %v8194_v10  ;;  %v9438_v26 = vld [vmem:[%s12038_s20 + $0x4a8] sm:$0xff]   ;;  %v9439_v10 = vld [vmem:[%s12038_s20 + $0x460] sm:$0xff]  }
 0xe4e   :  { %5705 = vmatprep.subr.bf16.mxu1 %v8213_v17  ;;  %5748 = vmatprep.subr.bf16.mxu0 %v8215_v18  ;;  %v9440_v17 = vld [vmem:[%s12038_s20 + $0x4e0] sm:$0xff]  }
 0xe4f   :  { %v9441_v18 = vld [vmem:[%s12038_s20 + $0x420] sm:$0xff]  }
 0xe50   :  { %8222 = vmatmul.mubr.msk.bf16.vlgmr.msra.gmra.mxu1 %vm348_vm3, %v11295_v48  ;;  %8223 = vmatmul.mubr.msk.bf16.vlgmr.msra.gmra.mxu0 %vm348_vm3, %v11295_v48 }
 0xe51   :  { %5706 = vmatpush1.bf16.msra.mxu1 %v8212_v45  ;;  %5749 = vmatpush1.bf16.msra.mxu0 %v8214_v25  ;;  %v9446_v45 = vld [vmem:[%s12038_s20 + $0x498] sm:$0xff]   ;;  %v9447_v25 = vld [vmem:[%s12038_s20 + $0x450] sm:$0xff]  }
 0xe52   :  { %5707 = vmatprep.subr.bf16.mxu1 %v8197_v14  ;;  %5750 = vmatprep.subr.bf16.mxu0 %v8199_v52  ;;  %v9448_v14 = vld [vmem:[%s12038_s20 + $0x4d0] sm:$0xff]  }
 0xe53   :  { %5725 = vmatprep.mubr.bf16.mxu1 %v9672_v2  ;;  %5768 = vmatprep.mubr.bf16.mxu0 %v9672_v2  ;;  %v9449_v52 = vld [vmem:[%s12038_s20 + $0x410] sm:$0xff]  }
 0xe55   :  { %5708 = vmatpush1.bf16.msra.mxu1 %v8196_v4  ;;  %5751 = vmatpush1.bf16.msra.mxu0 %v8198_v5  ;;  %v9454_v4 = vld [vmem:[%s12038_s20 + $0x488] sm:$0xff]   ;;  %v9455_v5 = vld [vmem:[%s12038_s20 + $0x440] sm:$0xff]  }
 0xe56   :  { %5791 = vmatprep.subr.bf16.mxu1 %v8217_v57  ;;  %5834 = vmatprep.subr.bf16.mxu0 %v8219_v29  ;;  %v9456_v57 = vld [vmem:[%s12038_s20 + $0x4c0] sm:$0xff]  }
 0xe57   :  { %v9457_v29 = vld [vmem:[%s12038_s20 + $0x400] sm:$0xff]  }
 0xe58   :  { %8224 = vmatmul.mubr.msk.bf16.vlgmr.msra.gmra.mxu1 %vm348_vm3, %v11295_v48  ;;  %8225 = vmatmul.mubr.msk.bf16.vlgmr.msra.gmra.mxu0 %vm348_vm3, %v11295_v48 }
 0xe59   :  { %5792 = vmatpush1.bf16.msra.mxu1 %v8216_v6  ;;  %5835 = vmatpush1.bf16.msra.mxu0 %v8218_v1  ;;  %v11481_v6 = vld [vmem:[%s12037_s19 + $0x10] sm:$0xff] }
 0xe5a   :  { %5793 = vmatprep.subr.bf16.mxu1 %v8201_v15  ;;  %5836 = vmatprep.subr.bf16.mxu0 %v8203_v63  ;;  %v5285_v63 = vrot.slane %v11481_v6, %v10459_v55 }
 0xe5b   :  { %5811 = vmatprep.mubr.bf16.mxu1 %v9672_v2  ;;  %5854 = vmatprep.mubr.bf16.mxu0 %v9672_v2  ;;  %v9432_v2 = vld [vmem:[%s12038_s20 + $0x4f0] sm:$0xff]  }
 0xe5d   :  { %5794 = vmatpush1.bf16.msra.mxu1 %v8200_v34  ;;  %5837 = vmatpush1.bf16.msra.mxu0 %v8202_v8  ;;  %v5293_v34 = vrot.slane %v11481_v6, %v10462_v61  ;;  %v5281_v8 = vrot.slane %v11481_v6, %v9926_v56 }
 0xe5e   :  { %8881 = vmatprep.subr.bf16.mxu1 %v9427_v54  ;;  %8903 = vmatprep.subr.bf16.mxu0 %v9428_v36  ;;  %v5289_v54 = vrot.slane %v11481_v6, %v10465_v62 }
 0xe60   :  { %8226 = vmatmul.mubr.msk.bf16.vlgmr.msra.gmra.mxu1 %vm348_vm3, %v11295_v48  ;;  %8227 = vmatmul.mubr.msk.bf16.vlgmr.msra.gmra.mxu0 %vm348_vm3, %v11295_v48  ;;  %v9436_v48 = vld [vmem:[%s12038_s20 + $0x4e8] sm:$0xff]  }
 0xe61   :  { %8882 = vmatpush3.bf16.msra.mxu1 %v9429_v40  ;;  %8904 = vmatpush3.bf16.msra.mxu0 %v9430_v19 }
 0xe62   :  { %8883 = vmatprep.subr.bf16.mxu1 %v9431_v21  ;;  %8905 = vmatprep.subr.bf16.mxu0 %v9432_v2 }
 0xe65   :  { %8884 = vmatpush3.bf16.msra.mxu1 %v9433_v47  ;;  %8906 = vmatpush3.bf16.msra.mxu0 %v9434_v49 }
 0xe66   :  { %8885 = vmatprep.subr.bf16.mxu1 %v9435_v35  ;;  %8907 = vmatprep.subr.bf16.mxu0 %v9436_v48 }
 0xe69   :  { %8886 = vmatpush3.bf16.msra.mxu1 %v9437_v37  ;;  %8908 = vmatpush3.bf16.msra.mxu0 %v9438_v26 }
 0xe6a   :  { %8887 = vmatprep.subr.bf16.mxu1 %v9439_v10  ;;  %8909 = vmatprep.subr.bf16.mxu0 %v9440_v17 }
 0xe6d   :  { %8888 = vmatpush3.bf16.msra.mxu1 %v9441_v18  ;;  %8910 = vmatpush3.bf16.msra.mxu0 %v9442_v32 }
 0xe6e   :  { %8889 = vmatprep.subr.bf16.mxu1 %v9443_v30  ;;  %8911 = vmatprep.subr.bf16.mxu0 %v9444_v38 }
 0xe71   :  { %8890 = vmatpush3.bf16.msra.mxu1 %v9445_v53  ;;  %8912 = vmatpush3.bf16.msra.mxu0 %v9446_v45  ;;  %v5301_v45 = vrot.slane %v11481_v6, %v10481_v16 }
 0xe72   :  { %8891 = vmatprep.subr.bf16.mxu1 %v9447_v25  ;;  %8913 = vmatprep.subr.bf16.mxu0 %v9448_v14  ;;  %v5309_v25 = vrot.slane %v11481_v6, %v10484_v22 }
 0xe75   :  { %8892 = vmatpush3.bf16.msra.mxu1 %v9449_v52  ;;  %8914 = vmatpush3.bf16.msra.mxu0 %v9450_v33 }
 0xe76   :  { %8893 = vmatprep.subr.bf16.mxu1 %v9451_v20  ;;  %8915 = vmatprep.subr.bf16.mxu0 %v9452_v58 }
 0xe79   :  { %8894 = vmatpush3.bf16.msra.mxu1 %v9453_v27  ;;  %8916 = vmatpush3.bf16.msra.mxu0 %v9454_v4 }
 0xe7a   :  { %8895 = vmatprep.subr.bf16.mxu1 %v9455_v5  ;;  %8917 = vmatprep.subr.bf16.mxu0 %v9456_v57 }
 0xe7d   :  { %8896 = vmatpush3.bf16.msra.mxu1 %v9457_v29  ;;  %8918 = vmatpush3.bf16.msra.mxu0 %v9458_v11  ;;  %v9461_v11 = vld [vmem:[%s12038_s20 + $0x538] sm:$0xff]  }
 0xe7e   :  { %8925 = vmatprep.subr.bf16.mxu1 %v9459_v7  ;;  %8947 = vmatprep.subr.bf16.mxu0 %v9460_v3  ;;  %v9462_v7 = vld [vmem:[%s12038_s20 + $0x5b8] sm:$0xff]  }
 0xf08   :  { %v5555_v1 = vpop.f32.mrf.mxu1  ;;  %v5598_v15 = vpop.f32.mrf.mxu0 }
 0xf09   :  { %v5556_v48 = vadd.f32 %v5555_v1, %v5281_v8  ;;  %v5599_v37 = vadd.f32 %v5598_v15, %v5289_v54 }
 0xf0a   :  { %v5557_v36 = vpop.f32.mrf.mxu1  ;;  %v5600_v40 = vpop.f32.mrf.mxu0 }
 0xf0b   :  { %v5558_v2 = vadd.f32 %v5557_v36, %v5285_v63  ;;  %v5601_v47 = vadd.f32 %v5600_v40, %v5293_v34  ;;  %v5865_v58 = vmax.f32 %v5556_v48, 0.0  ;;  %v5867_v27 = vmax.f32 %v5599_v37, 0.0 }
 0xf0c   :  { %v5559_v19 = vpop.f32.mrf.mxu1  ;;  %v5602_v21 = vpop.f32.mrf.mxu0 }
 0xf0d   :  { %v5560_v49 = vadd.f32 %v5559_v19, %v5281_v8  ;;  %v5603_v35 = vadd.f32 %v5602_v21, %v5289_v54  ;;  %v5866_v14 = vmax.f32 %v5558_v2, 0.0  ;;  %v5868_v52 = vmax.f32 %v5601_v47, 0.0  ;;  %v9465_v2 = vld [vmem:[%s12038_s20 + $0x530] sm:$0xff]  }
 0xf0e   :  { %v5561_v26 = vpop.f32.mrf.mxu1  ;;  %v5604_v10 = vpop.f32.mrf.mxu0  ;;  %v9466_v47 = vld [vmem:[%s12038_s20 + $0x5b0] sm:$0xff]  }
 0xf0f   :  { %v5562_v17 = vadd.f32 %v5561_v26, %v5285_v63  ;;  %v5605_v18 = vadd.f32 %v5604_v10, %v5293_v34  ;;  %v5881_v32 = vmax.f32 %v5560_v49, 0.0  ;;  %v5883_v30 = vmax.f32 %v5603_v35, 0.0  ;;  %v9463_v63 = vld [vmem:[%s12038_s20 + $0x570] sm:$0xff]   ;;  %v9467_v49 = vld [vmem:[%s12038_s20 + $0x568] sm:$0xff]  }
 0xf10   :  { %v11491_v38 = vpop.f32.mrf.mxu1  ;;  %v11493_v53 = vpop.f32.mrf.mxu0  ;;  %v9464_v34 = vld [vmem:[%s12038_s20 + $0x5f0] sm:$0xff]   ;;  %v9468_v10 = vld [vmem:[%s12038_s20 + $0x5e8] sm:$0xff]  }
 0xf11   :  { %v5882_v33 = vmax.f32 %v5562_v17, 0.0  ;;  %v5884_v20 = vmax.f32 %v5605_v18, 0.0  ;;  %v5897_v3 = vpack.c.bf16 %v5881_v32, %v5865_v58  ;;  %v5899_v39 = vpack.c.bf16 %v5883_v30, %v5867_v27  ;;  %v9469_v32 = vld [vmem:[%s12038_s20 + $0x528] sm:$0xff]   ;;  %v9475_v58 = vld [vmem:[%s12038_s20 + $0x558] sm:$0xff]  }
 0xf12   :  { %v5643_v4 = vpop.f32.mrf.mxu1  ;;  %v5686_v5 = vpop.f32.mrf.mxu0  ;;  %v9470_v30 = vld [vmem:[%s12038_s20 + $0x5a8] sm:$0xff]   ;;  %v9476_v27 = vld [vmem:[%s12038_s20 + $0x5d8] sm:$0xff]  }
 0xf13   :  { %v5898_v57 = vpack.c.bf16 %v5882_v33, %v5866_v14  ;;  %v5900_v29 = vpack.c.bf16 %v5884_v20, %v5868_v52  ;;  %v5644_v8 = vadd.f32 %v5643_v4, %v5301_v45  ;;  %v5687_v54 = vadd.f32 %v5686_v5, %v5309_v25  ;;  %v9473_v52 = vld [vmem:[%s12038_s20 + $0x520] sm:$0xff]   ;;  %v9477_v5 = vld [vmem:[%s12038_s20 + $0x518] sm:$0xff]  }
 0xf14   :  { %v11505_v1 = vpop.f32.mrf.mxu1  ;;  %v11507_v15 = vpop.f32.mrf.mxu0  ;;  %v9474_v20 = vld [vmem:[%s12038_s20 + $0x5a0] sm:$0xff]  }
 0xf15   :  { %6978 = vmatprep.mubr.bf16.mxu1 %v5898_v57  ;;  %7019 = vmatprep.mubr.bf16.mxu0 %v5900_v29  ;;  %v5870_v35 = vmax.f32 %v5644_v8, 0.0  ;;  %v5872_v48 = vmax.f32 %v5687_v54, 0.0  ;;  %v9478_v29 = vld [vmem:[%s12038_s20 + $0x598] sm:$0xff]   ;;  %v9483_v8 = vld [vmem:[%s12038_s20 + $0x548] sm:$0xff]  }
 0xf16   :  { %v5647_v36 = vpop.f32.mrf.mxu1  ;;  %v5690_v40 = vpop.f32.mrf.mxu0  ;;  %6979 = vmatmul.mubr.bf16.vlgmr.msra.gmra.mxu1 %v5897_v3  ;;  %7020 = vmatmul.mubr.bf16.vlgmr.msra.gmra.mxu0 %v5899_v39  ;;  %v9481_v39 = vld [vmem:[%s12038_s20 + $0x510] sm:$0xff]   ;;  %v9484_v54 = vld [vmem:[%s12038_s20 + $0x5c8] sm:$0xff]  }
 0xf17   :  { %v5648_v19 = vadd.f32 %v5647_v36, %v5301_v45  ;;  %v5691_v21 = vadd.f32 %v5690_v40, %v5309_v25  ;;  %8926 = vmatpush3.bf16.msra.mxu1 %v9461_v11  ;;  %8948 = vmatpush3.bf16.msra.mxu0 %v9462_v7  ;;  %v9471_v45 = vld [vmem:[%s12038_s20 + $0x560] sm:$0xff]   ;;  %v9479_v11 = vld [vmem:[%s12038_s20 + $0x550] sm:$0xff]   ;;  %v5297_v36 = vrot.slane %v11481_v6, %v10563_v0 }
 0xf18   :  { %8927 = vmatprep.subr.bf16.mxu1 %v9463_v63  ;;  %8949 = vmatprep.subr.bf16.mxu0 %v9464_v34  ;;  %v9472_v25 = vld [vmem:[%s12038_s20 + $0x5e0] sm:$0xff]   ;;  %v11539_v14 = vpop.f32.mrf.mxu1  ;;  %v11544_v33 = vpop.f32.mrf.mxu0  ;;  %v9480_v7 = vld [vmem:[%s12038_s20 + $0x5d0] sm:$0xff]   ;;  %v5305_v40 = vrot.slane %v11481_v6, %v10566_v13  ;;  %v9486_v6 = vld [vmem:[%s12038_s20 + $0x588] sm:$0xff]  }
 0xf19   :  { %v5886_v37 = vmax.f32 %v5648_v19, 0.0  ;;  %v5888_v26 = vmax.f32 %v5691_v21, 0.0  ;;  %v9482_v34 = vld [vmem:[%s12038_s20 + $0x590] sm:$0xff]   ;;  %v11590_v19 = vld [vmem:[%s12037_s19 + $0x18] sm:$0xff]  ;;  %s12070_s19 = sld [smem:[#allocation12_spill]] }
 0xf1a   :  { %v5729_v4 = vpop.f32.mrf.mxu1  ;;  %v5772_v57 = vpop.f32.mrf.mxu0 }
 0xf1b   :  { %v5902_v17 = vpack.c.bf16 %v5886_v37, %v5870_v35  ;;  %v5904_v18 = vpack.c.bf16 %v5888_v26, %v5872_v48  ;;  %8928 = vmatpush3.bf16.msra.mxu1 %v9465_v2  ;;  %8950 = vmatpush3.bf16.msra.mxu0 %v9466_v47  ;;  %v9485_v2 = vld [vmem:[%s12038_s20 + $0x508] sm:$0xff]   ;;  %v5646_v47 = vadd.f32 %v11505_v1, %v5297_v36  ;;  %v9487_v48 = vld [vmem:[%s12038_s20 + $0x540] sm:$0xff]  }
 0xf1c   :  { %8929 = vmatprep.subr.bf16.mxu1 %v9467_v49  ;;  %8951 = vmatprep.subr.bf16.mxu0 %v9468_v10  ;;  %v11567_v3 = vpop.f32.mrf.mxu1  ;;  %v11572_v63 = vpop.f32.mrf.mxu0  ;;  %v5317_v49 = vrot.slane %v11590_v19, %v10459_v55  ;;  %v5689_v37 = vadd.f32 %v11507_v15, %v5305_v40  ;;  %v5325_v26 = vrot.slane %v11590_v19, %v10462_v61  ;;  %v9488_v55 = vld [vmem:[%s12038_s20 + $0x5c0] sm:$0xff]  }
 0xf1d   :  { %7060 = vmatprep.mubr.bf16.mxu1 %v5902_v17  ;;  %7101 = vmatprep.mubr.bf16.mxu0 %v5904_v18  ;;  %v5642_v1 = vadd.f32 %v11491_v38, %v5297_v36  ;;  %v5685_v17 = vadd.f32 %v11493_v53, %v5305_v40  ;;  %v5885_v15 = vmax.f32 %v5646_v47, 0.0  ;;  %v9490_v61 = vld [vmem:[%s12038_s20 + $0x580] sm:$0xff]   ;;  %v9491_v38 = vld [vmem:[%s12038_s20 + $0x678] sm:$0xff]   ;;  %v9497_v36 = vld [vmem:[%s12038_s20 + $0x630] sm:$0xff]  }
 0xf1e   :  { %v5733_v21 = vpop.f32.mrf.mxu1  ;;  %v5776_v35 = vpop.f32.mrf.mxu0  ;;  %v5773_v53 = vadd.f32 %v5772_v57, %v5325_v26  ;;  %v9494_v57 = vld [vmem:[%s12038_s20 + $0x6b8] sm:$0xff]   ;;  %v9498_v40 = vld [vmem:[%s12038_s20 + $0x6b0] sm:$0xff]   ;;  %v9501_v47 = vld [vmem:[%s12038_s20 + $0x628] sm:$0xff]  }
 0xf1f   :  { %8930 = vmatpush3.bf16.msra.mxu1 %v9469_v32  ;;  %8952 = vmatpush3.bf16.msra.mxu0 %v9470_v30  ;;  %v5734_v10 = vadd.f32 %v5733_v21, %v5317_v49  ;;  %v5777_v18 = vadd.f32 %v5776_v35, %v5325_v26  ;;  %v9489_v32 = vld [vmem:[%s12038_s20 + $0x500] sm:$0xff]   ;;  %v5730_v30 = vadd.f32 %v5729_v4, %v5317_v49  ;;  %v9493_v4 = vld [vmem:[%s12038_s20 + $0x638] sm:$0xff]   ;;  %v9499_v21 = vld [vmem:[%s12038_s20 + $0x668] sm:$0xff]  }
 0xf20   :  { %8931 = vmatprep.subr.bf16.mxu1 %v9471_v45  ;;  %8953 = vmatprep.subr.bf16.mxu0 %v9472_v25  ;;  %v5887_v45 = vmax.f32 %v5689_v37, 0.0  ;;  %v9492_v25 = vld [vmem:[%s12038_s20 + $0x6f8] sm:$0xff]   ;;  %v9502_v49 = vld [vmem:[%s12038_s20 + $0x6a8] sm:$0xff]   ;;  %v9503_v35 = vld [vmem:[%s12038_s20 + $0x660] sm:$0xff]   ;;  %v11665_v26 = vpop.f32.mrf.mxu0 }
 0xf21   :  { %v9505_v37 = vld [vmem:[%s12038_s20 + $0x620] sm:$0xff]  }
 0xf23   :  { %8932 = vmatpush3.bf16.msra.mxu1 %v9473_v52  ;;  %8954 = vmatpush3.bf16.msra.mxu0 %v9474_v20  ;;  %v5869_v52 = vmax.f32 %v5642_v1, 0.0  ;;  %v5890_v20 = vmax.f32 %v5734_v10, 0.0  ;;  %v9507_v1 = vld [vmem:[%s12038_s20 + $0x658] sm:$0xff]  }
 0xf24   :  { %8933 = vmatprep.subr.bf16.mxu1 %v9475_v58  ;;  %8955 = vmatprep.subr.bf16.mxu0 %v9476_v27  ;;  %v5871_v58 = vmax.f32 %v5685_v17, 0.0  ;;  %v5892_v27 = vmax.f32 %v5777_v18, 0.0  ;;  %v9508_v10 = vld [vmem:[%s12038_s20 + $0x6d8] sm:$0xff]  }
 0xf25   :  { %v9509_v18 = vld [vmem:[%s12038_s20 + $0x618] sm:$0xff]  }
 0xf27   :  { %8934 = vmatpush3.bf16.msra.mxu1 %v9477_v5  ;;  %8956 = vmatpush3.bf16.msra.mxu0 %v9478_v29  ;;  %v5901_v5 = vpack.c.bf16 %v5885_v15, %v5869_v52  ;;  %v5874_v29 = vmax.f32 %v5730_v30, 0.0  ;;  %v9510_v15 = vld [vmem:[%s12038_s20 + $0x698] sm:$0xff]   ;;  %v9511_v30 = vld [vmem:[%s12038_s20 + $0x650] sm:$0xff]   ;;  %v9515_v52 = vld [vmem:[%s12038_s20 + $0x648] sm:$0xff]  }
 0xf28   :  { %8935 = vmatprep.subr.bf16.mxu1 %v9479_v11  ;;  %8957 = vmatprep.subr.bf16.mxu0 %v9480_v7  ;;  %v5903_v11 = vpack.c.bf16 %v5887_v45, %v5871_v58  ;;  %v5876_v7 = vmax.f32 %v5773_v53, 0.0  ;;  %v9513_v45 = vld [vmem:[%s12038_s20 + $0x610] sm:$0xff]   ;;  %v5313_v58 = vrot.slane %v11590_v19, %v9926_v56  ;;  %v9518_v56 = vld [vmem:[%s12038_s20 + $0x688] sm:$0xff]  }
 0xf2b   :  { %8936 = vmatpush3.bf16.msra.mxu1 %v9481_v39  ;;  %8958 = vmatpush3.bf16.msra.mxu0 %v9482_v34  ;;  %v9495_v39 = vld [vmem:[%s12038_s20 + $0x670] sm:$0xff]   ;;  %v5906_v34 = vpack.c.bf16 %v5890_v20, %v5874_v29  ;;  %v9516_v20 = vld [vmem:[%s12038_s20 + $0x6c8] sm:$0xff]   ;;  %v5732_v29 = vadd.f32 %v11567_v3, %v5313_v58  ;;  %v5728_v3 = vadd.f32 %v11539_v14, %v5313_v58  ;;  %v9523_v14 = vld [vmem:[%s12038_s20 + $0x778] sm:$0xff]  }
 0xf2c   :  { %8937 = vmatprep.subr.bf16.mxu1 %v9483_v8  ;;  %8959 = vmatprep.subr.bf16.mxu0 %v9484_v54  ;;  %v9496_v8 = vld [vmem:[%s12038_s20 + $0x6f0] sm:$0xff]   ;;  %v5908_v54 = vpack.c.bf16 %v5892_v27, %v5876_v7  ;;  %v5321_v27 = vrot.slane %v11590_v19, %v10465_v62  ;;  %v9519_v62 = vld [vmem:[%s12038_s20 + $0x640] sm:$0xff]   ;;  %v9533_v58 = vld [vmem:[%s12038_s20 + $0x728] sm:$0xff]  }
 0xf2e   :  { %v5775_v7 = vadd.f32 %v11572_v63, %v5321_v27  ;;  %v5889_v63 = vmax.f32 %v5732_v29, 0.0  ;;  %v9537_v29 = vld [vmem:[%s12038_s20 + $0x720] sm:$0xff]  }
 0xf2f   :  { %8938 = vmatpush3.bf16.msra.mxu1 %v9485_v2  ;;  %8960 = vmatpush3.bf16.msra.mxu0 %v9486_v6  ;;  %v9500_v2 = vld [vmem:[%s12038_s20 + $0x6e8] sm:$0xff]   ;;  %v9504_v6 = vld [vmem:[%s12038_s20 + $0x6e0] sm:$0xff]  }
 0xf30   :  { %8939 = vmatprep.subr.bf16.mxu1 %v9487_v48  ;;  %8961 = vmatprep.subr.bf16.mxu0 %v9488_v55  ;;  %v11660_v48 = vpop.f32.mrf.mxu1  ;;  %v9506_v55 = vld [vmem:[%s12038_s20 + $0x6a0] sm:$0xff]  }
 0xf32   :  { %v5815_v17 = vpop.f32.mrf.mxu1 }
 0xf33   :  { %8940 = vmatpush3.bf16.msra.mxu1 %v9489_v32  ;;  %8962 = vmatpush3.bf16.msra.mxu0 %v9490_v61  ;;  %v5858_v32 = vpop.f32.mrf.mxu0  ;;  %v9512_v61 = vld [vmem:[%s12038_s20 + $0x6d0] sm:$0xff]  }
 0xf34   :  { %8969 = vmatprep.subr.bf16.mxu1 %v9491_v38  ;;  %8991 = vmatprep.subr.bf16.mxu0 %v9492_v25  ;;  %v11688_v38 = vpop.f32.mrf.mxu1  ;;  %v9514_v25 = vld [vmem:[%s12038_s20 + $0x690] sm:$0xff]  }
 0xf35   :  { %v11693_v53 = vpop.f32.mrf.mxu0 }
 0xf36   :  { %7061 = vmatmul.mubr.bf16.vlgmr.msra.gmra.mxu1 %v5901_v5  ;;  %7102 = vmatmul.mubr.bf16.vlgmr.msra.gmra.mxu0 %v5903_v11  ;;  %v9517_v5 = vld [vmem:[%s12038_s20 + $0x608] sm:$0xff]  }
 0xf37   :  { %8970 = vmatpush3.bf16.msra.mxu1 %v9493_v4  ;;  %7142 = vmatprep.mubr.bf16.mxu1 %v5906_v34  ;;  %v5819_v4 = vpop.f32.mrf.mxu1  ;;  %v5862_v11 = vpop.f32.mrf.mxu0 }
 0xf38   :  { %8992 = vmatpush3.bf16.msra.mxu0 %v9494_v57  ;;  %7183 = vmatprep.mubr.bf16.mxu0 %v5908_v54  ;;  %v5333_v57 = vrot.slane %v11590_v19, %v10481_v16  ;;  %v9520_v16 = vld [vmem:[%s12038_s20 + $0x6c0] sm:$0xff]  }
 0xf39   :  { %8971 = vmatprep.subr.bf16.mxu1 %v9495_v39  ;;  %8993 = vmatprep.subr.bf16.mxu0 %v9496_v8  ;;  %v5341_v39 = vrot.slane %v11590_v19, %v10484_v22  ;;  %v5771_v8 = vadd.f32 %v11544_v33, %v5321_v27  ;;  %v9522_v22 = vld [vmem:[%s12038_s20 + $0x680] sm:$0xff]   ;;  %v9534_v27 = vld [vmem:[%s12038_s20 + $0x7a8] sm:$0xff]  }
 0xf3a   :  { %v5820_v34 = vadd.f32 %v5819_v4, %v5333_v57  ;;  %v9535_v4 = vld [vmem:[%s12038_s20 + $0x760] sm:$0xff]  }
 0xf3b   :  { %8972 = vmatpush3.bf16.msra.mxu1 %v9497_v36  ;;  %v5863_v54 = vadd.f32 %v5862_v11, %v5341_v39  ;;  %v9521_v36 = vld [vmem:[%s12038_s20 + $0x600] sm:$0xff]   ;;  %v5859_v33 = vadd.f32 %v5858_v32, %v5341_v39  ;;  %v9527_v32 = vld [vmem:[%s12038_s20 + $0x770] sm:$0xff]   ;;  %v9539_v11 = vld [vmem:[%s12038_s20 + $0x758] sm:$0xff]  }
 0xf3c   :  { %8994 = vmatpush3.bf16.msra.mxu0 %v9498_v40  ;;  %8973 = vmatprep.subr.bf16.mxu1 %v9499_v21  ;;  %v5816_v40 = vadd.f32 %v5815_v17, %v5333_v57  ;;  %v5891_v21 = vmax.f32 %v5775_v7, 0.0  ;;  %v9538_v57 = vld [vmem:[%s12038_s20 + $0x7a0] sm:$0xff]   ;;  %v9542_v7 = vld [vmem:[%s12038_s20 + $0x798] sm:$0xff]   ;;  %v9543_v39 = vld [vmem:[%s12038_s20 + $0x750] sm:$0xff]  }
 0xf3d   :  { %8995 = vmatprep.subr.bf16.mxu0 %v9500_v2  ;;  %v9524_v2 = vld [vmem:[%s12038_s20 + $0x7f8] sm:$0xff]  }
 0xf3f   :  { %8974 = vmatpush3.bf16.msra.mxu1 %v9501_v47  ;;  %v5873_v47 = vmax.f32 %v5728_v3, 0.0  ;;  %v9545_v3 = vld [vmem:[%s12038_s20 + $0x710] sm:$0xff]  }
 0xf40   :  { %8996 = vmatpush3.bf16.msra.mxu0 %v9502_v49  ;;  %8975 = vmatprep.subr.bf16.mxu1 %v9503_v35  ;;  %v5894_v49 = vmax.f32 %v5820_v34, 0.0  ;;  %v5875_v35 = vmax.f32 %v5771_v8, 0.0  ;;  %v9546_v34 = vld [vmem:[%s12038_s20 + $0x790] sm:$0xff]   ;;  %v9547_v8 = vld [vmem:[%s12038_s20 + $0x748] sm:$0xff]  }
 0xf41   :  { %8997 = vmatprep.subr.bf16.mxu0 %v9504_v6  ;;  %v5896_v6 = vmax.f32 %v5863_v54, 0.0  ;;  %v9548_v54 = vld [vmem:[%s12038_s20 + $0x7c8] sm:$0xff]  }
 0xf42   :  { %v5907_v17 = vpack.c.bf16 %v5891_v21, %v5875_v35  ;;  %v7712_v35 = vpop.permute.xlu1 %7711 }
 0xf43   :  { %8976 = vmatpush3.bf16.msra.mxu1 %v9505_v37  ;;  %v9525_v37 = vld [vmem:[%s12038_s20 + $0x738] sm:$0xff]   ;;  %vm7716_vm8 = vcmp.eq.s32.totalorder %v9840_v9, %v7712_v35 }
 0xf44   :  { %8998 = vmatpush3.bf16.msra.mxu0 %v9506_v55  ;;  %8977 = vmatprep.subr.bf16.mxu1 %v9507_v1  ;;  %v5905_v55 = vpack.c.bf16 %v5889_v63, %v5873_v47  ;;  %v5878_v1 = vmax.f32 %v5816_v40, 0.0  ;;  %v5337_v63 = vrot.slane %v11590_v19, %v10566_v13  ;;  %v9549_v40 = vld [vmem:[%s12038_s20 + $0x708] sm:$0xff]   ;;  %v9552_v13 = vld [vmem:[%s12038_s20 + $0x7c0] sm:$0xff]  }
 0xf45   :  { %8999 = vmatprep.subr.bf16.mxu0 %v9508_v10  ;;  %v9526_v10 = vld [vmem:[%s12038_s20 + $0x7b8] sm:$0xff]  }
 0xf46   :  { %v5861_v21 = vadd.f32 %v11693_v53, %v5337_v63  ;;  %v9554_v53 = vld [vmem:[%s12038_s20 + $0x780] sm:$0xff]  }
 0xf47   :  { %8978 = vmatpush3.bf16.msra.mxu1 %v9509_v18  ;;  %v5880_v18 = vmax.f32 %v5859_v33, 0.0  ;;  %v9553_v33 = vld [vmem:[%s12038_s20 + $0x700] sm:$0xff]  }
 0xf48   :  { %9000 = vmatpush3.bf16.msra.mxu0 %v9510_v15  ;;  %8979 = vmatprep.subr.bf16.mxu1 %v9511_v30  ;;  %v5910_v15 = vpack.c.bf16 %v5894_v49, %v5878_v1  ;;  %v9528_v30 = vld [vmem:[%s12038_s20 + $0x7f0] sm:$0xff]   ;;  %v5895_v47 = vmax.f32 %v5861_v21, 0.0  ;;  %v9614_v1 = vld [vmem:[%s12063_s3 + $0x68] sm:$0xff] }
 0xf49   :  { %9001 = vmatprep.subr.bf16.mxu0 %v9512_v61  ;;  %v5912_v61 = vpack.c.bf16 %v5896_v6, %v5880_v18  ;;  %v9617_v18 = vld [vmem:[%s12063_s3 + $0x50] sm:$0xff] }
 0xf4b   :  { %8980 = vmatpush3.bf16.msra.mxu1 %v9513_v45  ;;  %v9529_v45 = vld [vmem:[%s12038_s20 + $0x730] sm:$0xff]  }
 0xf4c   :  { %9002 = vmatpush3.bf16.msra.mxu0 %v9514_v25  ;;  %8981 = vmatprep.subr.bf16.mxu1 %v9515_v52  ;;  %v9530_v25 = vld [vmem:[%s12038_s20 + $0x7b0] sm:$0xff]   ;;  %v9531_v52 = vld [vmem:[%s12038_s20 + $0x768] sm:$0xff]  }
 0xf4d   :  { %9003 = vmatprep.subr.bf16.mxu0 %v9516_v20  ;;  %v9532_v20 = vld [vmem:[%s12038_s20 + $0x7e8] sm:$0xff]  }
 0xf4f   :  { %8982 = vmatpush3.bf16.msra.mxu1 %v9517_v5  ;;  %v9536_v5 = vld [vmem:[%s12038_s20 + $0x7e0] sm:$0xff]  }
 0xf50   :  { %9004 = vmatpush3.bf16.msra.mxu0 %v9518_v56  ;;  %8983 = vmatprep.subr.bf16.mxu1 %v9519_v62  ;;  %v9540_v56 = vld [vmem:[%s12038_s20 + $0x7d8] sm:$0xff]  }
 0xf51   :  { %9005 = vmatprep.subr.bf16.mxu0 %v9520_v16  ;;  %v9541_v62 = vld [vmem:[%s12038_s20 + $0x718] sm:$0xff]   ;;  %v9544_v16 = vld [vmem:[%s12038_s20 + $0x7d0] sm:$0xff]  }
 0xf53   :  { %8984 = vmatpush3.bf16.msra.mxu1 %v9521_v36  ;;  %v5329_v36 = vrot.slane %v11590_v19, %v10563_v0  ;;  %v9551_v0 = vld [vmem:[%s12038_s20 + $0x740] sm:$0xff]  }
 0xf54   :  { %9006 = vmatpush3.bf16.msra.mxu0 %v9522_v22  ;;  %9013 = vmatprep.subr.bf16.mxu1 %v9523_v14  ;;  %v9550_v14 = vld [vmem:[%s12038_s20 + $0x788] sm:$0xff]  }
 0xf55   :  { %9035 = vmatprep.subr.bf16.mxu0 %v9524_v2  ;;  %v5818_v22 = vadd.f32 %v11688_v38, %v5329_v36  ;;  %v5814_v19 = vadd.f32 %v11660_v48, %v5329_v36  ;;  %v5857_v38 = vadd.f32 %v11665_v26, %v5337_v63  ;;  %v9612_v26 = vld [vmem:[%s12063_s3 + $0x78] sm:$0xff] }
 0xf56   :  { %7143 = vmatmul.mubr.bf16.vlgmr.msra.gmra.mxu1 %v5905_v55  ;;  %v9613_v55 = vld [vmem:[%s12063_s3 + $0x70] sm:$0xff] }
 0xf57   :  { %7184 = vmatmul.mubr.bf16.vlgmr.msra.gmra.mxu0 %v5907_v17  ;;  %9014 = vmatpush3.bf16.msra.mxu1 %v9525_v37  ;;  %v5893_v2 = vmax.f32 %v5818_v22, 0.0  ;;  %v5877_v49 = vmax.f32 %v5814_v19, 0.0  ;;  %v5879_v6 = vmax.f32 %v5857_v38, 0.0  ;;  %v9616_v17 = vld [vmem:[%s12063_s3 + $0x58] sm:$0xff] }
 0xf58   :  { %7224 = vmatprep.mubr.bf16.mxu1 %v5910_v15  ;;  %9036 = vmatpush3.bf16.msra.mxu0 %v9526_v10  ;;  %v9615_v10 = vld [vmem:[%s12063_s3 + $0x60] sm:$0xff] }
 0xf59   :  { %7265 = vmatprep.mubr.bf16.mxu0 %v5912_v61  ;;  %9015 = vmatprep.subr.bf16.mxu1 %v9527_v32  ;;  %v5909_v48 = vpack.c.bf16 %v5893_v2, %v5877_v49  ;;  %v5911_v37 = vpack.c.bf16 %v5895_v47, %v5879_v6  ;;  %v9618_v32 = vld [vmem:[%s12063_s3 + $0x48] sm:$0xff]  ;;  %v9619_v15 = vld [vmem:[%s12063_s3 + $0x40] sm:$0xff]  ;;  %v9621_v61 = vld [vmem:[%s12063_s3 + $0x30] sm:$0xff] }
 0xf5a   :  { %9037 = vmatprep.subr.bf16.mxu0 %v9528_v30  ;;  %v9620_v30 = vld [vmem:[%s12063_s3 + $0x38] sm:$0xff] }
 0xf5b   :  { %9016 = vmatpush3.bf16.msra.mxu1 %v9529_v45  ;;  %v9622_v45 = vld [vmem:[%s12063_s3 + $0x28] sm:$0xff] }
 0xf5c   :  { %9038 = vmatpush3.bf16.msra.mxu0 %v9530_v25  ;;  %9017 = vmatprep.subr.bf16.mxu1 %v9531_v52  ;;  %v9623_v25 = vld [vmem:[%s12063_s3 + $0x20] sm:$0xff]  ;;  %v9624_v52 = vld [vmem:[%s12063_s3 + $0x18] sm:$0xff] }
 0xf5d   :  { %9039 = vmatprep.subr.bf16.mxu0 %v9532_v20  ;;  %v9625_v20 = vld [vmem:[%s12063_s3 + $0x10] sm:$0xff] }
 0xf5f   :  { %9018 = vmatpush3.bf16.msra.mxu1 %v9533_v58  ;;  %v7715_v58 = vpop.permute.xlu0 %7714 }
 0xf60   :  { %9040 = vmatpush3.bf16.msra.mxu0 %v9534_v27  ;;  %9019 = vmatprep.subr.bf16.mxu1 %v9535_v4  ;;  %v9626_v27 = vld [vmem:[%s12063_s3 + $0x8] sm:$0xff]  ;;  %v9627_v4 = vld [vmem:[%s12063_s3] sm:$0xff]  ;;  %vm7717_vm9 = vcmp.eq.s32.totalorder %v9840_v9, %v7715_v58 }
 0xf61   :  { %9041 = vmatprep.subr.bf16.mxu0 %v9536_v5  ;;  %v7800_v5 = vld [vmem:[%s12070_s19 + $0x18] sm:$0xff]  ;;  %v7797_v9 = vld [vmem:[%s12070_s19] sm:$0xff] }
 0xf63   :  { %9020 = vmatpush3.bf16.msra.mxu1 %v9537_v29  ;;  %v7799_v29 = vld [vmem:[%s12070_s19 + $0x10] sm:$0xff] }
 0xf64   :  { %9042 = vmatpush3.bf16.msra.mxu0 %v9538_v57  ;;  %9021 = vmatprep.subr.bf16.mxu1 %v9539_v11  ;;  %v7798_v57 = vld [vmem:[%s12070_s19 + $0x8] sm:$0xff] }
 0xf65   :  { %9043 = vmatprep.subr.bf16.mxu0 %v9540_v56 }
 0xf67   :  { %9022 = vmatpush3.bf16.msra.mxu1 %v9541_v62 }
 0xf68   :  { %9044 = vmatpush3.bf16.msra.mxu0 %v9542_v7  ;;  %9023 = vmatprep.subr.bf16.mxu1 %v9543_v39 }
 0xf69   :  { %9045 = vmatprep.subr.bf16.mxu0 %v9544_v16 }
 0xf6b   :  { %9024 = vmatpush3.bf16.msra.mxu1 %v9545_v3 }
 0xf6c   :  { %9046 = vmatpush3.bf16.msra.mxu0 %v9546_v34  ;;  %9025 = vmatprep.subr.bf16.mxu1 %v9547_v8 }
 0xf6d   :  { %9047 = vmatprep.subr.bf16.mxu0 %v9548_v54 }
 0xf6f   :  { %9026 = vmatpush3.bf16.msra.mxu1 %v9549_v40 }
 0xf70   :  { %9048 = vmatpush3.bf16.msra.mxu0 %v9550_v14  ;;  %9027 = vmatprep.subr.bf16.mxu1 %v9551_v0  ;;  %v8485_v0 = vld [vmem:[%s12039_s21 + $0x1] ss:$0 sm:$0xff] }
 0xf71   :  { %9049 = vmatprep.subr.bf16.mxu0 %v9552_v13 }
 0xf73   :  { %9028 = vmatpush3.bf16.msra.mxu1 %v9553_v33 }
 0xf74   :  { %9050 = vmatpush3.bf16.msra.mxu0 %v9554_v53  ;;  %9236 = vmatprep.subr.mxu1 %v9612_v26 }
 0xf75   :  { %9271 = vmatprep.subr.mxu0 %v7800_v5 }
 0xf76   :  { %7225 = vmatmul.mubr.bf16.vlgmr.msra.gmra.mxu1 %v5909_v48 }
 0xf77   :  { %7266 = vmatmul.mubr.bf16.vlgmr.msra.gmra.mxu0 %v5911_v37  ;;  %9237 = vmatpush3.msra.mxu1 %v9612_v26 }
 0xf78   :  { %9238 = vmatprep.subr.mxu1 %v9613_v55  ;;  %9268 = vmatprep.mubr.msk.f32.mxu1 %vm7716_vm8, %v9674_v23 }
 0xf79   :  { %9239 = vmatpush3.msra.mxu1 %v9613_v55  ;;  %9272 = vmatpush3.msra.mxu0 %v7800_v5 }
 0xf7a   :  { %9240 = vmatprep.subr.mxu1 %v9614_v1  ;;  %9273 = vmatprep.subr.mxu0 %v7799_v29 }
 0xf7b   :  { %9241 = vmatpush3.msra.mxu1 %v9614_v1  ;;  %9274 = vmatpush3.msra.mxu0 %v7799_v29 }
 0xf7c   :  { %9242 = vmatprep.subr.mxu1 %v9615_v10  ;;  %9275 = vmatprep.subr.mxu0 %v7798_v57 }
 0xf7d   :  { %9243 = vmatpush3.msra.mxu1 %v9615_v10  ;;  %9276 = vmatpush3.msra.mxu0 %v7798_v57 }
 0xf7e   :  { %9244 = vmatprep.subr.mxu1 %v9616_v17  ;;  %9277 = vmatprep.subr.mxu0 %v7797_v9 }
 0xf7f   :  { %9245 = vmatpush3.msra.mxu1 %v9616_v17  ;;  %9278 = vmatpush3.msra.mxu0 %v7797_v9 }
 0xf80   :  { %9246 = vmatprep.subr.mxu1 %v9617_v18 }
 0xf81   :  { %9247 = vmatpush3.msra.mxu1 %v9617_v18 }
 0xf82   :  { %9248 = vmatprep.subr.mxu1 %v9618_v32 }
 0xf83   :  { %9249 = vmatpush3.msra.mxu1 %v9618_v32 }
 0xf84   :  { %9250 = vmatprep.subr.mxu1 %v9619_v15 }
 0xf85   :  { %9251 = vmatpush3.msra.mxu1 %v9619_v15 }
 0xf86   :  { %9252 = vmatprep.subr.mxu1 %v9620_v30 }
 0xf87   :  { %9253 = vmatpush3.msra.mxu1 %v9620_v30 }
 0xf88   :  { %9254 = vmatprep.subr.mxu1 %v9621_v61 }
 0xf89   :  { %9255 = vmatpush3.msra.mxu1 %v9621_v61 }
 0xf8a   :  { %9256 = vmatprep.subr.mxu1 %v9622_v45 }
 0xf8b   :  { %9257 = vmatpush3.msra.mxu1 %v9622_v45 }
 0xf8c   :  { %9258 = vmatprep.subr.mxu1 %v9623_v25 }
 0xf8d   :  { %9259 = vmatpush3.msra.mxu1 %v9623_v25 }
 0xf8e   :  { %9260 = vmatprep.subr.mxu1 %v9624_v52 }
 0xf8f   :  { %9261 = vmatpush3.msra.mxu1 %v9624_v52 }
 0xf90   :  { %9262 = vmatprep.subr.mxu1 %v9625_v20 }
 0xf91   :  { %9263 = vmatpush3.msra.mxu1 %v9625_v20 }
 0xf92   :  { %9264 = vmatprep.subr.mxu1 %v9626_v27 }
 0xf93   :  { %9265 = vmatpush3.msra.mxu1 %v9626_v27 }
 0xf94   :  { %9266 = vmatprep.subr.mxu1 %v9627_v4 }
 0xf95   :  { %9267 = vmatpush3.msra.mxu1 %v9627_v4 }
 0xf96   :  { %9269 = vmatmul.mubr.msk.f32.vlgmr.msra.gmra.mxu1 %vm7717_vm9, %v9674_v23 }
 0xfd6   :  { %v8897_v23 = vpop.f32.mrf.mxu1  ;;  %v8919_v11 = vpop.f32.mrf.mxu0 }
 0xfd8   :  { %v8898_v56 = vpop.f32.mrf.mxu1  ;;  %v8920_v62 = vpop.f32.mrf.mxu0 }
 0xfd9   :  { %v8899_v14 = vadd.f32 %v8898_v56, %v8897_v23  ;;  %v8921_v53 = vadd.f32 %v8920_v62, %v8919_v11 }
 0xfda   :  { %v8900_v7 = vpop.f32.mrf.mxu1  ;;  %v8922_v39 = vpop.f32.mrf.mxu0 }
 0xfdb   :  { %v6981_v19 = vadd.f32 %v8899_v14, %v8485_v0 }
 0xfdc   :  { %v8901_v16 = vpop.f32.mrf.mxu1  ;;  %v8923_v34 = vpop.f32.mrf.mxu0 }
 0xfdd   :  { %v8902_v38 = vadd.f32 %v8901_v16, %v8900_v7  ;;  %v7022_v49 = vadd.f32 %v8921_v53, %v6981_v19  ;;  %v8924_v26 = vadd.f32 %v8923_v34, %v8922_v39 }
 0xfdf   :  { %v6984_v35 = vadd.f32 %v8902_v38, %v8485_v0 }
 0xfe1   :  { %v7025_v1 = vadd.f32 %v8924_v26, %v6984_v35 }
 0xff6   :  { %v8941_v3 = vpop.f32.mrf.mxu1  ;;  %v8963_v8 = vpop.f32.mrf.mxu0 }
 0xff8   :  { %v8942_v54 = vpop.f32.mrf.mxu1  ;;  %v8964_v36 = vpop.f32.mrf.mxu0 }
 0xff9   :  { %v8943_v47 = vadd.f32 %v8942_v54, %v8941_v3  ;;  %v8965_v10 = vadd.f32 %v8964_v36, %v8963_v8 }
 0xffa   :  { %v8944_v63 = vpop.f32.mrf.mxu1  ;;  %v8966_v40 = vpop.f32.mrf.mxu0 }
 0xffb   :  { %v7063_v37 = vadd.f32 %v8943_v47, %v7022_v49 }
 0xffc   :  { %v8945_v22 = vpop.f32.mrf.mxu1  ;;  %v8967_v13 = vpop.f32.mrf.mxu0 }
 0xffd   :  { %v8946_v55 = vadd.f32 %v8945_v22, %v8944_v63  ;;  %v7104_v15 = vadd.f32 %v8965_v10, %v7063_v37  ;;  %v8968_v61 = vadd.f32 %v8967_v13, %v8966_v40 }
 0xfff   :  { %v7066_v30 = vadd.f32 %v8946_v55, %v7025_v1 }
0x1001   :  { %v7107_v58 = vadd.f32 %v8968_v61, %v7066_v30 }
0x1016   :  { %v8985_v21 = vpop.f32.mrf.mxu1 }
0x1017   :  { %v9007_v33 = vpop.f32.mrf.mxu0 }
0x1018   :  { %v8986_v2 = vpop.f32.mrf.mxu1 }
0x1019   :  { %v9008_v6 = vpop.f32.mrf.mxu0  ;;  %v8987_v17 = vadd.f32 %v8986_v2, %v8985_v21 }
0x101a   :  { %v8988_v48 = vpop.f32.mrf.mxu1  ;;  %v9009_v27 = vadd.f32 %v9008_v6, %v9007_v33 }
0x101b   :  { %v9010_v18 = vpop.f32.mrf.mxu0  ;;  %v7145_v45 = vadd.f32 %v8987_v17, %v7104_v15 }
0x101c   :  { %v8989_v32 = vpop.f32.mrf.mxu1 }
0x101d   :  { %v8990_v25 = vadd.f32 %v8989_v32, %v8988_v48  ;;  %v9011_v52 = vpop.f32.mrf.mxu0  ;;  %v7186_v29 = vadd.f32 %v9009_v27, %v7145_v45 }
0x101e   :  { %v9012_v56 = vadd.f32 %v9011_v52, %v9010_v18 }
0x101f   :  { %v7148_v57 = vadd.f32 %v8990_v25, %v7107_v58 }
0x1021   :  { %v7189_v3 = vadd.f32 %v9012_v56, %v7148_v57 }
0x1036   :  { %v9029_v20 = vpop.f32.mrf.mxu1 }
0x1037   :  { %v9051_v4 = vpop.f32.mrf.mxu0 }
0x1038   :  { %v9030_v5 = vpop.f32.mrf.mxu1 }
0x1039   :  { %v9031_v9 = vadd.f32 %v9030_v5, %v9029_v20  ;;  %v9052_v23 = vpop.f32.mrf.mxu0 }
0x103a   :  { %v9032_v11 = vpop.f32.mrf.mxu1  ;;  %v9053_v7 = vadd.f32 %v9052_v23, %v9051_v4 }
0x103b   :  { %v7227_v62 = vadd.f32 %v9031_v9, %v7186_v29  ;;  %v9054_v39 = vpop.f32.mrf.mxu0 }
0x103c   :  { %v9033_v16 = vpop.f32.mrf.mxu1 }
0x103d   :  { %v7268_v34 = vadd.f32 %v9053_v7, %v7227_v62  ;;  %v9034_v8 = vadd.f32 %v9033_v16, %v9032_v11  ;;  %v9055_v54 = vpop.f32.mrf.mxu0 }
0x103e   :  { %v9056_v22 = vadd.f32 %v9055_v54, %v9054_v39 }
0x103f   :  { %v7276_v36 = vcombine.high %v7268_v34, %v7268_v34  ;;  %v7283_v63 = vrot.slane %v7268_v34, %v9923_v51  ;;  %v7230_v40 = vadd.f32 %v9034_v8, %v7189_v3 }
0x1041   :  { %v7290_v14 = vrot.slane %v7276_v36, %v9923_v51  ;;  %v7291_v0 = vcombine.high %v7283_v63, %v7283_v63  ;;  %v7271_v21 = vadd.f32 %v9056_v22, %v7230_v40  ;;  %v7318_v2 = vadd.f32 %v7283_v63, %v11255_v59 }
0x1043   :  { %v7292_v13 = vcombine.high %v7290_v14, %v7290_v14  ;;  %v7293_v19 = vcombine.high %v7271_v21, %v7271_v21  ;;  %v7300_v38 = vrot.slane %v7271_v21, %v9923_v51  ;;  %v7319_v33 = vadd.f32 %v7291_v0, %v11257_v24 }
0x1044   :  { %v7320_v49 = vadd.f32 %v7290_v14, %v11259_v60 }
0x1045   :  { %v7307_v53 = vrot.slane %v7293_v19, %v9923_v51  ;;  %v7308_v47 = vcombine.high %v7300_v38, %v7300_v38  ;;  %v7321_v35 = vadd.f32 %v7292_v13, %v11261_v46  ;;  %v7334_v6 = vcombine.low %v7318_v2, %v7319_v33 }
0x1046   :  { %v7322_v26 = vadd.f32 %v7300_v38, %v11267_v50 }
0x1047   :  { %v7309_v48 = vcombine.high %v7307_v53, %v7307_v53  ;;  %v7335_v37 = vcombine.low %v7320_v49, %v7321_v35  ;;  %v7323_v55 = vadd.f32 %v7308_v47, %v11269_v31  ;;  %v7324_v1 = vadd.f32 %v7307_v53, %v11271_v28 }
0x1048   :  { %v7342_v24 = vrot.slane %v7334_v6, %v9923_v51  ;;  %v8622_v6 = vld [vmem:[%s12071_s0] ss:$0 sm:$0xff] }
0x1049   :  { %v7349_v59 = vrot.slane %v7335_v37, %v9923_v51  ;;  %v7325_v10 = vadd.f32 %v7309_v48, %v11273_v12  ;;  %v7351_v17 = vcombine.low %v7322_v26, %v7323_v55 }
0x104b   :  { %v7350_v18 = vcombine.low %v7342_v24, %v7349_v59  ;;  %v7352_v60 = vcombine.low %v7324_v1, %v7325_v10  ;;  %v7359_v32 = vrot.slane %v7351_v17, %v9923_v51 }
0x104d   :  { %v7370_v46 = vsel %vm348_vm3, %v7350_v18, 0.0  ;;  %v7366_v50 = vrot.slane %v7352_v60, %v9923_v51 }
0x104e   :  { %7371 = vadd.xlane.f32.xlu1 %v7370_v46 }
0x104f   :  { %v7367_v15 = vcombine.low %v7359_v32, %v7366_v50 }
0x1051   :  { %v7373_v31 = vsel %vm348_vm3, %v7367_v15, 0.0 }
0x1052   :  { %7374 = vadd.xlane.f32.xlu0 %v7373_v31 }
0x1056   :  { %v9270_v28 = vpop.f32.mrf.mxu1 }
0x1058   :  { %v7788_v30 = vpop.f32.mrf.mxu1 }
0x1059   :  { %9279 = vmatprep.mubr.msk.f32.mxu0 %vm348_vm3, %v7788_v30 }
0x105a   :  { %9280 = vmatmul.mubr.msk.f32.vlgmr.msra.gmra.mxu0 %vm348_vm3, %v9270_v28 }
0x10d7   :  { %v7372_v12 = vpop.xlane.xlu1 %7371 }
0x10d8   :  { %v7376_v61 = vmul.f32 0.03125, %v7372_v12 }
0x10da   :  { %v7386_v45 = vrot.slane %v7376_v61, %v10103_v41  ;;  %v7393_v25 = vrot.slane %v7376_v61, %v10106_v42  ;;  %v7400_v52 = vrot.slane %v7376_v61, %v10109_v43  ;;  %v7407_v20 = vrot.slane %v7376_v61, %v10112_v44 }
0x10db   :  { %v7375_v58 = vpop.xlane.xlu0 %7374 }
0x10dc   :  { %v7377_v27 = vmul.f32 0.03125, %v7375_v58  ;;  %v11929_v4 = vsub.f32 %v7318_v2, %v7386_v45  ;;  %v11931_v5 = vsub.f32 %v7319_v33, %v7393_v25  ;;  %v11933_v29 = vsub.f32 %v7320_v49, %v7400_v52 }
0x10dd   :  { %v11935_v57 = vsub.f32 %v7321_v35, %v7407_v20 }
0x10de   :  { %v7414_v9 = vrot.slane %v7377_v27, %v10103_v41  ;;  %v7421_v23 = vrot.slane %v7377_v27, %v10106_v42  ;;  %v7428_v11 = vrot.slane %v7377_v27, %v10109_v43  ;;  %v7435_v56 = vrot.slane %v7377_v27, %v10112_v44 }
0x10df   :  { %v7452_v62 = vmul.f32 %v11929_v4, %v11929_v4  ;;  %v7453_v7 = vmul.f32 %v11931_v5, %v11931_v5  ;;  %v7454_v39 = vmul.f32 %v11933_v29, %v11933_v29  ;;  %v7455_v16 = vmul.f32 %v11935_v57, %v11935_v57 }
0x10e0   :  { %v11949_v3 = vsub.f32 %v7322_v26, %v7414_v9  ;;  %v11951_v34 = vsub.f32 %v7323_v55, %v7421_v23  ;;  %v11953_v8 = vsub.f32 %v7324_v1, %v7428_v11  ;;  %v11955_v54 = vsub.f32 %v7325_v10, %v7435_v56 }
0x10e1   :  { %v7468_v36 = vcombine.low %v7452_v62, %v7453_v7  ;;  %v7469_v63 = vcombine.low %v7454_v39, %v7455_v16 }
0x10e2   :  { %v7456_v40 = vmul.f32 %v11949_v3, %v11949_v3  ;;  %v7457_v22 = vmul.f32 %v11951_v34, %v11951_v34  ;;  %v7458_v14 = vmul.f32 %v11953_v8, %v11953_v8  ;;  %v7459_v0 = vmul.f32 %v11955_v54, %v11955_v54 }
0x10e3   :  { %v7476_v21 = vrot.slane %v7468_v36, %v9923_v51  ;;  %v7483_v13 = vrot.slane %v7469_v63, %v9923_v51 }
0x10e4   :  { %v7485_v19 = vcombine.low %v7456_v40, %v7457_v22  ;;  %v7486_v38 = vcombine.low %v7458_v14, %v7459_v0 }
0x10e5   :  { %v7484_v33 = vcombine.low %v7476_v21, %v7483_v13 }
0x10e6   :  { %v7493_v2 = vrot.slane %v7485_v19, %v9923_v51  ;;  %v7500_v53 = vrot.slane %v7486_v38, %v9923_v51 }
0x10e7   :  { %v7504_v47 = vsel %vm348_vm3, %v7484_v33, 0.0 }
0x10e8   :  { %7505 = vadd.xlane.f32.xlu1 %v7504_v47  ;;  %v7501_v49 = vcombine.low %v7493_v2, %v7500_v53 }
0x10ea   :  { %v7507_v35 = vsel %vm348_vm3, %v7501_v49, 0.0 }
0x10eb   :  { %7508 = vadd.xlane.f32.xlu0 %v7507_v35 }
0x111a   :  { %v9281_v48 = vpop.f32.mrf.mxu0 }
0x111b   :  { %v7886_v26 = vadd.f32 %v9281_v48, %v8622_v6 }
0x111c   :  { %v7880_v37 = vpop.f32.mrf.mxu0 }
0x111d   :  { %7890 = vst [vmem:[#allocation2 + $0x8] sm:$0xff] %v7886_v26  ;;  %v7881_v55 = vadd.f32 %v8622_v6, %v7880_v37 }
0x111f   :  { %7889 = vst [vmem:[#allocation2] sm:$0xff] %v7881_v55 }
0x1120   :  { %9639 = shalt.err (!%p9636_p4)
}
0x1121   :  { %s9683_s16 = smov 128   ;;  %s9684_s17 = smov 8   ;;  %v8615_v60 = vld [vmem:[%s12040_s22 + $0x1] ss:$0 sm:$0xff] }
0x1122   :  { %7902 = dma.vmem_to_hbm [thread:$0]  %s7897_s28, 256, %s12042_s24, [#allocation3], %s9683_s16, %s9683_s16, %s9684_s17   ;;  %v7597_v32 = vcombine.high %v8615_v60, %v8615_v60  ;;  %v7604_v15 = vrot.slane %v8615_v60, %v9923_v51 }
0x1123   :  { %v8617_v46 = vld [vmem:[%s12041_s23 + $0x1] ss:$0 sm:$0xff]  ;;  %s9685_s22 = smov [#allocation4]  }
0x1124   :  { %v7633_v50 = vcombine.high %v8617_v46, %v8617_v46  ;;  %v7611_v31 = vrot.slane %v7597_v32, %v9923_v51  ;;  %v7640_v28 = vrot.slane %v8617_v46, %v9923_v51  ;;  %v7612_v61 = vcombine.high %v7604_v15, %v7604_v15  ;;  %s7908_s23 = sshll.u32 %s9685_s22, 4  ;;  %s7909_s23 = int_to_ptr.vmem [resolvable:$true] %s7908_s23 }
0x1125   :  { %s9648_s24 = scalar_lea.vmem %s7909_s23, 256  ;;  %p9653_p6 = scmp.lt.s32.totalorder %s7909_s23, %s7909_s23 }
0x1126   :  { %v7647_v30 = vrot.slane %v7633_v50, %v9923_v51  ;;  %v7613_v45 = vcombine.high %v7611_v31, %v7611_v31  ;;  %v7648_v27 = vcombine.high %v7640_v28, %v7640_v28  ;;  %p9649_p5 = scmp.ne.s32.totalorder %s7909_s23, %s9648_s24  ;;  %p9654_p7 = scmp.lt.s32.totalorder %s9648_s24, %s9648_s24 }
0x1128   :  { %v7649_v9 = vcombine.high %v7647_v30, %v7647_v30  ;;  %p9655_p8 = por %p9654_p7, %p9653_p6 }
0x112a   :  { %p9656_p9 = pnand %p9655_p8, %p9649_p5 }
0x1171   :  { %v7506_v1 = vpop.xlane.xlu1 %7505 }
0x1172   :  { %v7510_v24 = vmul.f32 0.03125, %v7506_v1 }
0x1174   :  { %v7512_v59 = vadd.f32 1e-05, %v7510_v24  ;;  %v7509_v10 = vpop.xlane.xlu0 %7508 }
0x1175   :  { %v7511_v17 = vmul.f32 0.03125, %v7509_v10 }
0x1176   :  { %9603 = vrsqrt.f32 %v7512_v59 }
0x1177   :  { %v7513_v18 = vadd.f32 1e-05, %v7511_v17 }
0x1179   :  { %9605 = vrsqrt.f32 %v7513_v18 }
0x1183   :  { %v9604_v12 = vpop.eup %9603 }
0x1184   :  { %v7524_v25 = vrot.slane %v9604_v12, %v10103_v41  ;;  %v7531_v52 = vrot.slane %v9604_v12, %v10106_v42  ;;  %v7538_v20 = vrot.slane %v9604_v12, %v10109_v43  ;;  %v7545_v58 = vrot.slane %v9604_v12, %v10112_v44 }
0x1186   :  { %v9606_v23 = vpop.eup %9605  ;;  %v7582_v11 = vmul.f32 %v7524_v25, %v11929_v4  ;;  %v7583_v56 = vmul.f32 %v7531_v52, %v11931_v5  ;;  %v7584_v62 = vmul.f32 %v7538_v20, %v11933_v29  ;;  %v7585_v7 = vmul.f32 %v7545_v58, %v11935_v57 }
0x1187   :  { %v7552_v39 = vrot.slane %v9606_v23, %v10103_v41  ;;  %v7559_v16 = vrot.slane %v9606_v23, %v10106_v42  ;;  %v7566_v36 = vrot.slane %v9606_v23, %v10109_v43  ;;  %v7573_v63 = vrot.slane %v9606_v23, %v10112_v44 }
0x1188   :  { %v7618_v40 = vmul.f32 %v7604_v15, %v7582_v11  ;;  %v7619_v22 = vmul.f32 %v7612_v61, %v7583_v56  ;;  %v7620_v14 = vmul.f32 %v7611_v31, %v7584_v62  ;;  %v7621_v0 = vmul.f32 %v7613_v45, %v7585_v7 }
0x1189   :  { %v7586_v4 = vmul.f32 %v7552_v39, %v11949_v3  ;;  %v7587_v5 = vmul.f32 %v7559_v16, %v11951_v34  ;;  %v7588_v29 = vmul.f32 %v7566_v36, %v11953_v8  ;;  %v7589_v57 = vmul.f32 %v7573_v63, %v11955_v54 }
0x118a   :  { %v7654_v21 = vadd.f32 %v7640_v28, %v7618_v40  ;;  %v7655_v41 = vadd.f32 %v7648_v27, %v7619_v22  ;;  %v7656_v13 = vadd.f32 %v7647_v30, %v7620_v14  ;;  %v7657_v42 = vadd.f32 %v7649_v9, %v7621_v0 }
0x118b   :  { %v7622_v19 = vmul.f32 %v7604_v15, %v7586_v4  ;;  %v7623_v43 = vmul.f32 %v7612_v61, %v7587_v5  ;;  %v7624_v38 = vmul.f32 %v7611_v31, %v7588_v29  ;;  %v7625_v44 = vmul.f32 %v7613_v45, %v7589_v57 }
0x118c   :  { %v7670_v33 = vcombine.low %v7654_v21, %v7655_v41  ;;  %v7671_v2 = vcombine.low %v7656_v13, %v7657_v42 }
0x118d   :  { %v7658_v53 = vadd.f32 %v7640_v28, %v7622_v19  ;;  %v7659_v47 = vadd.f32 %v7648_v27, %v7623_v43  ;;  %v7660_v49 = vadd.f32 %v7647_v30, %v7624_v38  ;;  %v7661_v3 = vadd.f32 %v7649_v9, %v7625_v44 }
0x118e   :  { %v7678_v34 = vrot.slane %v7670_v33, %v9923_v51  ;;  %v7685_v8 = vrot.slane %v7671_v2, %v9923_v51 }
0x118f   :  { %v7687_v35 = vcombine.low %v7658_v53, %v7659_v47  ;;  %v7688_v54 = vcombine.low %v7660_v49, %v7661_v3 }
0x1190   :  { %v7686_v6 = vcombine.low %v7678_v34, %v7685_v8 }
0x1191   :  { %v7695_v48 = vrot.slane %v7687_v35, %v9923_v51  ;;  %v7702_v26 = vrot.slane %v7688_v54, %v9923_v51 }
0x1192   :  { %7706 = vst.msk [vmem:[#allocation4] sm:$0xff] %vm348_vm3, %v7686_v6 }
0x1193   :  { %v7703_v37 = vcombine.low %v7695_v48, %v7702_v26 }
0x1195   :  { %7707 = vst.msk [vmem:[#allocation4 + $0x8] sm:$0xff] %vm348_vm3, %v7703_v37 }
0x1196   :  { %9659 = shalt.err (!%p9656_p9)
}
0x1197   :  { %7914 = dma.vmem_to_hbm [thread:$0]  %s7909_s23, 256, %s12043_s25, [#allocation5], %s9683_s16, %s9683_s16, %s9684_s17  }
0x1198   :  { %9668 = dma.done.wait [#allocation3], 256  }
0x1199   :  { %9669 = vsyncadd [#allocation3], 4294967040 }
0x119a   :  { %9670 = dma.done.wait [#allocation5], 256  }
0x119b   :  { %9671 = vsyncadd [#allocation5], 4294967040 }
0x119c   :  { %7921 = vsyncpa [#allocation3], 1 }
0x119d   :  { %7922 = vsyncpa [#allocation5], 1 }

</bundles_post_ra>
